<compile_context>
chip_gen: v7x
topology: tpu7x:2x2x1
jax: 0.10.0
libtpu: 0.0.40
codegen_flags: <defaults>
</compile_context>

<pallas_src>
import jax
import jax.numpy as jnp
from jax import lax
from jax.experimental import pallas as pl
from jax.experimental.pallas import tpu as pltpu

CIN_A = 256        # channels coming from upsampled x15
CIN_B = 128        # channels coming from x8
C1 = 128           # conv_dec1[1] out channels
C2 = 128           # conv_dec1[3] out channels
KH = KW = 3


def _round_up(x, m):
    return (x + m - 1) // m * m


def _zero_halo(ref, hp, wp):
    """Zero rows 0 / hp+1 and columns [wp, Wf) of a (hp+2, Wf, C) scratch."""
    wf, c = ref.shape[1], ref.shape[2]
    ref[0] = jnp.zeros((wf, c), jnp.float32)
    ref[hp + 1] = jnp.zeros((wf, c), jnp.float32)
    ref[:, wp:wf, :] = jnp.zeros((hp + 2, wf - wp, c), jnp.float32)


def _conv3x3_flat(make_lhs, m, cout):
    """SAME 3x3 conv in flat (Hp*Wf) row form.

    make_lhs(ky) returns a list of (lhs, w_ref) pairs where lhs is the (m, cin)
    matrix whose flat row Y*Wf + x holds the zero-padded input at spatial row
    (Y + ky - 1) and column x, and w_ref is the (3, 3, cin, cout) HWIO weight.
    Only flat columns x < Wp of the result are valid.
    """
    accs = [jnp.zeros((m, cout), jnp.float32) for _ in range(KW)]
    for ky in range(KH):
        for lhs, w_ref in make_lhs(ky):
            for kx in range(KW):
                accs[kx] += jnp.dot(lhs, w_ref[ky, kx],
                                    preferred_element_type=jnp.float32)
    # Combine the three kernel-column taps: out[b] = accs[0][b-1] + accs[1][b]
    # + accs[2][b+1].  Rows brought in by the circular wrap always come from a
    # zeroed / discarded pad column, so a plain roll is exact.
    return (jnp.roll(accs[0], 1, axis=0)
            + accs[1]
            + jnp.roll(accs[2], -1, axis=0))


def _decoder4_kernel(xw_ref, x8_ref, w1a_ref, w1b_ref, w2_ref, o_ref,
                     apad_ref, bpad_ref, ypad_ref):
    # Per grid step (one batch sample):
    #   xw_ref : (1, H, Wp, 256)  x15 after NCHW->NHWC + 2x W-upsample (wrapper)
    #   x8_ref : (1, Hp, Wp, 128)
    #   w*_ref : (3, 3, Cin, Cout) HWIO
    #   o_ref  : (1, Hp, Wp, 128)
    # Scratch (padded, ReLU'd conv inputs; halo exists only in VMEM):
    #   apad_ref: (Hp+2, Wf, 256), bpad_ref: (Hp+2, Wf, 128), ypad_ref: (Hp+2, Wf, 128)
    h = xw_ref.shape[1]
    hp, wp = o_ref.shape[1], o_ref.shape[2]
    wf = apad_ref.shape[1]
    m = hp * wf

    # ---- build padded conv1 inputs (ReLU hoisted, applied exactly once) ----
    _zero_halo(apad_ref, hp, wp)
    _zero_halo(bpad_ref, hp, wp)
    xr = jnp.maximum(xw_ref[0], 0.0)                                  # (H, Wp, 256)
    # nearest 2x upsample along H: leading-dim broadcast + reshape (layout-free)
    up = jnp.broadcast_to(xr[:, None, :, :], (h, 2, wp, CIN_A)).reshape(hp, wp, CIN_A)
    apad_ref[1:hp + 1, 0:wp, :] = up
    bpad_ref[1:hp + 1, 0:wp, :] = jnp.maximum(x8_ref[0], 0.0)

    # ---- conv1: 3x3, (256 + 128) -> 128, concat folded into split weights ----
    def conv1_lhs(ky):
        a = apad_ref[ky:ky + hp, :, :].reshape(m, CIN_A)
        b = bpad_ref[ky:ky + hp, :, :].reshape(m, CIN_B)
        return [(a, w1a_ref), (b, w1b_ref)]

    y1 = _conv3x3_flat(conv1_lhs, m, C1)
    y1 = jnp.maximum(y1, 0.0).reshape(hp, wf, C1)                     # ReLU after conv1

    # ---- conv2 input: ReLU(conv1) back into a zero-padded VMEM scratch ----
    ypad_ref[0] = jnp.zeros((wf, C1), jnp.float32)
    ypad_ref[hp + 1] = jnp.zeros((wf, C1), jnp.float32)
    ypad_ref[1:hp + 1, :, :] = y1                                     # aligned full-width store
    ypad_ref[:, wp:wf, :] = jnp.zeros((hp + 2, wf - wp, C1), jnp.float32)

    # ---- conv2: 3x3, 128 -> 128 ----
    def conv2_lhs(ky):
        return [(ypad_ref[ky:ky + hp, :, :].reshape(m, C1), w2_ref)]

    y2 = _conv3x3_flat(conv2_lhs, m, C2)
    y2 = y2.reshape(hp, wf, C2)[:, 0:wp, :]                           # drop pad columns

    # ---- per-sample L2 norm over C*H*W (F.normalize, eps=1e-12) ----
    ssq = jnp.sum(y2 * y2)
    scale = lax.rsqrt(jnp.maximum(ssq, jnp.float32(1e-24)))           # 1/max(||y||, 1e-12)
    o_ref[0] = y2 * scale


def decoder4_forward(x15, x8, w1_oihw, w2_oihw):
    """x15: (B,256,H,W), x8: (B,128,2H,2W), weights in PyTorch OIHW. Returns NCHW."""
    B, _, H, W = x15.shape
    Hp, Wp = 2 * H, 2 * W
    Wf = _round_up(Wp + 1, 8)        # scratch width: >= Wp+1, sublane aligned

    # Minimal XLA glue (fused copies): NCHW->NHWC (+ 2x W-upsample of x15 only).
    x15n = jnp.transpose(x15, (0, 2, 3, 1)).astype(jnp.float32)       # (B,H,W,256)
    xw = jnp.repeat(x15n, 2, axis=2)                                  # (B,H,Wp,256)
    x8n = jnp.transpose(x8, (0, 2, 3, 1)).astype(jnp.float32)         # (B,Hp,Wp,128)

    w1 = jnp.transpose(w1_oihw, (2, 3, 1, 0)).astype(jnp.float32)     # OIHW -> HWIO
    w1a = w1[:, :, :CIN_A, :]                                         # applies to up(x15)
    w1b = w1[:, :, CIN_A:, :]                                         # applies to x8
    w2 = jnp.transpose(w2_oihw, (2, 3, 1, 0)).astype(jnp.float32)

    fused = pl.pallas_call(
        _decoder4_kernel,
        out_shape=jax.ShapeDtypeStruct((B, Hp, Wp, C2), jnp.float32),
        grid_spec=pltpu.PrefetchScalarGridSpec(
            num_scalar_prefetch=0,
            grid=(B,),
            in_specs=[
                pl.BlockSpec((1, H, Wp, CIN_A), lambda b: (b, 0, 0, 0)),
                pl.BlockSpec((1, Hp, Wp, CIN_B), lambda b: (b, 0, 0, 0)),
                pl.BlockSpec((KH, KW, CIN_A, C1), lambda b: (0, 0, 0, 0)),
                pl.BlockSpec((KH, KW, CIN_B, C1), lambda b: (0, 0, 0, 0)),
                pl.BlockSpec((KH, KW, C1, C2), lambda b: (0, 0, 0, 0)),
            ],
            out_specs=pl.BlockSpec((1, Hp, Wp, C2), lambda b: (b, 0, 0, 0)),
            scratch_shapes=[
                pltpu.VMEM((Hp + 2, Wf, CIN_A), jnp.float32),   # padded ReLU(up(x15))
                pltpu.VMEM((Hp + 2, Wf, CIN_B), jnp.float32),   # padded ReLU(x8)
                pltpu.VMEM((Hp + 2, Wf, C1), jnp.float32),      # padded ReLU(conv1)
            ],
        ),
        compiler_params=pltpu.CompilerParams(dimension_semantics=("parallel",)),
    )
    out_nhwc = fused(xw, x8n, w1a, w1b, w2)                           # (B,Hp,Wp,128)
    return jnp.transpose(out_nhwc, (0, 3, 1, 2))                      # back to NCHW


def decoder4_reference(x15, x8, w1_oihw, w2_oihw):
    """Pure-JAX reference matching the PyTorch module semantics."""
    x16 = jnp.repeat(jnp.repeat(x15, 2, axis=2), 2, axis=3)
    x17 = jnp.concatenate([x16, x8], axis=1)
    x = jnp.maximum(x17, 0.0)
    y = lax.conv_general_dilated(x, w1_oihw, (1, 1), 'SAME',
                                 dimension_numbers=('NCHW', 'OIHW', 'NCHW'))
    y = jnp.maximum(y, 0.0)
    y = lax.conv_general_dilated(y, w2_oihw, (1, 1), 'SAME',
                                 dimension_numbers=('NCHW', 'OIHW', 'NCHW'))
    B = y.shape[0]
    flat = y.reshape(B, -1)
    nrm = jnp.maximum(jnp.sqrt(jnp.sum(flat * flat, axis=1, keepdims=True)), 1e-12)
    return (flat / nrm).reshape(y.shape)


if __name__ == "__main__":
    # Channel counts are fixed by the module (384->128->128); batch/spatial kept small.
    # (self.max_pool / self.relu are defined in __init__ but unused in forward.)
    key = jax.random.PRNGKey(0)
    k1, k2, k3, k4 = jax.random.split(key, 4)
    B, H, W = 2, 4, 4
    x15 = jax.random.normal(k1, (B, 256, H, W), jnp.float32)
    x8 = jax.random.normal(k2, (B, 128, 2 * H, 2 * W), jnp.float32)
    w1 = jax.random.normal(k3, (C1, CIN_A + CIN_B, KH, KW), jnp.float32) * 0.05
    w2 = jax.random.normal(k4, (C2, C1, KH, KW), jnp.float32) * 0.05

    out = jax.jit(decoder4_forward)(x15, x8, w1, w2)
    out = jax.block_until_ready(out)

    ref = decoder4_reference(x15, x8, w1, w2)
    assert out.shape == (B, 128, 2 * H, 2 * W), out.shape
    max_err = float(jnp.max(jnp.abs(out - ref)))
    assert jnp.allclose(out, ref, atol=5e-5, rtol=5e-5), f"max abs err {max_err}"
    print("KERNEL_OK")
</pallas_src>

<mosaic_0001>
module attributes {stable_mosaic.version = 11 : i64} {
  func.func @_decoder4_kernel(%arg0: i32, %arg1: memref<1x4x8x256xf32, #tpu.memory_space<vmem>>, %arg2: memref<1x8x8x128xf32, #tpu.memory_space<vmem>>, %arg3: memref<3x3x256x128xf32, #tpu.memory_space<vmem>>, %arg4: memref<3x3x128x128xf32, #tpu.memory_space<vmem>>, %arg5: memref<3x3x128x128xf32, #tpu.memory_space<vmem>>, %arg6: memref<1x8x8x128xf32, #tpu.memory_space<vmem>>, %arg7: memref<10x16x256xf32, #tpu.memory_space<vmem>>, %arg8: memref<10x16x128xf32, #tpu.memory_space<vmem>>, %arg9: memref<10x16x128xf32, #tpu.memory_space<vmem>>) attributes {dimension_semantics = [#tpu.dimension_semantics<parallel>], iteration_bounds = array<i64: 2>, scalar_prefetch = 0 : i64, scratch_operands = 3 : i64, tpu.core_type = #tpu.core_type<tc>, window_params = [{transform_indices = @transform_0, window_bounds = array<i64: 1, 4, 8, 256>}, {transform_indices = @transform_1, window_bounds = array<i64: 1, 8, 8, 128>}, {pipeline_mode = #tpu.pipeline_mode<synchronous>, transform_indices = @transform_2, window_bounds = array<i64: 3, 3, 256, 128>}, {pipeline_mode = #tpu.pipeline_mode<synchronous>, transform_indices = @transform_3, window_bounds = array<i64: 3, 3, 128, 128>}, {pipeline_mode = #tpu.pipeline_mode<synchronous>, transform_indices = @transform_4, window_bounds = array<i64: 3, 3, 128, 128>}, {transform_indices = @transform_5, window_bounds = array<i64: 1, 8, 8, 128>}]} {
    %cst = arith.constant 0.000000e+00 : f32
    %0 = vector.broadcast %cst : f32 to vector<16x256xf32>
    %c0 = arith.constant 0 : index
    %c0_0 = arith.constant 0 : index
    %c0_1 = arith.constant 0 : index
    %1 = vector.load %arg7[%c0, %c0_0, %c0_1] : memref<10x16x256xf32, #tpu.memory_space<vmem>>, vector<1x16x256xf32>
    %2 = vector.shape_cast %1 : vector<1x16x256xf32> to vector<16x256xf32>
    %3 = vector.shape_cast %0 : vector<16x256xf32> to vector<1x16x256xf32>
    tpu.vector_store %arg7[%c0, %c0_0, %c0_1], %3 {strides = array<i32>} : memref<10x16x256xf32, #tpu.memory_space<vmem>>, vector<1x16x256xf32>,
    %cst_2 = arith.constant 0.000000e+00 : f32
    %4 = vector.broadcast %cst_2 : f32 to vector<16x256xf32>
    %c9 = arith.constant 9 : index
    %c0_3 = arith.constant 0 : index
    %c0_4 = arith.constant 0 : index
    %5 = vector.load %arg7[%c9, %c0_3, %c0_4] : memref<10x16x256xf32, #tpu.memory_space<vmem>>, vector<1x16x256xf32>
    %6 = vector.shape_cast %5 : vector<1x16x256xf32> to vector<16x256xf32>
    %7 = vector.shape_cast %4 : vector<16x256xf32> to vector<1x16x256xf32>
    tpu.vector_store %arg7[%c9, %c0_3, %c0_4], %7 {strides = array<i32>} : memref<10x16x256xf32, #tpu.memory_space<vmem>>, vector<1x16x256xf32>,
    %cst_5 = arith.constant 0.000000e+00 : f32
    %8 = vector.broadcast %cst_5 : f32 to vector<10x8x256xf32>
    %c0_6 = arith.constant 0 : index
    %c8 = arith.constant 8 : index
    %c0_7 = arith.constant 0 : index
    %9 = vector.load %arg7[%c0_6, %c8, %c0_7] : memref<10x16x256xf32, #tpu.memory_space<vmem>>, vector<10x8x256xf32>
    tpu.vector_store %arg7[%c0_6, %c8, %c0_7], %8 {strides = array<i32>} : memref<10x16x256xf32, #tpu.memory_space<vmem>>, vector<10x8x256xf32>,
    %cst_8 = arith.constant 0.000000e+00 : f32
    %10 = vector.broadcast %cst_8 : f32 to vector<16x128xf32>
    %c0_9 = arith.constant 0 : index
    %c0_10 = arith.constant 0 : index
    %c0_11 = arith.constant 0 : index
    %11 = vector.load %arg8[%c0_9, %c0_10, %c0_11] : memref<10x16x128xf32, #tpu.memory_space<vmem>>, vector<1x16x128xf32>
    %12 = vector.shape_cast %11 : vector<1x16x128xf32> to vector<16x128xf32>
    %13 = vector.shape_cast %10 : vector<16x128xf32> to vector<1x16x128xf32>
    tpu.vector_store %arg8[%c0_9, %c0_10, %c0_11], %13 {strides = array<i32>} : memref<10x16x128xf32, #tpu.memory_space<vmem>>, vector<1x16x128xf32>,
    %cst_12 = arith.constant 0.000000e+00 : f32
    %14 = vector.broadcast %cst_12 : f32 to vector<16x128xf32>
    %c9_13 = arith.constant 9 : index
    %c0_14 = arith.constant 0 : index
    %c0_15 = arith.constant 0 : index
    %15 = vector.load %arg8[%c9_13, %c0_14, %c0_15] : memref<10x16x128xf32, #tpu.memory_space<vmem>>, vector<1x16x128xf32>
    %16 = vector.shape_cast %15 : vector<1x16x128xf32> to vector<16x128xf32>
    %17 = vector.shape_cast %14 : vector<16x128xf32> to vector<1x16x128xf32>
    tpu.vector_store %arg8[%c9_13, %c0_14, %c0_15], %17 {strides = array<i32>} : memref<10x16x128xf32, #tpu.memory_space<vmem>>, vector<1x16x128xf32>,
    %cst_16 = arith.constant 0.000000e+00 : f32
    %18 = vector.broadcast %cst_16 : f32 to vector<10x8x128xf32>
    %c0_17 = arith.constant 0 : index
    %c8_18 = arith.constant 8 : index
    %c0_19 = arith.constant 0 : index
    %19 = vector.load %arg8[%c0_17, %c8_18, %c0_19] : memref<10x16x128xf32, #tpu.memory_space<vmem>>, vector<10x8x128xf32>
    tpu.vector_store %arg8[%c0_17, %c8_18, %c0_19], %18 {strides = array<i32>} : memref<10x16x128xf32, #tpu.memory_space<vmem>>, vector<10x8x128xf32>,
    %c0_20 = arith.constant 0 : index
    %c0_21 = arith.constant 0 : index
    %c0_22 = arith.constant 0 : index
    %c0_23 = arith.constant 0 : index
    %20 = vector.load %arg1[%c0_20, %c0_21, %c0_22, %c0_23] : memref<1x4x8x256xf32, #tpu.memory_space<vmem>>, vector<1x4x8x256xf32>
    %21 = vector.shape_cast %20 : vector<1x4x8x256xf32> to vector<4x8x256xf32>
    %cst_24 = arith.constant 0.000000e+00 : f32
    %22 = vector.broadcast %cst_24 : f32 to vector<4x8x256xf32>
    %23 = arith.maximumf %21, %22 : vector<4x8x256xf32>
    %24 = vector.shape_cast %23 : vector<4x8x256xf32> to vector<4x1x8x256xf32>
    %25 = vector.shape_cast %24 : vector<4x1x8x256xf32> to vector<4x1x8x256xf32>
    %26 = vector.broadcast %25 : vector<4x1x8x256xf32> to vector<4x2x8x256xf32>
    %27 = vector.shape_cast %26 : vector<4x2x8x256xf32> to vector<8x8x256xf32>
    %c1 = arith.constant 1 : index
    %c0_25 = arith.constant 0 : index
    %c0_26 = arith.constant 0 : index
    %28 = vector.load %arg7[%c1, %c0_25, %c0_26] : memref<10x16x256xf32, #tpu.memory_space<vmem>>, vector<8x8x256xf32>
    tpu.vector_store %arg7[%c1, %c0_25, %c0_26], %27 {strides = array<i32>} : memref<10x16x256xf32, #tpu.memory_space<vmem>>, vector<8x8x256xf32>,
    %c0_27 = arith.constant 0 : index
    %c0_28 = arith.constant 0 : index
    %c0_29 = arith.constant 0 : index
    %c0_30 = arith.constant 0 : index
    %29 = vector.load %arg2[%c0_27, %c0_28, %c0_29, %c0_30] : memref<1x8x8x128xf32, #tpu.memory_space<vmem>>, vector<1x8x8x128xf32>
    %30 = vector.shape_cast %29 : vector<1x8x8x128xf32> to vector<8x8x128xf32>
    %cst_31 = arith.constant 0.000000e+00 : f32
    %31 = vector.broadcast %cst_31 : f32 to vector<8x8x128xf32>
    %32 = arith.maximumf %30, %31 : vector<8x8x128xf32>
    %c1_32 = arith.constant 1 : index
    %c0_33 = arith.constant 0 : index
    %c0_34 = arith.constant 0 : index
    %33 = vector.load %arg8[%c1_32, %c0_33, %c0_34] : memref<10x16x128xf32, #tpu.memory_space<vmem>>, vector<8x8x128xf32>
    tpu.vector_store %arg8[%c1_32, %c0_33, %c0_34], %32 {strides = array<i32>} : memref<10x16x128xf32, #tpu.memory_space<vmem>>, vector<8x8x128xf32>,
    %cst_35 = arith.constant 0.000000e+00 : f32
    %34 = vector.broadcast %cst_35 : f32 to vector<128x128xf32>
    %cst_36 = arith.constant 0.000000e+00 : f32
    %35 = vector.broadcast %cst_36 : f32 to vector<128x128xf32>
    %cst_37 = arith.constant 0.000000e+00 : f32
    %36 = vector.broadcast %cst_37 : f32 to vector<128x128xf32>
    %c0_38 = arith.constant 0 : index
    %c0_39 = arith.constant 0 : index
    %c0_40 = arith.constant 0 : index
    %37 = vector.load %arg7[%c0_38, %c0_39, %c0_40] : memref<10x16x256xf32, #tpu.memory_space<vmem>>, vector<8x16x256xf32>
    %38 = vector.shape_cast %37 : vector<8x16x256xf32> to vector<128x256xf32>
    %c0_41 = arith.constant 0 : index
    %c0_42 = arith.constant 0 : index
    %c0_43 = arith.constant 0 : index
    %39 = vector.load %arg8[%c0_41, %c0_42, %c0_43] : memref<10x16x128xf32, #tpu.memory_space<vmem>>, vector<8x16x128xf32>
    %40 = vector.shape_cast %39 : vector<8x16x128xf32> to vector<128x128xf32>
    %c0_44 = arith.constant 0 : index
    %c0_45 = arith.constant 0 : index
    %c0_46 = arith.constant 0 : index
    %c0_47 = arith.constant 0 : index
    %41 = vector.load %arg3[%c0_44, %c0_45, %c0_46, %c0_47] : memref<3x3x256x128xf32, #tpu.memory_space<vmem>>, vector<1x1x256x128xf32>
    %42 = vector.shape_cast %41 : vector<1x1x256x128xf32> to vector<256x128xf32>
    %cst_48 = arith.constant dense<0.000000e+00> : vector<128x128xf32>
    %43 = tpu.matmul %38, %42, %cst_48 {dimension_numbers = #tpu.dot_dimension_numbers<[1], [0], [0], [1], [0, 0, 1, 1], [], []>} : vector<128x256xf32>, vector<256x128xf32>, vector<128x128xf32> -> vector<128x128xf32>
    %44 = arith.addf %34, %43 : vector<128x128xf32>
    %c0_49 = arith.constant 0 : index
    %c1_50 = arith.constant 1 : index
    %c0_51 = arith.constant 0 : index
    %c0_52 = arith.constant 0 : index
    %45 = vector.load %arg3[%c0_49, %c1_50, %c0_51, %c0_52] : memref<3x3x256x128xf32, #tpu.memory_space<vmem>>, vector<1x1x256x128xf32>
    %46 = vector.shape_cast %45 : vector<1x1x256x128xf32> to vector<256x128xf32>
    %cst_53 = arith.constant dense<0.000000e+00> : vector<128x128xf32>
    %47 = tpu.matmul %38, %46, %cst_53 {dimension_numbers = #tpu.dot_dimension_numbers<[1], [0], [0], [1], [0, 0, 1, 1], [], []>} : vector<128x256xf32>, vector<256x128xf32>, vector<128x128xf32> -> vector<128x128xf32>
    %48 = arith.addf %35, %47 : vector<128x128xf32>
    %c0_54 = arith.constant 0 : index
    %c2 = arith.constant 2 : index
    %c0_55 = arith.constant 0 : index
    %c0_56 = arith.constant 0 : index
    %49 = vector.load %arg3[%c0_54, %c2, %c0_55, %c0_56] : memref<3x3x256x128xf32, #tpu.memory_space<vmem>>, vector<1x1x256x128xf32>
    %50 = vector.shape_cast %49 : vector<1x1x256x128xf32> to vector<256x128xf32>
    %cst_57 = arith.constant dense<0.000000e+00> : vector<128x128xf32>
    %51 = tpu.matmul %38, %50, %cst_57 {dimension_numbers = #tpu.dot_dimension_numbers<[1], [0], [0], [1], [0, 0, 1, 1], [], []>} : vector<128x256xf32>, vector<256x128xf32>, vector<128x128xf32> -> vector<128x128xf32>
    %52 = arith.addf %36, %51 : vector<128x128xf32>
    %c0_58 = arith.constant 0 : index
    %c0_59 = arith.constant 0 : index
    %c0_60 = arith.constant 0 : index
    %c0_61 = arith.constant 0 : index
    %53 = vector.load %arg4[%c0_58, %c0_59, %c0_60, %c0_61] : memref<3x3x128x128xf32, #tpu.memory_space<vmem>>, vector<1x1x128x128xf32>
    %54 = vector.shape_cast %53 : vector<1x1x128x128xf32> to vector<128x128xf32>
    %cst_62 = arith.constant dense<0.000000e+00> : vector<128x128xf32>
    %55 = tpu.matmul %40, %54, %cst_62 {dimension_numbers = #tpu.dot_dimension_numbers<[1], [0], [0], [1], [0, 0, 1, 1], [], []>} : vector<128x128xf32>, vector<128x128xf32>, vector<128x128xf32> -> vector<128x128xf32>
    %56 = arith.addf %44, %55 : vector<128x128xf32>
    %c0_63 = arith.constant 0 : index
    %c1_64 = arith.constant 1 : index
    %c0_65 = arith.constant 0 : index
    %c0_66 = arith.constant 0 : index
    %57 = vector.load %arg4[%c0_63, %c1_64, %c0_65, %c0_66] : memref<3x3x128x128xf32, #tpu.memory_space<vmem>>, vector<1x1x128x128xf32>
    %58 = vector.shape_cast %57 : vector<1x1x128x128xf32> to vector<128x128xf32>
    %cst_67 = arith.constant dense<0.000000e+00> : vector<128x128xf32>
    %59 = tpu.matmul %40, %58, %cst_67 {dimension_numbers = #tpu.dot_dimension_numbers<[1], [0], [0], [1], [0, 0, 1, 1], [], []>} : vector<128x128xf32>, vector<128x128xf32>, vector<128x128xf32> -> vector<128x128xf32>
    %60 = arith.addf %48, %59 : vector<128x128xf32>
    %c0_68 = arith.constant 0 : index
    %c2_69 = arith.constant 2 : index
    %c0_70 = arith.constant 0 : index
    %c0_71 = arith.constant 0 : index
    %61 = vector.load %arg4[%c0_68, %c2_69, %c0_70, %c0_71] : memref<3x3x128x128xf32, #tpu.memory_space<vmem>>, vector<1x1x128x128xf32>
    %62 = vector.shape_cast %61 : vector<1x1x128x128xf32> to vector<128x128xf32>
    %cst_72 = arith.constant dense<0.000000e+00> : vector<128x128xf32>
    %63 = tpu.matmul %40, %62, %cst_72 {dimension_numbers = #tpu.dot_dimension_numbers<[1], [0], [0], [1], [0, 0, 1, 1], [], []>} : vector<128x128xf32>, vector<128x128xf32>, vector<128x128xf32> -> vector<128x128xf32>
    %64 = arith.addf %52, %63 : vector<128x128xf32>
    %c1_73 = arith.constant 1 : index
    %c0_74 = arith.constant 0 : index
    %c0_75 = arith.constant 0 : index
    %65 = vector.load %arg7[%c1_73, %c0_74, %c0_75] : memref<10x16x256xf32, #tpu.memory_space<vmem>>, vector<8x16x256xf32>
    %66 = vector.shape_cast %65 : vector<8x16x256xf32> to vector<128x256xf32>
    %c1_76 = arith.constant 1 : index
    %c0_77 = arith.constant 0 : index
    %c0_78 = arith.constant 0 : index
    %67 = vector.load %arg8[%c1_76, %c0_77, %c0_78] : memref<10x16x128xf32, #tpu.memory_space<vmem>>, vector<8x16x128xf32>
    %68 = vector.shape_cast %67 : vector<8x16x128xf32> to vector<128x128xf32>
    %c1_79 = arith.constant 1 : index
    %c0_80 = arith.constant 0 : index
    %c0_81 = arith.constant 0 : index
    %c0_82 = arith.constant 0 : index
    %69 = vector.load %arg3[%c1_79, %c0_80, %c0_81, %c0_82] : memref<3x3x256x128xf32, #tpu.memory_space<vmem>>, vector<1x1x256x128xf32>
    %70 = vector.shape_cast %69 : vector<1x1x256x128xf32> to vector<256x128xf32>
    %cst_83 = arith.constant dense<0.000000e+00> : vector<128x128xf32>
    %71 = tpu.matmul %66, %70, %cst_83 {dimension_numbers = #tpu.dot_dimension_numbers<[1], [0], [0], [1], [0, 0, 1, 1], [], []>} : vector<128x256xf32>, vector<256x128xf32>, vector<128x128xf32> -> vector<128x128xf32>
    %72 = arith.addf %56, %71 : vector<128x128xf32>
    %c1_84 = arith.constant 1 : index
    %c1_85 = arith.constant 1 : index
    %c0_86 = arith.constant 0 : index
    %c0_87 = arith.constant 0 : index
    %73 = vector.load %arg3[%c1_84, %c1_85, %c0_86, %c0_87] : memref<3x3x256x128xf32, #tpu.memory_space<vmem>>, vector<1x1x256x128xf32>
    %74 = vector.shape_cast %73 : vector<1x1x256x128xf32> to vector<256x128xf32>
    %cst_88 = arith.constant dense<0.000000e+00> : vector<128x128xf32>
    %75 = tpu.matmul %66, %74, %cst_88 {dimension_numbers = #tpu.dot_dimension_numbers<[1], [0], [0], [1], [0, 0, 1, 1], [], []>} : vector<128x256xf32>, vector<256x128xf32>, vector<128x128xf32> -> vector<128x128xf32>
    %76 = arith.addf %60, %75 : vector<128x128xf32>
    %c1_89 = arith.constant 1 : index
    %c2_90 = arith.constant 2 : index
    %c0_91 = arith.constant 0 : index
    %c0_92 = arith.constant 0 : index
    %77 = vector.load %arg3[%c1_89, %c2_90, %c0_91, %c0_92] : memref<3x3x256x128xf32, #tpu.memory_space<vmem>>, vector<1x1x256x128xf32>
    %78 = vector.shape_cast %77 : vector<1x1x256x128xf32> to vector<256x128xf32>
    %cst_93 = arith.constant dense<0.000000e+00> : vector<128x128xf32>
    %79 = tpu.matmul %66, %78, %cst_93 {dimension_numbers = #tpu.dot_dimension_numbers<[1], [0], [0], [1], [0, 0, 1, 1], [], []>} : vector<128x256xf32>, vector<256x128xf32>, vector<128x128xf32> -> vector<128x128xf32>
    %80 = arith.addf %64, %79 : vector<128x128xf32>
    %c1_94 = arith.constant 1 : index
    %c0_95 = arith.constant 0 : index
    %c0_96 = arith.constant 0 : index
    %c0_97 = arith.constant 0 : index
    %81 = vector.load %arg4[%c1_94, %c0_95, %c0_96, %c0_97] : memref<3x3x128x128xf32, #tpu.memory_space<vmem>>, vector<1x1x128x128xf32>
    %82 = vector.shape_cast %81 : vector<1x1x128x128xf32> to vector<128x128xf32>
    %cst_98 = arith.constant dense<0.000000e+00> : vector<128x128xf32>
    %83 = tpu.matmul %68, %82, %cst_98 {dimension_numbers = #tpu.dot_dimension_numbers<[1], [0], [0], [1], [0, 0, 1, 1], [], []>} : vector<128x128xf32>, vector<128x128xf32>, vector<128x128xf32> -> vector<128x128xf32>
    %84 = arith.addf %72, %83 : vector<128x128xf32>
    %c1_99 = arith.constant 1 : index
    %c1_100 = arith.constant 1 : index
    %c0_101 = arith.constant 0 : index
    %c0_102 = arith.constant 0 : index
    %85 = vector.load %arg4[%c1_99, %c1_100, %c0_101, %c0_102] : memref<3x3x128x128xf32, #tpu.memory_space<vmem>>, vector<1x1x128x128xf32>
    %86 = vector.shape_cast %85 : vector<1x1x128x128xf32> to vector<128x128xf32>
    %cst_103 = arith.constant dense<0.000000e+00> : vector<128x128xf32>
    %87 = tpu.matmul %68, %86, %cst_103 {dimension_numbers = #tpu.dot_dimension_numbers<[1], [0], [0], [1], [0, 0, 1, 1], [], []>} : vector<128x128xf32>, vector<128x128xf32>, vector<128x128xf32> -> vector<128x128xf32>
    %88 = arith.addf %76, %87 : vector<128x128xf32>
    %c1_104 = arith.constant 1 : index
    %c2_105 = arith.constant 2 : index
    %c0_106 = arith.constant 0 : index
    %c0_107 = arith.constant 0 : index
    %89 = vector.load %arg4[%c1_104, %c2_105, %c0_106, %c0_107] : memref<3x3x128x128xf32, #tpu.memory_space<vmem>>, vector<1x1x128x128xf32>
    %90 = vector.shape_cast %89 : vector<1x1x128x128xf32> to vector<128x128xf32>
    %cst_108 = arith.constant dense<0.000000e+00> : vector<128x128xf32>
    %91 = tpu.matmul %68, %90, %cst_108 {dimension_numbers = #tpu.dot_dimension_numbers<[1], [0], [0], [1], [0, 0, 1, 1], [], []>} : vector<128x128xf32>, vector<128x128xf32>, vector<128x128xf32> -> vector<128x128xf32>
    %92 = arith.addf %80, %91 : vector<128x128xf32>
    %c2_109 = arith.constant 2 : index
    %c0_110 = arith.constant 0 : index
    %c0_111 = arith.constant 0 : index
    %93 = vector.load %arg7[%c2_109, %c0_110, %c0_111] : memref<10x16x256xf32, #tpu.memory_space<vmem>>, vector<8x16x256xf32>
    %94 = vector.shape_cast %93 : vector<8x16x256xf32> to vector<128x256xf32>
    %c2_112 = arith.constant 2 : index
    %c0_113 = arith.constant 0 : index
    %c0_114 = arith.constant 0 : index
    %95 = vector.load %arg8[%c2_112, %c0_113, %c0_114] : memref<10x16x128xf32, #tpu.memory_space<vmem>>, vector<8x16x128xf32>
    %96 = vector.shape_cast %95 : vector<8x16x128xf32> to vector<128x128xf32>
    %c2_115 = arith.constant 2 : index
    %c0_116 = arith.constant 0 : index
    %c0_117 = arith.constant 0 : index
    %c0_118 = arith.constant 0 : index
    %97 = vector.load %arg3[%c2_115, %c0_116, %c0_117, %c0_118] : memref<3x3x256x128xf32, #tpu.memory_space<vmem>>, vector<1x1x256x128xf32>
    %98 = vector.shape_cast %97 : vector<1x1x256x128xf32> to vector<256x128xf32>
    %cst_119 = arith.constant dense<0.000000e+00> : vector<128x128xf32>
    %99 = tpu.matmul %94, %98, %cst_119 {dimension_numbers = #tpu.dot_dimension_numbers<[1], [0], [0], [1], [0, 0, 1, 1], [], []>} : vector<128x256xf32>, vector<256x128xf32>, vector<128x128xf32> -> vector<128x128xf32>
    %100 = arith.addf %84, %99 : vector<128x128xf32>
    %c2_120 = arith.constant 2 : index
    %c1_121 = arith.constant 1 : index
    %c0_122 = arith.constant 0 : index
    %c0_123 = arith.constant 0 : index
    %101 = vector.load %arg3[%c2_120, %c1_121, %c0_122, %c0_123] : memref<3x3x256x128xf32, #tpu.memory_space<vmem>>, vector<1x1x256x128xf32>
    %102 = vector.shape_cast %101 : vector<1x1x256x128xf32> to vector<256x128xf32>
    %cst_124 = arith.constant dense<0.000000e+00> : vector<128x128xf32>
    %103 = tpu.matmul %94, %102, %cst_124 {dimension_numbers = #tpu.dot_dimension_numbers<[1], [0], [0], [1], [0, 0, 1, 1], [], []>} : vector<128x256xf32>, vector<256x128xf32>, vector<128x128xf32> -> vector<128x128xf32>
    %104 = arith.addf %88, %103 : vector<128x128xf32>
    %c2_125 = arith.constant 2 : index
    %c2_126 = arith.constant 2 : index
    %c0_127 = arith.constant 0 : index
    %c0_128 = arith.constant 0 : index
    %105 = vector.load %arg3[%c2_125, %c2_126, %c0_127, %c0_128] : memref<3x3x256x128xf32, #tpu.memory_space<vmem>>, vector<1x1x256x128xf32>
    %106 = vector.shape_cast %105 : vector<1x1x256x128xf32> to vector<256x128xf32>
    %cst_129 = arith.constant dense<0.000000e+00> : vector<128x128xf32>
    %107 = tpu.matmul %94, %106, %cst_129 {dimension_numbers = #tpu.dot_dimension_numbers<[1], [0], [0], [1], [0, 0, 1, 1], [], []>} : vector<128x256xf32>, vector<256x128xf32>, vector<128x128xf32> -> vector<128x128xf32>
    %108 = arith.addf %92, %107 : vector<128x128xf32>
    %c2_130 = arith.constant 2 : index
    %c0_131 = arith.constant 0 : index
    %c0_132 = arith.constant 0 : index
    %c0_133 = arith.constant 0 : index
    %109 = vector.load %arg4[%c2_130, %c0_131, %c0_132, %c0_133] : memref<3x3x128x128xf32, #tpu.memory_space<vmem>>, vector<1x1x128x128xf32>
    %110 = vector.shape_cast %109 : vector<1x1x128x128xf32> to vector<128x128xf32>
    %cst_134 = arith.constant dense<0.000000e+00> : vector<128x128xf32>
    %111 = tpu.matmul %96, %110, %cst_134 {dimension_numbers = #tpu.dot_dimension_numbers<[1], [0], [0], [1], [0, 0, 1, 1], [], []>} : vector<128x128xf32>, vector<128x128xf32>, vector<128x128xf32> -> vector<128x128xf32>
    %112 = arith.addf %100, %111 : vector<128x128xf32>
    %c2_135 = arith.constant 2 : index
    %c1_136 = arith.constant 1 : index
    %c0_137 = arith.constant 0 : index
    %c0_138 = arith.constant 0 : index
    %113 = vector.load %arg4[%c2_135, %c1_136, %c0_137, %c0_138] : memref<3x3x128x128xf32, #tpu.memory_space<vmem>>, vector<1x1x128x128xf32>
    %114 = vector.shape_cast %113 : vector<1x1x128x128xf32> to vector<128x128xf32>
    %cst_139 = arith.constant dense<0.000000e+00> : vector<128x128xf32>
    %115 = tpu.matmul %96, %114, %cst_139 {dimension_numbers = #tpu.dot_dimension_numbers<[1], [0], [0], [1], [0, 0, 1, 1], [], []>} : vector<128x128xf32>, vector<128x128xf32>, vector<128x128xf32> -> vector<128x128xf32>
    %116 = arith.addf %104, %115 : vector<128x128xf32>
    %c2_140 = arith.constant 2 : index
    %c2_141 = arith.constant 2 : index
    %c0_142 = arith.constant 0 : index
    %c0_143 = arith.constant 0 : index
    %117 = vector.load %arg4[%c2_140, %c2_141, %c0_142, %c0_143] : memref<3x3x128x128xf32, #tpu.memory_space<vmem>>, vector<1x1x128x128xf32>
    %118 = vector.shape_cast %117 : vector<1x1x128x128xf32> to vector<128x128xf32>
    %cst_144 = arith.constant dense<0.000000e+00> : vector<128x128xf32>
    %119 = tpu.matmul %96, %118, %cst_144 {dimension_numbers = #tpu.dot_dimension_numbers<[1], [0], [0], [1], [0, 0, 1, 1], [], []>} : vector<128x128xf32>, vector<128x128xf32>, vector<128x128xf32> -> vector<128x128xf32>
    %120 = arith.addf %108, %119 : vector<128x128xf32>
    %121 = vector.extract_strided_slice %112 {offsets = [127, 0], sizes = [1, 128], strides = [1, 1]} : vector<128x128xf32> to vector<1x128xf32>
    %122 = vector.extract_strided_slice %112 {offsets = [0, 0], sizes = [127, 128], strides = [1, 1]} : vector<128x128xf32> to vector<127x128xf32>
    %123 = tpu.concatenate %121, %122 in 0 : vector<1x128xf32>, vector<127x128xf32> -> vector<128x128xf32>
    %124 = arith.addf %123, %116 : vector<128x128xf32>
    %125 = vector.extract_strided_slice %120 {offsets = [1, 0], sizes = [127, 128], strides = [1, 1]} : vector<128x128xf32> to vector<127x128xf32>
    %126 = vector.extract_strided_slice %120 {offsets = [0, 0], sizes = [1, 128], strides = [1, 1]} : vector<128x128xf32> to vector<1x128xf32>
    %127 = tpu.concatenate %125, %126 in 0 : vector<127x128xf32>, vector<1x128xf32> -> vector<128x128xf32>
    %128 = arith.addf %124, %127 : vector<128x128xf32>
    %cst_145 = arith.constant 0.000000e+00 : f32
    %129 = vector.broadcast %cst_145 : f32 to vector<128x128xf32>
    %130 = arith.maximumf %128, %129 : vector<128x128xf32>
    %131 = vector.shape_cast %130 : vector<128x128xf32> to vector<8x16x128xf32>
    %cst_146 = arith.constant 0.000000e+00 : f32
    %132 = vector.broadcast %cst_146 : f32 to vector<16x128xf32>
    %c0_147 = arith.constant 0 : index
    %c0_148 = arith.constant 0 : index
    %c0_149 = arith.constant 0 : index
    %133 = vector.load %arg9[%c0_147, %c0_148, %c0_149] : memref<10x16x128xf32, #tpu.memory_space<vmem>>, vector<1x16x128xf32>
    %134 = vector.shape_cast %133 : vector<1x16x128xf32> to vector<16x128xf32>
    %135 = vector.shape_cast %132 : vector<16x128xf32> to vector<1x16x128xf32>
    tpu.vector_store %arg9[%c0_147, %c0_148, %c0_149], %135 {strides = array<i32>} : memref<10x16x128xf32, #tpu.memory_space<vmem>>, vector<1x16x128xf32>,
    %cst_150 = arith.constant 0.000000e+00 : f32
    %136 = vector.broadcast %cst_150 : f32 to vector<16x128xf32>
    %c9_151 = arith.constant 9 : index
    %c0_152 = arith.constant 0 : index
    %c0_153 = arith.constant 0 : index
    %137 = vector.load %arg9[%c9_151, %c0_152, %c0_153] : memref<10x16x128xf32, #tpu.memory_space<vmem>>, vector<1x16x128xf32>
    %138 = vector.shape_cast %137 : vector<1x16x128xf32> to vector<16x128xf32>
    %139 = vector.shape_cast %136 : vector<16x128xf32> to vector<1x16x128xf32>
    tpu.vector_store %arg9[%c9_151, %c0_152, %c0_153], %139 {strides = array<i32>} : memref<10x16x128xf32, #tpu.memory_space<vmem>>, vector<1x16x128xf32>,
    %c1_154 = arith.constant 1 : index
    %c0_155 = arith.constant 0 : index
    %c0_156 = arith.constant 0 : index
    %140 = vector.load %arg9[%c1_154, %c0_155, %c0_156] : memref<10x16x128xf32, #tpu.memory_space<vmem>>, vector<8x16x128xf32>
    tpu.vector_store %arg9[%c1_154, %c0_155, %c0_156], %131 {strides = array<i32>} : memref<10x16x128xf32, #tpu.memory_space<vmem>>, vector<8x16x128xf32>,
    %cst_157 = arith.constant 0.000000e+00 : f32
    %141 = vector.broadcast %cst_157 : f32 to vector<10x8x128xf32>
    %c0_158 = arith.constant 0 : index
    %c8_159 = arith.constant 8 : index
    %c0_160 = arith.constant 0 : index
    %142 = vector.load %arg9[%c0_158, %c8_159, %c0_160] : memref<10x16x128xf32, #tpu.memory_space<vmem>>, vector<10x8x128xf32>
    tpu.vector_store %arg9[%c0_158, %c8_159, %c0_160], %141 {strides = array<i32>} : memref<10x16x128xf32, #tpu.memory_space<vmem>>, vector<10x8x128xf32>,
    %cst_161 = arith.constant 0.000000e+00 : f32
    %143 = vector.broadcast %cst_161 : f32 to vector<128x128xf32>
    %cst_162 = arith.constant 0.000000e+00 : f32
    %144 = vector.broadcast %cst_162 : f32 to vector<128x128xf32>
    %cst_163 = arith.constant 0.000000e+00 : f32
    %145 = vector.broadcast %cst_163 : f32 to vector<128x128xf32>
    %c0_164 = arith.constant 0 : index
    %c0_165 = arith.constant 0 : index
    %c0_166 = arith.constant 0 : index
    %146 = vector.load %arg9[%c0_164, %c0_165, %c0_166] : memref<10x16x128xf32, #tpu.memory_space<vmem>>, vector<8x16x128xf32>
    %147 = vector.shape_cast %146 : vector<8x16x128xf32> to vector<128x128xf32>
    %c0_167 = arith.constant 0 : index
    %c0_168 = arith.constant 0 : index
    %c0_169 = arith.constant 0 : index
    %c0_170 = arith.constant 0 : index
    %148 = vector.load %arg5[%c0_167, %c0_168, %c0_169, %c0_170] : memref<3x3x128x128xf32, #tpu.memory_space<vmem>>, vector<1x1x128x128xf32>
    %149 = vector.shape_cast %148 : vector<1x1x128x128xf32> to vector<128x128xf32>
    %cst_171 = arith.constant dense<0.000000e+00> : vector<128x128xf32>
    %150 = tpu.matmul %147, %149, %cst_171 {dimension_numbers = #tpu.dot_dimension_numbers<[1], [0], [0], [1], [0, 0, 1, 1], [], []>} : vector<128x128xf32>, vector<128x128xf32>, vector<128x128xf32> -> vector<128x128xf32>
    %151 = arith.addf %143, %150 : vector<128x128xf32>
    %c0_172 = arith.constant 0 : index
    %c1_173 = arith.constant 1 : index
    %c0_174 = arith.constant 0 : index
    %c0_175 = arith.constant 0 : index
    %152 = vector.load %arg5[%c0_172, %c1_173, %c0_174, %c0_175] : memref<3x3x128x128xf32, #tpu.memory_space<vmem>>, vector<1x1x128x128xf32>
    %153 = vector.shape_cast %152 : vector<1x1x128x128xf32> to vector<128x128xf32>
    %cst_176 = arith.constant dense<0.000000e+00> : vector<128x128xf32>
    %154 = tpu.matmul %147, %153, %cst_176 {dimension_numbers = #tpu.dot_dimension_numbers<[1], [0], [0], [1], [0, 0, 1, 1], [], []>} : vector<128x128xf32>, vector<128x128xf32>, vector<128x128xf32> -> vector<128x128xf32>
    %155 = arith.addf %144, %154 : vector<128x128xf32>
    %c0_177 = arith.constant 0 : index
    %c2_178 = arith.constant 2 : index
    %c0_179 = arith.constant 0 : index
    %c0_180 = arith.constant 0 : index
    %156 = vector.load %arg5[%c0_177, %c2_178, %c0_179, %c0_180] : memref<3x3x128x128xf32, #tpu.memory_space<vmem>>, vector<1x1x128x128xf32>
    %157 = vector.shape_cast %156 : vector<1x1x128x128xf32> to vector<128x128xf32>
    %cst_181 = arith.constant dense<0.000000e+00> : vector<128x128xf32>
    %158 = tpu.matmul %147, %157, %cst_181 {dimension_numbers = #tpu.dot_dimension_numbers<[1], [0], [0], [1], [0, 0, 1, 1], [], []>} : vector<128x128xf32>, vector<128x128xf32>, vector<128x128xf32> -> vector<128x128xf32>
    %159 = arith.addf %145, %158 : vector<128x128xf32>
    %c1_182 = arith.constant 1 : index
    %c0_183 = arith.constant 0 : index
    %c0_184 = arith.constant 0 : index
    %160 = vector.load %arg9[%c1_182, %c0_183, %c0_184] : memref<10x16x128xf32, #tpu.memory_space<vmem>>, vector<8x16x128xf32>
    %161 = vector.shape_cast %160 : vector<8x16x128xf32> to vector<128x128xf32>
    %c1_185 = arith.constant 1 : index
    %c0_186 = arith.constant 0 : index
    %c0_187 = arith.constant 0 : index
    %c0_188 = arith.constant 0 : index
    %162 = vector.load %arg5[%c1_185, %c0_186, %c0_187, %c0_188] : memref<3x3x128x128xf32, #tpu.memory_space<vmem>>, vector<1x1x128x128xf32>
    %163 = vector.shape_cast %162 : vector<1x1x128x128xf32> to vector<128x128xf32>
    %cst_189 = arith.constant dense<0.000000e+00> : vector<128x128xf32>
    %164 = tpu.matmul %161, %163, %cst_189 {dimension_numbers = #tpu.dot_dimension_numbers<[1], [0], [0], [1], [0, 0, 1, 1], [], []>} : vector<128x128xf32>, vector<128x128xf32>, vector<128x128xf32> -> vector<128x128xf32>
    %165 = arith.addf %151, %164 : vector<128x128xf32>
    %c1_190 = arith.constant 1 : index
    %c1_191 = arith.constant 1 : index
    %c0_192 = arith.constant 0 : index
    %c0_193 = arith.constant 0 : index
    %166 = vector.load %arg5[%c1_190, %c1_191, %c0_192, %c0_193] : memref<3x3x128x128xf32, #tpu.memory_space<vmem>>, vector<1x1x128x128xf32>
    %167 = vector.shape_cast %166 : vector<1x1x128x128xf32> to vector<128x128xf32>
    %cst_194 = arith.constant dense<0.000000e+00> : vector<128x128xf32>
    %168 = tpu.matmul %161, %167, %cst_194 {dimension_numbers = #tpu.dot_dimension_numbers<[1], [0], [0], [1], [0, 0, 1, 1], [], []>} : vector<128x128xf32>, vector<128x128xf32>, vector<128x128xf32> -> vector<128x128xf32>
    %169 = arith.addf %155, %168 : vector<128x128xf32>
    %c1_195 = arith.constant 1 : index
    %c2_196 = arith.constant 2 : index
    %c0_197 = arith.constant 0 : index
    %c0_198 = arith.constant 0 : index
    %170 = vector.load %arg5[%c1_195, %c2_196, %c0_197, %c0_198] : memref<3x3x128x128xf32, #tpu.memory_space<vmem>>, vector<1x1x128x128xf32>
    %171 = vector.shape_cast %170 : vector<1x1x128x128xf32> to vector<128x128xf32>
    %cst_199 = arith.constant dense<0.000000e+00> : vector<128x128xf32>
    %172 = tpu.matmul %161, %171, %cst_199 {dimension_numbers = #tpu.dot_dimension_numbers<[1], [0], [0], [1], [0, 0, 1, 1], [], []>} : vector<128x128xf32>, vector<128x128xf32>, vector<128x128xf32> -> vector<128x128xf32>
    %173 = arith.addf %159, %172 : vector<128x128xf32>
    %c2_200 = arith.constant 2 : index
    %c0_201 = arith.constant 0 : index
    %c0_202 = arith.constant 0 : index
    %174 = vector.load %arg9[%c2_200, %c0_201, %c0_202] : memref<10x16x128xf32, #tpu.memory_space<vmem>>, vector<8x16x128xf32>
    %175 = vector.shape_cast %174 : vector<8x16x128xf32> to vector<128x128xf32>
    %c2_203 = arith.constant 2 : index
    %c0_204 = arith.constant 0 : index
    %c0_205 = arith.constant 0 : index
    %c0_206 = arith.constant 0 : index
    %176 = vector.load %arg5[%c2_203, %c0_204, %c0_205, %c0_206] : memref<3x3x128x128xf32, #tpu.memory_space<vmem>>, vector<1x1x128x128xf32>
    %177 = vector.shape_cast %176 : vector<1x1x128x128xf32> to vector<128x128xf32>
    %cst_207 = arith.constant dense<0.000000e+00> : vector<128x128xf32>
    %178 = tpu.matmul %175, %177, %cst_207 {dimension_numbers = #tpu.dot_dimension_numbers<[1], [0], [0], [1], [0, 0, 1, 1], [], []>} : vector<128x128xf32>, vector<128x128xf32>, vector<128x128xf32> -> vector<128x128xf32>
    %179 = arith.addf %165, %178 : vector<128x128xf32>
    %c2_208 = arith.constant 2 : index
    %c1_209 = arith.constant 1 : index
    %c0_210 = arith.constant 0 : index
    %c0_211 = arith.constant 0 : index
    %180 = vector.load %arg5[%c2_208, %c1_209, %c0_210, %c0_211] : memref<3x3x128x128xf32, #tpu.memory_space<vmem>>, vector<1x1x128x128xf32>
    %181 = vector.shape_cast %180 : vector<1x1x128x128xf32> to vector<128x128xf32>
    %cst_212 = arith.constant dense<0.000000e+00> : vector<128x128xf32>
    %182 = tpu.matmul %175, %181, %cst_212 {dimension_numbers = #tpu.dot_dimension_numbers<[1], [0], [0], [1], [0, 0, 1, 1], [], []>} : vector<128x128xf32>, vector<128x128xf32>, vector<128x128xf32> -> vector<128x128xf32>
    %183 = arith.addf %169, %182 : vector<128x128xf32>
    %c2_213 = arith.constant 2 : index
    %c2_214 = arith.constant 2 : index
    %c0_215 = arith.constant 0 : index
    %c0_216 = arith.constant 0 : index
    %184 = vector.load %arg5[%c2_213, %c2_214, %c0_215, %c0_216] : memref<3x3x128x128xf32, #tpu.memory_space<vmem>>, vector<1x1x128x128xf32>
    %185 = vector.shape_cast %184 : vector<1x1x128x128xf32> to vector<128x128xf32>
    %cst_217 = arith.constant dense<0.000000e+00> : vector<128x128xf32>
    %186 = tpu.matmul %175, %185, %cst_217 {dimension_numbers = #tpu.dot_dimension_numbers<[1], [0], [0], [1], [0, 0, 1, 1], [], []>} : vector<128x128xf32>, vector<128x128xf32>, vector<128x128xf32> -> vector<128x128xf32>
    %187 = arith.addf %173, %186 : vector<128x128xf32>
    %188 = vector.extract_strided_slice %179 {offsets = [127, 0], sizes = [1, 128], strides = [1, 1]} : vector<128x128xf32> to vector<1x128xf32>
    %189 = vector.extract_strided_slice %179 {offsets = [0, 0], sizes = [127, 128], strides = [1, 1]} : vector<128x128xf32> to vector<127x128xf32>
    %190 = tpu.concatenate %188, %189 in 0 : vector<1x128xf32>, vector<127x128xf32> -> vector<128x128xf32>
    %191 = arith.addf %190, %183 : vector<128x128xf32>
    %192 = vector.extract_strided_slice %187 {offsets = [1, 0], sizes = [127, 128], strides = [1, 1]} : vector<128x128xf32> to vector<127x128xf32>
    %193 = vector.extract_strided_slice %187 {offsets = [0, 0], sizes = [1, 128], strides = [1, 1]} : vector<128x128xf32> to vector<1x128xf32>
    %194 = tpu.concatenate %192, %193 in 0 : vector<127x128xf32>, vector<1x128xf32> -> vector<128x128xf32>
    %195 = arith.addf %191, %194 : vector<128x128xf32>
    %196 = vector.shape_cast %195 : vector<128x128xf32> to vector<8x16x128xf32>
    %197 = vector.extract_strided_slice %196 {offsets = [0, 0, 0], sizes = [8, 8, 128], strides = [1, 1, 1]} : vector<8x16x128xf32> to vector<8x8x128xf32>
    %198 = arith.mulf %197, %197 : vector<8x8x128xf32>
    %199 = vector.shape_cast %198 : vector<8x8x128xf32> to vector<1x8x8x128xf32>
    %cst_218 = arith.constant dense<0.000000e+00> : vector<1xf32>
    %200 = vector.multi_reduction <add>, %199, %cst_218 [1, 2, 3] : vector<1x8x8x128xf32> to vector<1xf32>
    %201 = vector.shape_cast %200 : vector<1xf32> to vector<1x1x1x1xf32>
    %202 = vector.extract %201[0, 0, 0, 0] : f32 from vector<1x1x1x1xf32>
    %cst_219 = arith.constant 1.000000e-24 : f32
    %203 = arith.maximumf %202, %cst_219 : f32
    %204 = math.rsqrt %203 : f32
    %205 = vector.broadcast %204 : f32 to vector<8x8x128xf32>
    %206 = arith.mulf %197, %205 : vector<8x8x128xf32>
    %c0_220 = arith.constant 0 : index
    %c0_221 = arith.constant 0 : index
    %c0_222 = arith.constant 0 : index
    %c0_223 = arith.constant 0 : index
    %207 = vector.load %arg6[%c0_220, %c0_221, %c0_222, %c0_223] : memref<1x8x8x128xf32, #tpu.memory_space<vmem>>, vector<1x8x8x128xf32>
    %208 = vector.shape_cast %207 : vector<1x8x8x128xf32> to vector<8x8x128xf32>
    %209 = vector.shape_cast %206 : vector<8x8x128xf32> to vector<1x8x8x128xf32>
    tpu.vector_store %arg6[%c0_220, %c0_221, %c0_222, %c0_223], %209 {strides = array<i32>} : memref<1x8x8x128xf32, #tpu.memory_space<vmem>>, vector<1x8x8x128xf32>,
    return
  }
  func.func @transform_0(%arg0: i32) -> (i32, i32, i32, i32) {
    %c0_i32 = arith.constant 0 : i32
    %c0_i32_0 = arith.constant 0 : i32
    %c0_i32_1 = arith.constant 0 : i32
    %c0_i32_2 = arith.constant 0 : i32
    return %arg0, %c0_i32, %c0_i32_0, %c0_i32_1 : i32, i32, i32, i32
  }
  func.func @transform_1(%arg0: i32) -> (i32, i32, i32, i32) {
    %c0_i32 = arith.constant 0 : i32
    %c0_i32_0 = arith.constant 0 : i32
    %c0_i32_1 = arith.constant 0 : i32
    %c0_i32_2 = arith.constant 0 : i32
    return %arg0, %c0_i32, %c0_i32_0, %c0_i32_1 : i32, i32, i32, i32
  }
  func.func @transform_2(%arg0: i32) -> (i32, i32, i32, i32) {
    %c0_i32 = arith.constant 0 : i32
    %c0_i32_0 = arith.constant 0 : i32
    %c0_i32_1 = arith.constant 0 : i32
    %c0_i32_2 = arith.constant 0 : i32
    %c0_i32_3 = arith.constant 0 : i32
    return %c0_i32, %c0_i32_0, %c0_i32_1, %c0_i32_2 : i32, i32, i32, i32
  }
  func.func @transform_3(%arg0: i32) -> (i32, i32, i32, i32) {
    %c0_i32 = arith.constant 0 : i32
    %c0_i32_0 = arith.constant 0 : i32
    %c0_i32_1 = arith.constant 0 : i32
    %c0_i32_2 = arith.constant 0 : i32
    %c0_i32_3 = arith.constant 0 : i32
    return %c0_i32, %c0_i32_0, %c0_i32_1, %c0_i32_2 : i32, i32, i32, i32
  }
  func.func @transform_4(%arg0: i32) -> (i32, i32, i32, i32) {
    %c0_i32 = arith.constant 0 : i32
    %c0_i32_0 = arith.constant 0 : i32
    %c0_i32_1 = arith.constant 0 : i32
    %c0_i32_2 = arith.constant 0 : i32
    %c0_i32_3 = arith.constant 0 : i32
    return %c0_i32, %c0_i32_0, %c0_i32_1, %c0_i32_2 : i32, i32, i32, i32
  }
  func.func @transform_5(%arg0: i32) -> (i32, i32, i32, i32) {
    %c0_i32 = arith.constant 0 : i32
    %c0_i32_0 = arith.constant 0 : i32
    %c0_i32_1 = arith.constant 0 : i32
    %c0_i32_2 = arith.constant 0 : i32
    return %arg0, %c0_i32, %c0_i32_0, %c0_i32_1 : i32, i32, i32, i32
  }
}

</mosaic_0001>

<bundles_post_ra>
// kernel: decoder4_forward.1
= control target key start
LH: loop header
LB: loop body
LE: loop exit
PB: predicated region body
PF: predicated region fallthrough
CT: control target
= control target key end

     0   :  { %10 = vsyncpa [#allocation6], 0  ;;  %s12917_s0 = inlined_call_operand.vmem [shape: f32[2,4,8,256], index: 0, kind: input, shape index: {}]   ;;  %s12918_s1 = inlined_call_operand.vmem [shape: f32[2,8,8,128], index: 1, kind: input, shape index: {}]   ;;  %s12919_s2 = inlined_call_operand.vmem [shape: f32[3,3,256,128], index: 2, kind: input, shape index: {}]   ;;  %s12920_s3 = inlined_call_operand.vmem [shape: f32[3,3,128,128], index: 3, kind: input, shape index: {}]   ;;  %s12921_s4 = inlined_call_operand.vmem [shape: f32[3,3,128,128], index: 4, kind: input, shape index: {}]   ;;  %s12922_s5 = inlined_call_operand.hbm [shape: f32[2,8,8,128], index: 5, kind: output, shape index: {}]  }
   0x1   :  { %12 = vsyncpa [#allocation6 + $0x1], 0  ;;  %s9806_s18 = smov 0   ;;  %s9808_s19 = smov 0  }
   0x2   :  { %s9810_s20 = smov 0   ;;  %s9812_s21 = smov 0  }
   0x3 LB: > { %s9827_s22 = sadd.s32 4294967295, %s9769_s21   ;;  %s5721_s23 = sadd.s32 4294967294, %s9769_s21   ;;  %s9769_s21 = sphi %s9812_s21, %s12981_s21   ;;  %s9765_s20 = sphi %s9810_s20, %s12980_s20   ;;  %s9761_s19 = sphi %s9808_s19, %s12979_s19   ;;  %s9757_s18 = sphi %s9806_s18, %s12978_s18  }
   0x4   : > { %s9831_s24 = sadd.s32 1, %s9769_s21   ;;  %s140_s25 = sadd.s32 1, %s9765_s20 }
   0x5   : > { %s137_s26 = ssub.s32 %s9769_s21, %s9831_s24  ;;  %p150_p0 = scmp.ne.s32.totalorder %s9765_s20, %s9761_s19 }
   0x6   : > { %p138_p1 = scmp.eq.s32.totalorder %s137_s26, 0  ;;  %p151_p2 = scmp.eq.s32.totalorder %s9827_s22, 1 }
   0x7   : > { %p156_p3 = scmp.ne.s32.totalorder %s9761_s19, %s9757_s18  ;;  %p157_p4 = scmp.eq.s32.totalorder %s5721_s23, 1 }
   0x8   : > { %s9842_s27 = scalar_select %p138_p1, %s9765_s20, %s140_s25  }
   0x9   : > { %p9844_p5 = por %p151_p2, %p150_p0  ;;  %p9848_p6 = por %p157_p4, %p156_p3 }
   0xa   : > { %p5724_p7 = scmp.ge.s32.totalorder %s9769_s21, 1  ;;  %p200_p8 = scmp.lt.s32.totalorder %s9769_s21, 3 }
   0xc   : > { %p201_p9 = pnand %p5724_p7, %p200_p8 }
   0xe   : > { %204 = sbr.rel (%p201_p9) target bundleno = 1456 (0x5b0), region = 40 }
  0x15   : > { %v491_v0 = vld [vmem:[%s12920_s3] sm:$0xff]  ;;  %v492_v1 = vld [vmem:[%s12920_s3 + $0x8] sm:$0xff]  ;;  %v12923_v7 = vmov 0.0   ;;  %v493_v10 = vld [vmem:[%s12920_s3 + $0x10] sm:$0xff]  ;;  %p233_p10 = scmp.lt.s32.totalorder %s9827_s22, 1  ;;  %vm3839_vm0 = vcmask 1046528  }
  0x16   : > { %v409_v2 = vld [vmem:[%s12919_s2 + $0x80] sm:$0xff]  ;;  %v8554_v3 = vpack.c.bf16 %v492_v1, %v491_v0  ;;  %v410_v4 = vld [vmem:[%s12919_s2 + $0x88] sm:$0xff]  ;;  %7578 = vmatprep.mubr.f32.mxu0 %v12923_v7  ;;  %v494_v11 = vld [vmem:[%s12920_s3 + $0x18] sm:$0xff]  ;;  %vm3759_vm1 = vcmask 1040384   ;;  %s9772_s9 = smov 1e-24  }
  0x17   : > { %v393_v5 = vld [vmem:[%s12919_s2] sm:$0xff]  ;;  %v394_v6 = vld [vmem:[%s12919_s2 + $0x8] sm:$0xff]  ;;  %v9873_v8 = vpack.c.bf16 %v410_v4, %v409_v2  ;;  %v411_v12 = vld [vmem:[%s12919_s2 + $0x90] sm:$0xff]  ;;  %v8558_v13 = vpack.c.bf16 %v494_v11, %v493_v10  ;;  %s9932_s13 = scalar_select %p233_p10, %s9827_s22, 1 }
  0x18   : > { %v9875_v9 = vpack.c.bf16 %v394_v6, %v393_v5  ;;  %8555 = vmatprep.subr.bf16.mxu0 %v8554_v3  ;;  %v412_v14 = vld [vmem:[%s12919_s2 + $0x98] sm:$0xff]  ;;  %v395_v15 = vld [vmem:[%s12919_s2 + $0x10] sm:$0xff]  ;;  %v495_v18 = vld [vmem:[%s12920_s3 + $0x20] sm:$0xff]  ;;  %s6249_s12 = sshll.u32 %s9827_s22, 10  ;;  %s9773_s30 = smov [#allocation5]  }
  0x19   : > { %v396_v16 = vld [vmem:[%s12919_s2 + $0x18] sm:$0xff]  ;;  %9418 = vmatprep.subr.bf16.mxu1 %v9873_v8  ;;  %8557 = vmatpush3.bf16.msra.mxu0 %v8554_v3  ;;  %v9897_v17 = vpack.c.bf16 %v412_v14, %v411_v12  ;;  %v496_v19 = vld [vmem:[%s12920_s3 + $0x28] sm:$0xff]  ;;  %v413_v20 = vld [vmem:[%s12919_s2 + $0xa0] sm:$0xff]  ;;  %s6247_s10 = sshll.u32 %s9932_s13, 6  ;;  %s12872_s23 = scalar_lea.hbm %s12922_s5, %s6249_s12 }
  0x1a   : > { %9426 = vmatpush3.bf16.msra.mxu1 %v9875_v9  ;;  %8559 = vmatprep.subr.bf16.mxu0 %v8558_v13  ;;  %v9909_v21 = vpack.c.bf16 %v396_v16, %v395_v15  ;;  %v8562_v22 = vpack.c.bf16 %v496_v19, %v495_v18  ;;  %v414_v23 = vld [vmem:[%s12919_s2 + $0xa8] sm:$0xff]  ;;  %v397_v24 = vld [vmem:[%s12919_s2 + $0x20] sm:$0xff]  ;;  %v497_v27 = vld [vmem:[%s12920_s3 + $0x30] sm:$0xff]  ;;  %s9976_s26 = scalar_lea.vmem %s12917_s0, %s6247_s10  ;;  %s10071_s11 = scalar_lea.vmem %s12918_s1, %s6247_s10 }
  0x1b   : > { %9419 = vmatprep.subr.bf16.mxu1 %v9897_v17  ;;  %v9918_v25 = vpack.c.bf16 %v414_v23, %v413_v20  ;;  %v398_v26 = vld [vmem:[%s12919_s2 + $0x28] sm:$0xff]  ;;  %v498_v28 = vld [vmem:[%s12920_s3 + $0x38] sm:$0xff]  ;;  %v415_v29 = vld [vmem:[%s12919_s2 + $0xb0] sm:$0xff]  ;;  %s230_s10 = sand.u32 1, %s9761_s19   ;;  %s9711_s6 = sshll.u32 %s9773_s30, 4  ;;  %s9712_s6 = int_to_ptr.vmem [resolvable:$false] %s9711_s6 }
  0x1c   : > { %v416_v30 = vld [vmem:[%s12919_s2 + $0xb8] sm:$0xff]  ;;  %v9941_v31 = vpack.c.bf16 %v398_v26, %v397_v24  ;;  %v8566_v32 = vpack.c.bf16 %v498_v28, %v497_v27  ;;  %v399_v33 = vld [vmem:[%s12919_s2 + $0x30] sm:$0xff]  ;;  %v499_v36 = vld [vmem:[%s12920_s3 + $0x40] sm:$0xff]  ;;  %s12876_s22 = scalar_lea.sflag [#allocation6], %s230_s10  ;;  %s9713_s7 = scalar_lea.vmem %s9712_s6, 2048 }
  0x1d   : > { %8561 = vmatpush3.bf16.msra.mxu0 %v8558_v13  ;;  %v9947_v34 = vpack.c.bf16 %v416_v30, %v415_v29  ;;  %v400_v35 = vld [vmem:[%s12919_s2 + $0x38] sm:$0xff]  ;;  %v500_v37 = vld [vmem:[%s12920_s3 + $0x48] sm:$0xff]  ;;  %v417_v38 = vld [vmem:[%s12919_s2 + $0xc0] sm:$0xff] }
  0x1e   : > { %9427 = vmatpush3.bf16.msra.mxu1 %v9909_v21  ;;  %8563 = vmatprep.subr.bf16.mxu0 %v8562_v22  ;;  %v418_v39 = vld [vmem:[%s12919_s2 + $0xc8] sm:$0xff]  ;;  %v9966_v40 = vpack.c.bf16 %v400_v35, %v399_v33  ;;  %v8570_v41 = vpack.c.bf16 %v500_v37, %v499_v36  ;;  %v401_v42 = vld [vmem:[%s12919_s2 + $0x40] sm:$0xff]  ;;  %v501_v45 = vld [vmem:[%s12920_s3 + $0x50] sm:$0xff] }
  0x1f   : > { %9420 = vmatprep.subr.bf16.mxu1 %v9918_v25  ;;  %v9979_v43 = vpack.c.bf16 %v418_v39, %v417_v38  ;;  %v402_v44 = vld [vmem:[%s12919_s2 + $0x48] sm:$0xff]  ;;  %v502_v46 = vld [vmem:[%s12920_s3 + $0x58] sm:$0xff]  ;;  %v419_v47 = vld [vmem:[%s12919_s2 + $0xd0] sm:$0xff] }
  0x20   : > { %v420_v48 = vld [vmem:[%s12919_s2 + $0xd8] sm:$0xff]  ;;  %v9998_v50 = vpack.c.bf16 %v402_v44, %v401_v42  ;;  %v8574_v51 = vpack.c.bf16 %v502_v46, %v501_v45  ;;  %v403_v52 = vld [vmem:[%s12919_s2 + $0x50] sm:$0xff]  ;;  %v503_v56 = vld [vmem:[%s12920_s3 + $0x60] sm:$0xff] }
  0x21   : > { %8565 = vmatpush3.bf16.msra.mxu0 %v8562_v22  ;;  %v290_v49 = vld [vmem:[%s9976_s26 + $0x18] sm:$0xff]  ;;  %v10006_v54 = vpack.c.bf16 %v420_v48, %v419_v47  ;;  %v504_v57 = vld [vmem:[%s12920_s3 + $0x68] sm:$0xff]  ;;  %v421_v58 = vld [vmem:[%s12919_s2 + $0xe0] sm:$0xff] }
  0x22   : > { %9428 = vmatpush3.bf16.msra.mxu1 %v9941_v31  ;;  %8567 = vmatprep.subr.bf16.mxu0 %v8566_v32  ;;  %v10003_v53 = vmax.f32 %v290_v49, 0.0  ;;  %v404_v55 = vld [vmem:[%s12919_s2 + $0x58] sm:$0xff]  ;;  %v422_v59 = vld [vmem:[%s12919_s2 + $0xe8] sm:$0xff]  ;;  %v8578_v61 = vpack.c.bf16 %v504_v57, %v503_v56  ;;  %v405_v62 = vld [vmem:[%s12919_s2 + $0x60] sm:$0xff] }
  0x23   : > { %9421 = vmatprep.subr.bf16.mxu1 %v9947_v34  ;;  %v10025_v60 = vpack.c.bf16 %v404_v55, %v403_v52  ;;  %v10031_v63 = vpack.c.bf16 %v422_v59, %v421_v58  ;;  %v406_v0 = vld [vmem:[%s12919_s2 + $0x68] sm:$0xff]  ;;  %v505_v1 = vld [vmem:[%s12920_s3 + $0x70] sm:$0xff]  ;;  %v506_v2 = vld [vmem:[%s12920_s3 + $0x78] sm:$0xff] }
  0x24   : > { %756 = vmatprep.mubr.f32.mxu1 %v10003_v53  ;;  %v423_v3 = vld [vmem:[%s12919_s2 + $0xf0] sm:$0xff]  ;;  %v424_v4 = vld [vmem:[%s12919_s2 + $0xf8] sm:$0xff]  ;;  %v10049_v5 = vpack.c.bf16 %v406_v0, %v405_v62  ;;  %v8582_v6 = vpack.c.bf16 %v506_v2, %v505_v1  ;;  %v5810_v13 = vld [vmem:[%s12920_s3 + $0x100] sm:$0xff] }
  0x25   : > { %8569 = vmatpush3.bf16.msra.mxu0 %v8566_v32  ;;  %v10052_v10 = vpack.c.bf16 %v424_v4, %v423_v3  ;;  %v407_v11 = vld [vmem:[%s12919_s2 + $0x70] sm:$0xff]  ;;  %v408_v12 = vld [vmem:[%s12919_s2 + $0x78] sm:$0xff]  ;;  %v5811_v14 = vld [vmem:[%s12920_s3 + $0x108] sm:$0xff] }
  0x26   : > { %9429 = vmatpush3.bf16.msra.mxu1 %v9966_v40  ;;  %8571 = vmatprep.subr.bf16.mxu0 %v8570_v41  ;;  %v10074_v15 = vpack.c.bf16 %v408_v12, %v407_v11  ;;  %v289_v16 = vld [vmem:[%s9976_s26 + $0x10] sm:$0xff]  ;;  %v8682_v18 = vpack.c.bf16 %v5811_v14, %v5810_v13  ;;  %v320_v19 = vld [vmem:[%s10071_s11] sm:$0xff]  ;;  %v5813_v23 = vld [vmem:[%s12920_s3 + $0x118] sm:$0xff] }
  0x27   : > { %9422 = vmatprep.subr.bf16.mxu1 %v9979_v43  ;;  %v10079_v20 = vmax.f32 %v289_v16, 0.0  ;;  %v5812_v22 = vld [vmem:[%s12920_s3 + $0x110] sm:$0xff]  ;;  %v10089_v24 = vmax.f32 %v320_v19, 0.0  ;;  %v321_v26 = vld [vmem:[%s10071_s11 + $0x8] sm:$0xff]  ;;  %v5814_v29 = vld [vmem:[%s12920_s3 + $0x120] sm:$0xff] }
  0x28   : > { %v8686_v27 = vpack.c.bf16 %v5813_v23, %v5812_v22  ;;  %v292_v28 = vld [vmem:[%s9976_s26 + $0x28] sm:$0xff]  ;;  %v10103_v30 = vmax.f32 %v321_v26, 0.0  ;;  %v291_v32 = vld [vmem:[%s9976_s26 + $0x20] sm:$0xff]  ;;  %v322_v33 = vld [vmem:[%s10071_s11 + $0x10] sm:$0xff] }
  0x29   : > { %8573 = vmatpush3.bf16.msra.mxu0 %v8570_v41  ;;  %v10114_v36 = vmax.f32 %v291_v32, 0.0  ;;  %v5816_v37 = vld [vmem:[%s12920_s3 + $0x130] sm:$0xff]  ;;  %v10123_v38 = vmax.f32 %v322_v33, 0.0  ;;  %v5818_v41 = vld [vmem:[%s12920_s3 + $0x140] sm:$0xff]  ;;  %v5819_v42 = vld [vmem:[%s12920_s3 + $0x148] sm:$0xff] }
  0x2a   : > { %9430 = vmatpush3.bf16.msra.mxu1 %v9998_v50  ;;  %8575 = vmatprep.subr.bf16.mxu0 %v8574_v51  ;;  %v324_v44 = vld [vmem:[%s10071_s11 + $0x20] sm:$0xff]  ;;  %v5820_v45 = vld [vmem:[%s12920_s3 + $0x150] sm:$0xff]  ;;  %v5821_v46 = vld [vmem:[%s12920_s3 + $0x158] sm:$0xff] }
  0x2b   : > { %9423 = vmatprep.subr.bf16.mxu1 %v10006_v54  ;;  %v325_v47 = vld [vmem:[%s10071_s11 + $0x28] sm:$0xff]  ;;  %v294_v48 = vld [vmem:[%s9976_s26 + $0x38] sm:$0xff]  ;;  %v5822_v49 = vld [vmem:[%s12920_s3 + $0x160] sm:$0xff] }
  0x2c   : > { %v293_v52 = vld [vmem:[%s9976_s26 + $0x30] sm:$0xff]  ;;  %v10174_v55 = vmax.f32 %v294_v48, 0.0  ;;  %v5795_v62 = vld [vmem:[%s12920_s3 + $0x88] sm:$0xff]  ;;  %v5762_v2 = vld [vmem:[%s12919_s2 + $0x200] sm:$0xff] }
  0x2d   : > { %8577 = vmatpush3.bf16.msra.mxu0 %v8574_v51  ;;  %v5823_v51 = vld [vmem:[%s12920_s3 + $0x168] sm:$0xff]  ;;  %v10180_v57 = vmax.f32 %v293_v52, 0.0  ;;  %v5824_v58 = vld [vmem:[%s12920_s3 + $0x170] sm:$0xff]  ;;  %v5781_v11 = vld [vmem:[%s12919_s2 + $0x298] sm:$0xff] }
  0x2e   : > { %9431 = vmatpush3.bf16.msra.mxu1 %v10025_v60  ;;  %8579 = vmatprep.subr.bf16.mxu0 %v8578_v61  ;;  %v8706_v56 = vpack.c.bf16 %v5823_v51, %v5822_v49  ;;  %v5779_v0 = vld [vmem:[%s12919_s2 + $0x288] sm:$0xff]  ;;  %v5764_v14 = vld [vmem:[%s12919_s2 + $0x210] sm:$0xff]  ;;  %v5798_v19 = vld [vmem:[%s12920_s3 + $0xa0] sm:$0xff] }
  0x2f   : > { %9424 = vmatprep.subr.bf16.mxu1 %v10031_v63  ;;  %v5763_v3 = vld [vmem:[%s12919_s2 + $0x208] sm:$0xff]  ;;  %v287_v23 = vld [vmem:[%s9976_s26] sm:$0xff] }
  0x30   : > { %v8716_v12 = vpack.c.bf16 %v5763_v3, %v5762_v2  ;;  %v288_v16 = vld [vmem:[%s9976_s26 + $0x8] sm:$0xff]  ;;  %v5782_v26 = vld [vmem:[%s12919_s2 + $0x2a0] sm:$0xff]  ;;  %v5773_v2 = vld [vmem:[%s12919_s2 + $0x258] sm:$0xff] }
  0x31   : > { %8581 = vmatpush3.bf16.msra.mxu0 %v8578_v61  ;;  %v5794_v61 = vld [vmem:[%s12920_s3 + $0x80] sm:$0xff]  ;;  %v5799_v22 = vld [vmem:[%s12920_s3 + $0xa8] sm:$0xff] }
  0x32   : > { %9432 = vmatpush3.bf16.msra.mxu1 %v10049_v5  ;;  %8583 = vmatprep.subr.bf16.mxu0 %v8582_v6  ;;  %v8618_v1 = vpack.c.bf16 %v5795_v62, %v5794_v61  ;;  %v5766_v32 = vld [vmem:[%s12919_s2 + $0x220] sm:$0xff]  ;;  %v5767_v33 = vld [vmem:[%s12919_s2 + $0x228] sm:$0xff]  ;;  %v5788_v61 = vld [vmem:[%s12919_s2 + $0x2d0] sm:$0xff] }
  0x33   : > { %9425 = vmatprep.subr.bf16.mxu1 %v10052_v10  ;;  %v5786_v48 = vld [vmem:[%s12919_s2 + $0x2c0] sm:$0xff]  ;;  %v5787_v49 = vld [vmem:[%s12919_s2 + $0x2c8] sm:$0xff]  ;;  %v5789_v62 = vld [vmem:[%s12919_s2 + $0x2d8] sm:$0xff] }
  0x34   : > { %v8734_v3 = vpack.c.bf16 %v5789_v62, %v5788_v61  ;;  %v5860_v61 = vld [vmem:[%s12919_s2 + $0x410] sm:$0xff]  ;;  %v5861_v62 = vld [vmem:[%s12919_s2 + $0x418] sm:$0xff] }
  0x35   : > { %8585 = vmatpush3.bf16.msra.mxu0 %v8582_v6  ;;  %v5797_v6 = vld [vmem:[%s12920_s3 + $0x98] sm:$0xff] }
  0x36   : > { %9433 = vmatpush3.bf16.msra.mxu1 %v10074_v15  ;;  %8587 = vmatprep.subr.bf16.mxu0 %v9873_v8  ;;  %v5815_v8 = vld [vmem:[%s12920_s3 + $0x128] sm:$0xff] }
  0x37   : > { %8683 = vmatprep.subr.bf16.mxu1 %v8682_v18  ;;  %v8690_v35 = vpack.c.bf16 %v5815_v8, %v5814_v29  ;;  %v10257_v29 = vmax.f32 %v288_v16, 0.0  ;;  %v8626_v8 = vpack.c.bf16 %v5799_v22, %v5798_v19  ;;  %v5808_v16 = vld [vmem:[%s12920_s3 + $0xf0] sm:$0xff]  ;;  %v5793_v22 = vld [vmem:[%s12919_s2 + $0x2f8] sm:$0xff] }
  0x38   : > { %7579 = vmatmul.mubr.f32.vlgmr.msra.gmra.mrb[0].mxu0 %v12923_v7  ;;  %v5792_v19 = vld [vmem:[%s12919_s2 + $0x2f0] sm:$0xff] }
  0x39   : > { %757 = vmatmul.mubr.f32.vlgmr.msra.gmra.mrb[0].mxu1 %v10079_v20  ;;  %8589 = vmatpush3.bf16.msra.mxu0 %v9875_v9  ;;  %v10108_v9 = vmax.f32 %v292_v28, 0.0 }
  0x3a   : > { %8685 = vmatpush3.bf16.msra.mxu1 %v8682_v18  ;;  %7581 = vmatprep.mubr.f32.mxu0 %v10089_v24 }
  0x3b   : > { %761 = vmatprep.mubr.f32.mxu1 %v12923_v7  ;;  %8591 = vmatprep.subr.bf16.mxu0 %v9897_v17  ;;  %v5817_v17 = vld [vmem:[%s12920_s3 + $0x138] sm:$0xff] }
  0x3c   : > { %7582 = vmatmul.mubr.f32.gmra.mrb[2].mxu0 %v12923_v7  ;;  %8687 = vmatprep.subr.bf16.mxu1 %v8686_v27  ;;  %v8694_v39 = vpack.c.bf16 %v5817_v17, %v5816_v37  ;;  %v5800_v17 = vld [vmem:[%s12920_s3 + $0xb0] sm:$0xff] }
  0x3d   : > { %762 = vmatmul.mubr.f32.gmra.mrb[2].mxu1 %v12923_v7  ;;  %8593 = vmatpush3.bf16.msra.mxu0 %v9909_v21  ;;  %v323_v21 = vld [vmem:[%s10071_s11 + $0x18] sm:$0xff] }
  0x3e   : > { %8689 = vmatpush3.bf16.msra.mxu1 %v8686_v27  ;;  %7584 = vmatprep.mubr.f32.mxu0 %v10103_v30  ;;  %v5783_v27 = vld [vmem:[%s12919_s2 + $0x2a8] sm:$0xff] }
  0x3f   : > { %766 = vmatprep.mubr.f32.mxu1 %v10108_v9  ;;  %8595 = vmatprep.subr.bf16.mxu0 %v9918_v25  ;;  %v10138_v25 = vmax.f32 %v323_v21, 0.0  ;;  %v8722_v37 = vpack.c.bf16 %v5783_v27, %v5782_v26  ;;  %v5801_v21 = vld [vmem:[%s12920_s3 + $0xb8] sm:$0xff]  ;;  %v5776_v27 = vld [vmem:[%s12919_s2 + $0x270] sm:$0xff] }
  0x40   : > { %7585 = vmatmul.mubr.f32.gmra.mrb[4].mxu0 %v12923_v7  ;;  %8691 = vmatprep.subr.bf16.mxu1 %v8690_v35 }
  0x41   : > { %767 = vmatmul.mubr.f32.gmra.mrb[4].mxu1 %v10114_v36  ;;  %8597 = vmatpush3.bf16.msra.mxu0 %v9941_v31  ;;  %v8698_v31 = vpack.c.bf16 %v5819_v42, %v5818_v41  ;;  %v5785_v41 = vld [vmem:[%s12919_s2 + $0x2b8] sm:$0xff]  ;;  %v8724_v42 = vpack.c.bf16 %v5767_v33, %v5766_v32  ;;  %v5746_v32 = vld [vmem:[%s12919_s2 + $0x180] sm:$0xff]  ;;  %v5747_v33 = vld [vmem:[%s12919_s2 + $0x188] sm:$0xff] }
  0x42   : > { %8693 = vmatpush3.bf16.msra.mxu1 %v8690_v35  ;;  %7587 = vmatprep.mubr.f32.mxu0 %v10123_v38  ;;  %v10267_v35 = vmax.f32 %v287_v23, 0.0 }
  0x43   : > { %771 = vmatprep.mubr.f32.mxu1 %v12923_v7  ;;  %8599 = vmatprep.subr.bf16.mxu0 %v9947_v34  ;;  %v10153_v34 = vmax.f32 %v324_v44, 0.0  ;;  %v8630_v44 = vpack.c.bf16 %v5801_v21, %v5800_v17  ;;  %v5875_v17 = vld [vmem:[%s12919_s2 + $0x488] sm:$0xff] }
  0x44   : > { %7588 = vmatmul.mubr.f32.gmra.mrb[6].mxu0 %v12923_v7  ;;  %8695 = vmatprep.subr.bf16.mxu1 %v8694_v39 }
  0x45   : > { %772 = vmatmul.mubr.f32.gmra.mrb[6].mxu1 %v12923_v7  ;;  %8601 = vmatpush3.bf16.msra.mxu0 %v9966_v40  ;;  %v8702_v40 = vpack.c.bf16 %v5821_v46, %v5820_v45  ;;  %v5769_v45 = vld [vmem:[%s12919_s2 + $0x238] sm:$0xff] }
  0x46   : > { %8697 = vmatpush3.bf16.msra.mxu1 %v8694_v39  ;;  %7590 = vmatprep.mubr.f32.mxu0 %v10138_v25  ;;  %v5784_v39 = vld [vmem:[%s12919_s2 + $0x2b0] sm:$0xff] }
  0x47   : > { %776 = vmatprep.mubr.f32.mxu1 %v10108_v9  ;;  %8603 = vmatprep.subr.bf16.mxu0 %v9979_v43  ;;  %v10169_v43 = vmax.f32 %v325_v47, 0.0  ;;  %v8726_v46 = vpack.c.bf16 %v5785_v41, %v5784_v39  ;;  %v5802_v47 = vld [vmem:[%s12920_s3 + $0xc0] sm:$0xff]  ;;  %v5731_v41 = vld [vmem:[%s12919_s2 + $0x108] sm:$0xff] }
  0x48   : > { %7591 = vmatmul.mubr.f32.gmra.mrb[8].mxu0 %v12923_v7  ;;  %8699 = vmatprep.subr.bf16.mxu1 %v8698_v31  ;;  %v5730_v39 = vld [vmem:[%s12919_s2 + $0x100] sm:$0xff] }
  0x49   : > { %777 = vmatmul.mubr.f32.gmra.mrb[8].mxu1 %v10114_v36  ;;  %8605 = vmatpush3.bf16.msra.mxu0 %v9998_v50  ;;  %v326_v50 = vld [vmem:[%s10071_s11 + $0x30] sm:$0xff] }
  0x4a   : > { %8701 = vmatpush3.bf16.msra.mxu1 %v8698_v31  ;;  %7593 = vmatprep.mubr.f32.mxu0 %v10153_v34  ;;  %v10189_v59 = vmax.f32 %v326_v50, 0.0  ;;  %v5768_v31 = vld [vmem:[%s12919_s2 + $0x230] sm:$0xff]  ;;  %v5770_v50 = vld [vmem:[%s12919_s2 + $0x240] sm:$0xff] }
  0x4b   : > { %781 = vmatprep.mubr.f32.mxu1 %v12923_v7  ;;  %8607 = vmatprep.subr.bf16.mxu0 %v10006_v54  ;;  %v5825_v54 = vld [vmem:[%s12920_s3 + $0x178] sm:$0xff]  ;;  %v8728_v51 = vpack.c.bf16 %v5769_v45, %v5768_v31 }
  0x4c   : > { %7594 = vmatmul.mubr.f32.gmra.mrb[10].mxu0 %v12923_v7  ;;  %8703 = vmatprep.subr.bf16.mxu1 %v8702_v40  ;;  %v5749_v31 = vld [vmem:[%s12919_s2 + $0x198] sm:$0xff] }
  0x4d   : > { %782 = vmatmul.mubr.f32.gmra.mrb[10].mxu1 %v12923_v7  ;;  %8609 = vmatpush3.bf16.msra.mxu0 %v10025_v60  ;;  %v8710_v60 = vpack.c.bf16 %v5825_v54, %v5824_v58  ;;  %v8730_v58 = vpack.c.bf16 %v5787_v49, %v5786_v48  ;;  %v5804_v54 = vld [vmem:[%s12920_s3 + $0xd0] sm:$0xff]  ;;  %v5877_v49 = vld [vmem:[%s12919_s2 + $0x498] sm:$0xff] }
  0x4e   : > { %8705 = vmatpush3.bf16.msra.mxu1 %v8702_v40  ;;  %7596 = vmatprep.mubr.f32.mxu0 %v10169_v43  ;;  %v5803_v40 = vld [vmem:[%s12920_s3 + $0xc8] sm:$0xff]  ;;  %v5876_v48 = vld [vmem:[%s12919_s2 + $0x490] sm:$0xff] }
  0x4f   : > { %786 = vmatprep.mubr.f32.mxu1 %v10174_v55  ;;  %8611 = vmatprep.subr.bf16.mxu0 %v10031_v63  ;;  %v5778_v63 = vld [vmem:[%s12919_s2 + $0x280] sm:$0xff]  ;;  %v8634_v52 = vpack.c.bf16 %v5803_v40, %v5802_v47  ;;  %v5859_v47 = vld [vmem:[%s12919_s2 + $0x408] sm:$0xff]  ;;  %v8652_v40 = vpack.c.bf16 %v5731_v41, %v5730_v39 }
  0x50   : > { %7597 = vmatmul.mubr.f32.gmra.mrb[12].mxu0 %v12923_v7  ;;  %8707 = vmatprep.subr.bf16.mxu1 %v8706_v56  ;;  %v8714_v4 = vpack.c.bf16 %v5779_v0, %v5778_v63  ;;  %v5739_v39 = vld [vmem:[%s12919_s2 + $0x148] sm:$0xff] }
  0x51   : > { %787 = vmatmul.mubr.f32.gmra.mrb[12].mxu1 %v10180_v57  ;;  %8613 = vmatpush3.bf16.msra.mxu0 %v10049_v5  ;;  %v5796_v5 = vld [vmem:[%s12920_s3 + $0x90] sm:$0xff] }
  0x52   : > { %8709 = vmatpush3.bf16.msra.mxu1 %v8706_v56  ;;  %7599 = vmatprep.mubr.f32.mxu0 %v10189_v59  ;;  %v8622_v13 = vpack.c.bf16 %v5797_v6, %v5796_v5  ;;  %v5771_v56 = vld [vmem:[%s12919_s2 + $0x248] sm:$0xff]  ;;  %v5790_v6 = vld [vmem:[%s12919_s2 + $0x2e0] sm:$0xff] }
  0x53   : > { %791 = vmatprep.mubr.f32.mxu1 %v12923_v7  ;;  %8615 = vmatprep.subr.bf16.mxu0 %v10052_v10  ;;  %v5780_v10 = vld [vmem:[%s12919_s2 + $0x290] sm:$0xff]  ;;  %v8732_v63 = vpack.c.bf16 %v5771_v56, %v5770_v50  ;;  %v5807_v5 = vld [vmem:[%s12920_s3 + $0xe8] sm:$0xff]  ;;  %v5750_v56 = vld [vmem:[%s12919_s2 + $0x1a0] sm:$0xff] }
  0x54   : > { %7600 = vmatmul.mubr.f32.gmra.mrb[14].mxu0 %v12923_v7  ;;  %8711 = vmatprep.subr.bf16.mxu1 %v8710_v60  ;;  %v8718_v18 = vpack.c.bf16 %v5781_v11, %v5780_v10  ;;  %v5791_v10 = vld [vmem:[%s12919_s2 + $0x2e8] sm:$0xff] }
  0x55   : > { %792 = vmatmul.mubr.f32.gmra.mrb[14].mxu1 %v12923_v7  ;;  %8617 = vmatpush3.bf16.msra.mxu0 %v10074_v15  ;;  %v5765_v15 = vld [vmem:[%s12919_s2 + $0x218] sm:$0xff] }
  0x56   : > { %8713 = vmatpush3.bf16.msra.mxu1 %v8710_v60  ;;  %716 = vmatprep.mubr.f32.mxu0 %v12923_v7  ;;  %v8720_v28 = vpack.c.bf16 %v5765_v15, %v5764_v14  ;;  %v5805_v60 = vld [vmem:[%s12920_s3 + $0xd8] sm:$0xff]  ;;  %v5775_v14 = vld [vmem:[%s12919_s2 + $0x268] sm:$0xff]  ;;  %v8738_v15 = vpack.c.bf16 %v5791_v10, %v5790_v6  ;;  %v8784_v6 = vpack.c.bf16 %v5861_v62, %v5860_v61  ;;  %v5868_v61 = vld [vmem:[%s12919_s2 + $0x450] sm:$0xff] }
  0x57   : > { %7690 = vmatprep.mubr.f32.mxu1 %v12923_v7  ;;  %8619 = vmatprep.subr.bf16.mxu0 %v8618_v1  ;;  %v8638_v0 = vpack.c.bf16 %v5805_v60, %v5804_v54  ;;  %v5751_v54 = vld [vmem:[%s12919_s2 + $0x1a8] sm:$0xff]  ;;  %v8782_v60 = vpack.c.bf16 %v5877_v49, %v5876_v48  ;;  %v5753_v10 = vld [vmem:[%s12919_s2 + $0x1b8] sm:$0xff]  ;;  %v5884_v48 = vld [vmem:[%s12919_s2 + $0x4d0] sm:$0xff] }
  0x58   : > { %717 = vmatmul.mubr.f32.vlgmr.msra.gmra.mrb[16].mxu0 %v12923_v7  ;;  %8715 = vmatprep.subr.bf16.mxu1 %v8714_v4  ;;  %v5806_v4 = vld [vmem:[%s12920_s3 + $0xe0] sm:$0xff]  ;;  %v5885_v49 = vld [vmem:[%s12919_s2 + $0x4d8] sm:$0xff] }
  0x59   : > { %7691 = vmatmul.mubr.f32.vlgmr.msra.gmra.mrb[16].mxu1 %v12923_v7  ;;  %8621 = vmatpush3.bf16.msra.mxu0 %v8618_v1  ;;  %v5772_v1 = vld [vmem:[%s12919_s2 + $0x250] sm:$0xff]  ;;  %v5869_v62 = vld [vmem:[%s12919_s2 + $0x458] sm:$0xff] }
  0x5a   : > { %8717 = vmatpush3.bf16.msra.mxu1 %v8716_v12  ;;  %721 = vmatprep.mubr.f32.mxu0 %v12923_v7  ;;  %v8736_v11 = vpack.c.bf16 %v5773_v2, %v5772_v1  ;;  %v8642_v12 = vpack.c.bf16 %v5807_v5, %v5806_v4  ;;  %v5879_v1 = vld [vmem:[%s12919_s2 + $0x4a8] sm:$0xff]  ;;  %v5734_v2 = vld [vmem:[%s12919_s2 + $0x120] sm:$0xff]  ;;  %v8658_v4 = vpack.c.bf16 %v5751_v54, %v5750_v56  ;;  %v5752_v5 = vld [vmem:[%s12919_s2 + $0x1b0] sm:$0xff] }
  0x5b   : > { %7693 = vmatprep.mubr.f32.mxu1 %v10089_v24  ;;  %8623 = vmatprep.subr.bf16.mxu0 %v8622_v13  ;;  %v5758_v56 = vld [vmem:[%s12919_s2 + $0x1e0] sm:$0xff]  ;;  %v5759_v54 = vld [vmem:[%s12919_s2 + $0x1e8] sm:$0xff] }
  0x5c   : > { %722 = vmatmul.mubr.f32.gmra.mrb[18].mxu0 %v12923_v7  ;;  %8719 = vmatprep.subr.bf16.mxu1 %v8718_v18  ;;  %v5809_v18 = vld [vmem:[%s12920_s3 + $0xf8] sm:$0xff] }
  0x5d   : > { %7694 = vmatmul.mubr.f32.gmra.mrb[18].mxu1 %v12923_v7  ;;  %8625 = vmatpush3.bf16.msra.mxu0 %v8622_v13  ;;  %v5774_v13 = vld [vmem:[%s12919_s2 + $0x260] sm:$0xff]  ;;  %v8646_v26 = vpack.c.bf16 %v5809_v18, %v5808_v16  ;;  %v5881_v16 = vld [vmem:[%s12919_s2 + $0x4b8] sm:$0xff]  ;;  %v5736_v18 = vld [vmem:[%s12919_s2 + $0x130] sm:$0xff] }
  0x5e   : > { %8721 = vmatpush3.bf16.msra.mxu1 %v8720_v28  ;;  %726 = vmatprep.mubr.f32.mxu0 %v10257_v29  ;;  %v8740_v23 = vpack.c.bf16 %v5775_v14, %v5774_v13  ;;  %v5777_v28 = vld [vmem:[%s12919_s2 + $0x278] sm:$0xff]  ;;  %v5863_v13 = vld [vmem:[%s12919_s2 + $0x428] sm:$0xff] }
  0x5f   : > { %7696 = vmatprep.mubr.f32.mxu1 %v10103_v30  ;;  %8627 = vmatprep.subr.bf16.mxu0 %v8626_v8  ;;  %v8744_v21 = vpack.c.bf16 %v5777_v28, %v5776_v27  ;;  %v5755_v27 = vld [vmem:[%s12919_s2 + $0x1c8] sm:$0xff] }
  0x60   : > { %727 = vmatmul.mubr.f32.gmra.mrb[20].mxu0 %v10267_v35  ;;  %8723 = vmatprep.subr.bf16.mxu1 %v8722_v37  ;;  %v5874_v37 = vld [vmem:[%s12919_s2 + $0x480] sm:$0xff] }
  0x61   : > { %7697 = vmatmul.mubr.f32.gmra.mrb[20].mxu1 %v12923_v7  ;;  %8629 = vmatpush3.bf16.msra.mxu0 %v8626_v8  ;;  %v8742_v8 = vpack.c.bf16 %v5793_v22, %v5792_v19  ;;  %v8778_v45 = vpack.c.bf16 %v5875_v17, %v5874_v37  ;;  %v5737_v19 = vld [vmem:[%s12919_s2 + $0x138] sm:$0xff]  ;;  %v8662_v22 = vpack.c.bf16 %v5753_v10, %v5752_v5  ;;  %v5882_v37 = vld [vmem:[%s12919_s2 + $0x4c0] sm:$0xff]  ;;  %v5883_v17 = vld [vmem:[%s12919_s2 + $0x4c8] sm:$0xff] }
  0x62   : > { %8725 = vmatpush3.bf16.msra.mxu1 %v8724_v42  ;;  %731 = vmatprep.mubr.f32.mxu0 %v12923_v7  ;;  %v8650_v42 = vpack.c.bf16 %v5747_v33, %v5746_v32  ;;  %v5865_v32 = vld [vmem:[%s12919_s2 + $0x438] sm:$0xff]  ;;  %v8664_v33 = vpack.c.bf16 %v5737_v19, %v5736_v18  ;;  %v5760_v5 = vld [vmem:[%s12919_s2 + $0x1f0] sm:$0xff] }
  0x63   : > { %7699 = vmatprep.mubr.f32.mxu1 %v10123_v38  ;;  %8631 = vmatprep.subr.bf16.mxu0 %v8630_v44  ;;  %v5761_v10 = vld [vmem:[%s12919_s2 + $0x1f8] sm:$0xff]  ;;  %v5744_v18 = vld [vmem:[%s12919_s2 + $0x170] sm:$0xff] }
  0x64   : > { %732 = vmatmul.mubr.f32.gmra.mrb[22].mxu0 %v12923_v7  ;;  %8727 = vmatprep.subr.bf16.mxu1 %v8726_v46  ;;  %v5858_v46 = vld [vmem:[%s12919_s2 + $0x400] sm:$0xff]  ;;  %v5745_v19 = vld [vmem:[%s12919_s2 + $0x178] sm:$0xff] }
  0x65   : > { %7700 = vmatmul.mubr.f32.gmra.mrb[22].mxu1 %v12923_v7  ;;  %8633 = vmatpush3.bf16.msra.mxu0 %v8630_v44  ;;  %v5748_v44 = vld [vmem:[%s12919_s2 + $0x190] sm:$0xff] }
  0x66   : > { %8729 = vmatpush3.bf16.msra.mxu1 %v8728_v51  ;;  %736 = vmatprep.mubr.f32.mxu0 %v10257_v29  ;;  %v5732_v51 = vld [vmem:[%s12919_s2 + $0x110] sm:$0xff]  ;;  %v8654_v50 = vpack.c.bf16 %v5749_v31, %v5748_v44  ;;  %v5757_v31 = vld [vmem:[%s12919_s2 + $0x1d8] sm:$0xff] }
  0x67   : > { %7702 = vmatprep.mubr.f32.mxu1 %v10138_v25  ;;  %8635 = vmatprep.subr.bf16.mxu0 %v8634_v52 }
  0x68   : > { %737 = vmatmul.mubr.f32.gmra.mrb[24].mxu0 %v10267_v35  ;;  %8731 = vmatprep.subr.bf16.mxu1 %v8730_v58  ;;  %v8780_v58 = vpack.c.bf16 %v5859_v47, %v5858_v46  ;;  %v5866_v46 = vld [vmem:[%s12919_s2 + $0x440] sm:$0xff]  ;;  %v5867_v47 = vld [vmem:[%s12919_s2 + $0x448] sm:$0xff] }
  0x69   : > { %7703 = vmatmul.mubr.f32.gmra.mrb[24].mxu1 %v12923_v7  ;;  %8637 = vmatpush3.bf16.msra.mxu0 %v8634_v52  ;;  %v5733_v52 = vld [vmem:[%s12919_s2 + $0x118] sm:$0xff] }
  0x6a   : > { %8733 = vmatpush3.bf16.msra.mxu1 %v8732_v63  ;;  %741 = vmatprep.mubr.f32.mxu0 %v12923_v7  ;;  %v8656_v63 = vpack.c.bf16 %v5733_v52, %v5732_v51  ;;  %v5740_v51 = vld [vmem:[%s12919_s2 + $0x150] sm:$0xff]  ;;  %v5741_v52 = vld [vmem:[%s12919_s2 + $0x158] sm:$0xff] }
  0x6b   : > { %7705 = vmatprep.mubr.f32.mxu1 %v10153_v34  ;;  %8639 = vmatprep.subr.bf16.mxu0 %v8638_v0 }
  0x6c   : > { %742 = vmatmul.mubr.f32.gmra.mrb[26].mxu0 %v12923_v7  ;;  %8735 = vmatprep.subr.bf16.mxu1 %v8734_v3  ;;  %v5735_v3 = vld [vmem:[%s12919_s2 + $0x128] sm:$0xff] }
  0x6d   : > { %7706 = vmatmul.mubr.f32.gmra.mrb[26].mxu1 %v12923_v7  ;;  %8641 = vmatpush3.bf16.msra.mxu0 %v8638_v0  ;;  %v5878_v0 = vld [vmem:[%s12919_s2 + $0x4a0] sm:$0xff]  ;;  %v8660_v14 = vpack.c.bf16 %v5735_v3, %v5734_v2  ;;  %v5743_v3 = vld [vmem:[%s12919_s2 + $0x168] sm:$0xff] }
  0x6e   : > { %8737 = vmatpush3.bf16.msra.mxu1 %v8736_v11  ;;  %746 = vmatprep.mubr.f32.mxu0 %v10003_v53  ;;  %v8786_v11 = vpack.c.bf16 %v5879_v1, %v5878_v0  ;;  %v5886_v0 = vld [vmem:[%s12919_s2 + $0x4e0] sm:$0xff]  ;;  %v5887_v1 = vld [vmem:[%s12919_s2 + $0x4e8] sm:$0xff] }
  0x6f   : > { %7708 = vmatprep.mubr.f32.mxu1 %v10169_v43  ;;  %8643 = vmatprep.subr.bf16.mxu0 %v8642_v12  ;;  %v5742_v2 = vld [vmem:[%s12919_s2 + $0x160] sm:$0xff] }
  0x70   : > { %747 = vmatmul.mubr.f32.gmra.mrb[28].mxu0 %v10079_v20  ;;  %8739 = vmatprep.subr.bf16.mxu1 %v8738_v15  ;;  %v5880_v15 = vld [vmem:[%s12919_s2 + $0x4b0] sm:$0xff] }
  0x71   : > { %7709 = vmatmul.mubr.f32.gmra.mrb[28].mxu1 %v12923_v7  ;;  %8645 = vmatpush3.bf16.msra.mxu0 %v8642_v12  ;;  %v5862_v12 = vld [vmem:[%s12919_s2 + $0x420] sm:$0xff]  ;;  %v8790_v28 = vpack.c.bf16 %v5881_v16, %v5880_v15  ;;  %v5888_v15 = vld [vmem:[%s12919_s2 + $0x4f0] sm:$0xff]  ;;  %v5889_v16 = vld [vmem:[%s12919_s2 + $0x4f8] sm:$0xff] }
  0x72   : > { %8741 = vmatpush3.bf16.msra.mxu1 %v8740_v23  ;;  %751 = vmatprep.mubr.f32.mxu0 %v12923_v7  ;;  %v5754_v23 = vld [vmem:[%s12919_s2 + $0x1c0] sm:$0xff] }
  0x73   : > { %7711 = vmatprep.mubr.f32.mxu1 %v10189_v59  ;;  %8647 = vmatprep.subr.bf16.mxu0 %v8646_v26  ;;  %v8666_v41 = vpack.c.bf16 %v5755_v27, %v5754_v23  ;;  %v5842_v23 = vld [vmem:[%s12919_s2 + $0x380] sm:$0xff]  ;;  %v5843_v27 = vld [vmem:[%s12919_s2 + $0x388] sm:$0xff] }
  0x74   : > { %752 = vmatmul.mubr.f32.gmra.mrb[30].mxu0 %v12923_v7  ;;  %8743 = vmatprep.subr.bf16.mxu1 %v8742_v8  ;;  %v5864_v8 = vld [vmem:[%s12919_s2 + $0x430] sm:$0xff] }
  0x75   : > { %7712 = vmatmul.mubr.f32.gmra.mrb[30].mxu1 %v12923_v7  ;;  %8649 = vmatpush3.bf16.msra.mxu0 %v8646_v26  ;;  %v8788_v26 = vpack.c.bf16 %v5863_v13, %v5862_v12  ;;  %v8792_v44 = vpack.c.bf16 %v5865_v32, %v5864_v8  ;;  %v5870_v12 = vld [vmem:[%s12919_s2 + $0x460] sm:$0xff]  ;;  %v5871_v13 = vld [vmem:[%s12919_s2 + $0x468] sm:$0xff]  ;;  %v5872_v8 = vld [vmem:[%s12919_s2 + $0x470] sm:$0xff] }
  0x76   : > { %8745 = vmatpush3.bf16.msra.mxu1 %v8744_v21  ;;  %7634 = vmatprep.mubr.f32.mxu0 %v12923_v7  ;;  %v5738_v21 = vld [vmem:[%s12919_s2 + $0x140] sm:$0xff]  ;;  %v5873_v32 = vld [vmem:[%s12919_s2 + $0x478] sm:$0xff] }
  0x77   : > { %1330 = vmatprep.mubr.f32.mxu1 %v12923_v7  ;;  %8651 = vmatprep.subr.bf16.mxu0 %v8650_v42  ;;  %v5756_v42 = vld [vmem:[%s12919_s2 + $0x1d0] sm:$0xff] }
  0x78   : > { %7635 = vmatmul.mubr.f32.vlgmr.msra.gmra.mrb[32].mxu0 %v12923_v7  ;;  %8779 = vmatprep.subr.bf16.mxu1 %v8778_v45  ;;  %v8794_v45 = vpack.c.bf16 %v5883_v17, %v5882_v37  ;;  %v5938_v37 = vld [vmem:[%s12920_s3 + $0x200] sm:$0xff]  ;;  %v5939_v17 = vld [vmem:[%s12920_s3 + $0x208] sm:$0xff] }
  0x79   : > { %1331 = vmatmul.mubr.f32.vlgmr.msra.gmra.mrb[32].mxu1 %v12923_v7  ;;  %8653 = vmatpush3.bf16.msra.mxu0 %v8652_v40  ;;  %v8668_v40 = vpack.c.bf16 %v5739_v39, %v5738_v21  ;;  %v5826_v21 = vld [vmem:[%s12919_s2 + $0x300] sm:$0xff]  ;;  %v5827_v39 = vld [vmem:[%s12919_s2 + $0x308] sm:$0xff] }
  0x7a   : > { %7637 = vmatprep.mubr.f32.mxu0 %v10089_v24  ;;  %1335 = vmatprep.mubr.f32.mxu1 %v12923_v7 }
  0x7b   : > { %8655 = vmatprep.subr.bf16.mxu0 %v8654_v50  ;;  %8781 = vmatpush3.bf16.msra.mxu1 %v8780_v58  ;;  %v8670_v50 = vpack.c.bf16 %v5757_v31, %v5756_v42  ;;  %v8796_v58 = vpack.c.bf16 %v5867_v47, %v5866_v46  ;;  %v8808_v42 = vpack.c.bf16 %v5873_v32, %v5872_v8  ;;  %v5845_v31 = vld [vmem:[%s12919_s2 + $0x398] sm:$0xff] }
  0x7c   : > { %7638 = vmatmul.mubr.f32.gmra.mrb[34].mxu0 %v12923_v7  ;;  %8783 = vmatprep.subr.bf16.mxu1 %v8782_v60  ;;  %v8798_v60 = vpack.c.bf16 %v5885_v49, %v5884_v48  ;;  %v8748_v46 = vpack.c.bf16 %v5827_v39, %v5826_v21  ;;  %v5829_v48 = vld [vmem:[%s12919_s2 + $0x318] sm:$0xff]  ;;  %v5846_v49 = vld [vmem:[%s12919_s2 + $0x3a0] sm:$0xff]  ;;  %v5907_v21 = vld [vmem:[%s12919_s2 + $0x588] sm:$0xff] }
  0x7d   : > { %1336 = vmatmul.mubr.f32.gmra.mrb[34].mxu1 %v12923_v7  ;;  %8657 = vmatpush3.bf16.msra.mxu0 %v8656_v63  ;;  %v8672_v63 = vpack.c.bf16 %v5741_v52, %v5740_v51  ;;  %v5847_v51 = vld [vmem:[%s12919_s2 + $0x3a8] sm:$0xff] }
  0x7e   : > { %7640 = vmatprep.mubr.f32.mxu0 %v10103_v30  ;;  %1340 = vmatprep.mubr.f32.mxu1 %v10257_v29 }
  0x7f   : > { %8659 = vmatprep.subr.bf16.mxu0 %v8658_v4  ;;  %8785 = vmatpush3.bf16.msra.mxu1 %v8784_v6  ;;  %v8674_v4 = vpack.c.bf16 %v5759_v54, %v5758_v56  ;;  %v8800_v6 = vpack.c.bf16 %v5869_v62, %v5868_v61  ;;  %v5830_v56 = vld [vmem:[%s12919_s2 + $0x320] sm:$0xff]  ;;  %v5848_v54 = vld [vmem:[%s12919_s2 + $0x3b0] sm:$0xff] }
  0x80   : > { %7641 = vmatmul.mubr.f32.gmra.mrb[36].mxu0 %v12923_v7  ;;  %8787 = vmatprep.subr.bf16.mxu1 %v8786_v11  ;;  %v8802_v11 = vpack.c.bf16 %v5887_v1, %v5886_v0  ;;  %v5833_v0 = vld [vmem:[%s12919_s2 + $0x338] sm:$0xff]  ;;  %v5850_v1 = vld [vmem:[%s12919_s2 + $0x3c0] sm:$0xff] }
  0x81   : > { %1341 = vmatmul.mubr.f32.gmra.mrb[36].mxu1 %v10267_v35  ;;  %8661 = vmatpush3.bf16.msra.mxu0 %v8660_v14  ;;  %v8676_v14 = vpack.c.bf16 %v5743_v3, %v5742_v2  ;;  %v5851_v2 = vld [vmem:[%s12919_s2 + $0x3c8] sm:$0xff] }
  0x82   : > { %7643 = vmatprep.mubr.f32.mxu0 %v10123_v38  ;;  %1345 = vmatprep.mubr.f32.mxu1 %v12923_v7 }
  0x83   : > { %8663 = vmatprep.subr.bf16.mxu0 %v8662_v22  ;;  %8789 = vmatpush3.bf16.msra.mxu1 %v8788_v26  ;;  %v8678_v22 = vpack.c.bf16 %v5761_v10, %v5760_v5  ;;  %v8804_v26 = vpack.c.bf16 %v5871_v13, %v5870_v12  ;;  %v5834_v5 = vld [vmem:[%s12919_s2 + $0x340] sm:$0xff]  ;;  %v5852_v10 = vld [vmem:[%s12919_s2 + $0x3d0] sm:$0xff] }
  0x84   : > { %7644 = vmatmul.mubr.f32.gmra.mrb[38].mxu0 %v12923_v7  ;;  %8791 = vmatprep.subr.bf16.mxu1 %v8790_v28  ;;  %v8806_v28 = vpack.c.bf16 %v5889_v16, %v5888_v15  ;;  %v5837_v15 = vld [vmem:[%s12919_s2 + $0x358] sm:$0xff]  ;;  %v5854_v16 = vld [vmem:[%s12919_s2 + $0x3e0] sm:$0xff] }
  0x85   : > { %1346 = vmatmul.mubr.f32.gmra.mrb[38].mxu1 %v12923_v7  ;;  %8665 = vmatpush3.bf16.msra.mxu0 %v8664_v33  ;;  %v8680_v33 = vpack.c.bf16 %v5745_v19, %v5744_v18  ;;  %v5855_v18 = vld [vmem:[%s12919_s2 + $0x3e8] sm:$0xff] }
  0x86   : > { %7646 = vmatprep.mubr.f32.mxu0 %v10138_v25  ;;  %1350 = vmatprep.mubr.f32.mxu1 %v10257_v29 }
  0x87   : > { %8667 = vmatprep.subr.bf16.mxu0 %v8666_v41  ;;  %8793 = vmatpush3.bf16.msra.mxu1 %v8792_v44  ;;  %v8746_v41 = vpack.c.bf16 %v5843_v27, %v5842_v23  ;;  %v5844_v44 = vld [vmem:[%s12919_s2 + $0x390] sm:$0xff]  ;;  %v5838_v23 = vld [vmem:[%s12919_s2 + $0x360] sm:$0xff] }
  0x88   : > { %7647 = vmatmul.mubr.f32.gmra.mrb[40].mxu0 %v12923_v7  ;;  %8795 = vmatprep.subr.bf16.mxu1 %v8794_v45  ;;  %v10631_v45 = vpack.c.bf16 %v5939_v17, %v5938_v37  ;;  %v8750_v47 = vpack.c.bf16 %v5845_v31, %v5844_v44  ;;  %v5856_v27 = vld [vmem:[%s12919_s2 + $0x3f0] sm:$0xff]  ;;  %v5841_v37 = vld [vmem:[%s12919_s2 + $0x378] sm:$0xff]  ;;  %v5906_v17 = vld [vmem:[%s12919_s2 + $0x580] sm:$0xff] }
  0x89   : > { %1351 = vmatmul.mubr.f32.gmra.mrb[40].mxu1 %v10267_v35  ;;  %8669 = vmatpush3.bf16.msra.mxu0 %v8668_v40  ;;  %v5828_v40 = vld [vmem:[%s12919_s2 + $0x310] sm:$0xff]  ;;  %v5941_v44 = vld [vmem:[%s12920_s3 + $0x218] sm:$0xff] }
  0x8a   : > { %7649 = vmatprep.mubr.f32.mxu0 %v10153_v34  ;;  %1355 = vmatprep.mubr.f32.mxu1 %v12923_v7  ;;  %v8752_v52 = vpack.c.bf16 %v5829_v48, %v5828_v40  ;;  %v5944_v48 = vld [vmem:[%s12920_s3 + $0x230] sm:$0xff] }
  0x8b   : > { %8671 = vmatprep.subr.bf16.mxu0 %v8670_v50  ;;  %8797 = vmatpush3.bf16.msra.mxu1 %v8796_v58  ;;  %v8754_v50 = vpack.c.bf16 %v5847_v51, %v5846_v49  ;;  %v5831_v58 = vld [vmem:[%s12919_s2 + $0x328] sm:$0xff]  ;;  %v5945_v49 = vld [vmem:[%s12920_s3 + $0x238] sm:$0xff]  ;;  %v5946_v51 = vld [vmem:[%s12920_s3 + $0x240] sm:$0xff] }
  0x8c   : > { %7650 = vmatmul.mubr.f32.gmra.mrb[42].mxu0 %v12923_v7  ;;  %8799 = vmatprep.subr.bf16.mxu1 %v8798_v60  ;;  %v5849_v60 = vld [vmem:[%s12919_s2 + $0x3b8] sm:$0xff]  ;;  %v8756_v61 = vpack.c.bf16 %v5831_v58, %v5830_v56  ;;  %v5948_v56 = vld [vmem:[%s12920_s3 + $0x250] sm:$0xff] }
  0x8d   : > { %1356 = vmatmul.mubr.f32.gmra.mrb[42].mxu1 %v12923_v7  ;;  %8673 = vmatpush3.bf16.msra.mxu0 %v8672_v63  ;;  %v8758_v62 = vpack.c.bf16 %v5849_v60, %v5848_v54  ;;  %v5832_v63 = vld [vmem:[%s12919_s2 + $0x330] sm:$0xff]  ;;  %v5949_v58 = vld [vmem:[%s12920_s3 + $0x258] sm:$0xff]  ;;  %v5950_v60 = vld [vmem:[%s12920_s3 + $0x260] sm:$0xff] }
  0x8e   : > { %7652 = vmatprep.mubr.f32.mxu0 %v10169_v43  ;;  %1360 = vmatprep.mubr.f32.mxu1 %v10003_v53  ;;  %v8760_v3 = vpack.c.bf16 %v5833_v0, %v5832_v63  ;;  %v8894_v54 = vpack.c.bf16 %v5949_v58, %v5948_v56  ;;  %v5952_v63 = vld [vmem:[%s12920_s3 + $0x270] sm:$0xff]  ;;  %v5953_v0 = vld [vmem:[%s12920_s3 + $0x278] sm:$0xff]  ;;  %v5902_v56 = vld [vmem:[%s12919_s2 + $0x560] sm:$0xff] }
  0x8f   : > { %8675 = vmatprep.subr.bf16.mxu0 %v8674_v4  ;;  %8801 = vmatpush3.bf16.msra.mxu1 %v8800_v6  ;;  %v8762_v4 = vpack.c.bf16 %v5851_v2, %v5850_v1  ;;  %v5835_v6 = vld [vmem:[%s12919_s2 + $0x348] sm:$0xff]  ;;  %v8902_v1 = vpack.c.bf16 %v5953_v0, %v5952_v63  ;;  %v5954_v2 = vld [vmem:[%s12920_s3 + $0x280] sm:$0xff]  ;;  %v5904_v63 = vld [vmem:[%s12919_s2 + $0x570] sm:$0xff] }
  0x90   : > { %7653 = vmatmul.mubr.f32.gmra.mrb[44].mxu0 %v12923_v7  ;;  %8803 = vmatprep.subr.bf16.mxu1 %v8802_v11  ;;  %v5853_v11 = vld [vmem:[%s12919_s2 + $0x3d8] sm:$0xff]  ;;  %v8764_v12 = vpack.c.bf16 %v5835_v6, %v5834_v5  ;;  %v5891_v5 = vld [vmem:[%s12919_s2 + $0x508] sm:$0xff] }
  0x91   : > { %1361 = vmatmul.mubr.f32.gmra.mrb[44].mxu1 %v10079_v20  ;;  %8677 = vmatpush3.bf16.msra.mxu0 %v8676_v14  ;;  %v8766_v13 = vpack.c.bf16 %v5853_v11, %v5852_v10  ;;  %v5836_v14 = vld [vmem:[%s12919_s2 + $0x350] sm:$0xff]  ;;  %v5909_v11 = vld [vmem:[%s12919_s2 + $0x598] sm:$0xff]  ;;  %v5903_v58 = vld [vmem:[%s12919_s2 + $0x568] sm:$0xff] }
  0x92   : > { %7655 = vmatprep.mubr.f32.mxu0 %v10189_v59  ;;  %1365 = vmatprep.mubr.f32.mxu1 %v12923_v7  ;;  %v8768_v19 = vpack.c.bf16 %v5837_v15, %v5836_v14  ;;  %v5908_v10 = vld [vmem:[%s12919_s2 + $0x590] sm:$0xff]  ;;  %v5893_v15 = vld [vmem:[%s12919_s2 + $0x518] sm:$0xff] }
  0x93   : > { %8679 = vmatprep.subr.bf16.mxu0 %v8678_v22  ;;  %8805 = vmatpush3.bf16.msra.mxu1 %v8804_v26  ;;  %v8770_v22 = vpack.c.bf16 %v5855_v18, %v5854_v16  ;;  %v5839_v26 = vld [vmem:[%s12919_s2 + $0x368] sm:$0xff]  ;;  %v5892_v14 = vld [vmem:[%s12919_s2 + $0x510] sm:$0xff]  ;;  %v5910_v16 = vld [vmem:[%s12919_s2 + $0x5a0] sm:$0xff] }
  0x94   : > { %7656 = vmatmul.mubr.f32.gmra.mrb[46].mxu0 %v12923_v7  ;;  %8807 = vmatprep.subr.bf16.mxu1 %v8806_v28  ;;  %v5857_v28 = vld [vmem:[%s12919_s2 + $0x3f8] sm:$0xff]  ;;  %v8772_v8 = vpack.c.bf16 %v5839_v26, %v5838_v23  ;;  %v5911_v18 = vld [vmem:[%s12919_s2 + $0x5a8] sm:$0xff]  ;;  %v5894_v23 = vld [vmem:[%s12919_s2 + $0x520] sm:$0xff] }
  0x95   : > { %1366 = vmatmul.mubr.f32.gmra.mrb[46].mxu1 %v12923_v7  ;;  %8681 = vmatpush3.bf16.msra.mxu0 %v8680_v33  ;;  %v8774_v32 = vpack.c.bf16 %v5857_v28, %v5856_v27  ;;  %v5840_v33 = vld [vmem:[%s12919_s2 + $0x370] sm:$0xff]  ;;  %v5895_v26 = vld [vmem:[%s12919_s2 + $0x528] sm:$0xff]  ;;  %v5913_v28 = vld [vmem:[%s12919_s2 + $0x5b8] sm:$0xff] }
  0x96   : > { %1023 = vmatprep.mubr.f32.mxu0 %v12923_v7  ;;  %1370 = vmatprep.mubr.f32.mxu1 %v10003_v53  ;;  %v8776_v39 = vpack.c.bf16 %v5841_v37, %v5840_v33  ;;  %v5912_v27 = vld [vmem:[%s12919_s2 + $0x5b0] sm:$0xff]  ;;  %v5897_v37 = vld [vmem:[%s12919_s2 + $0x538] sm:$0xff] }
  0x97   : > { %8747 = vmatprep.subr.bf16.mxu0 %v8746_v41  ;;  %8809 = vmatpush3.bf16.msra.mxu1 %v8808_v42  ;;  %v8810_v41 = vpack.c.bf16 %v5907_v21, %v5906_v17  ;;  %v5940_v42 = vld [vmem:[%s12920_s3 + $0x210] sm:$0xff]  ;;  %v5914_v17 = vld [vmem:[%s12919_s2 + $0x5c0] sm:$0xff]  ;;  %v5915_v21 = vld [vmem:[%s12919_s2 + $0x5c8] sm:$0xff] }
  0x98   : > { %1024 = vmatmul.mubr.f32.vlgmr.msra.gmra.mrb[48].mxu0 %v12923_v7  ;;  %8875 = vmatprep.subr.bf16.mxu1 %v10631_v45  ;;  %v8878_v31 = vpack.c.bf16 %v5941_v44, %v5940_v42  ;;  %v5896_v33 = vld [vmem:[%s12919_s2 + $0x530] sm:$0xff]  ;;  %v5898_v42 = vld [vmem:[%s12919_s2 + $0x540] sm:$0xff]  ;;  %v5899_v44 = vld [vmem:[%s12919_s2 + $0x548] sm:$0xff] }
  0x99   : > { %1371 = vmatmul.mubr.f32.gmra.mrb[48].mxu1 %v10079_v20  ;;  %8749 = vmatpush3.bf16.msra.mxu0 %v8748_v46  ;;  %v5942_v46 = vld [vmem:[%s12920_s3 + $0x220] sm:$0xff]  ;;  %v5905_v0 = vld [vmem:[%s12919_s2 + $0x578] sm:$0xff] }
  0x9a   : > { %1028 = vmatprep.mubr.f32.mxu0 %v12923_v7  ;;  %1375 = vmatprep.mubr.f32.mxu1 %v12923_v7 }
  0x9b   : > { %8751 = vmatprep.subr.bf16.mxu0 %v8750_v47  ;;  %v5943_v47 = vld [vmem:[%s12920_s3 + $0x228] sm:$0xff] }
  0x9c   : > { %1029 = vmatmul.mubr.f32.gmra.mrb[50].mxu0 %v12923_v7  ;;  %v8882_v40 = vpack.c.bf16 %v5943_v47, %v5942_v46  ;;  %v5917_v46 = vld [vmem:[%s12919_s2 + $0x5d8] sm:$0xff]  ;;  %v8828_v47 = vpack.c.bf16 %v5899_v44, %v5898_v42 }
  0x9d   : > { %1376 = vmatmul.mubr.f32.gmra.mrb[50].mxu1 %v12923_v7  ;;  %1033 = vmatprep.mubr.f32.mxu0 %v10257_v29 }
  0x9e   : > { %1380 = vmatprep.mubr.f32.mxu1 %v10108_v9  ;;  %8753 = vmatpush3.bf16.msra.mxu0 %v8752_v52  ;;  %v5947_v52 = vld [vmem:[%s12920_s3 + $0x248] sm:$0xff] }
  0x9f   : > { %8755 = vmatprep.subr.bf16.mxu0 %v8754_v50  ;;  %v8890_v50 = vpack.c.bf16 %v5947_v52, %v5946_v51  ;;  %v5919_v51 = vld [vmem:[%s12919_s2 + $0x5e8] sm:$0xff] }
  0xa0   : > { %1034 = vmatmul.mubr.f32.gmra.mrb[52].mxu0 %v10267_v35 }
  0xa1   : > { %1381 = vmatmul.mubr.f32.gmra.mrb[52].mxu1 %v10114_v36  ;;  %1038 = vmatprep.mubr.f32.mxu0 %v12923_v7 }
  0xa2   : > { %1385 = vmatprep.mubr.f32.mxu1 %v12923_v7  ;;  %8757 = vmatpush3.bf16.msra.mxu0 %v8756_v61  ;;  %v5951_v61 = vld [vmem:[%s12920_s3 + $0x268] sm:$0xff] }
  0xa3   : > { %8759 = vmatprep.subr.bf16.mxu0 %v8758_v62  ;;  %v8898_v62 = vpack.c.bf16 %v5951_v61, %v5950_v60  ;;  %v5921_v60 = vld [vmem:[%s12919_s2 + $0x5f8] sm:$0xff]  ;;  %v8836_v61 = vpack.c.bf16 %v5903_v58, %v5902_v56  ;;  %v5924_v58 = vld [vmem:[%s12920_s3 + $0x190] sm:$0xff] }
  0xa4   : > { %1039 = vmatmul.mubr.f32.gmra.mrb[54].mxu0 %v12923_v7 }
  0xa5   : > { %1386 = vmatmul.mubr.f32.gmra.mrb[54].mxu1 %v12923_v7  ;;  %1043 = vmatprep.mubr.f32.mxu0 %v10257_v29 }
  0xa6   : > { %1390 = vmatprep.mubr.f32.mxu1 %v10108_v9  ;;  %8761 = vmatpush3.bf16.msra.mxu0 %v8760_v3  ;;  %v5955_v3 = vld [vmem:[%s12920_s3 + $0x288] sm:$0xff] }
  0xa7   : > { %8763 = vmatprep.subr.bf16.mxu0 %v8762_v4  ;;  %v5890_v4 = vld [vmem:[%s12919_s2 + $0x500] sm:$0xff]  ;;  %v10836_v6 = vpack.c.bf16 %v5955_v3, %v5954_v2  ;;  %v5923_v2 = vld [vmem:[%s12920_s3 + $0x188] sm:$0xff]  ;;  %v8840_v3 = vpack.c.bf16 %v5905_v0, %v5904_v63  ;;  %v6004_v0 = vld [vmem:[%s12919_s2 + $0x710] sm:$0xff] }
  0xa8   : > { %1044 = vmatmul.mubr.f32.gmra.mrb[56].mxu0 %v10267_v35 }
  0xa9   : > { %1391 = vmatmul.mubr.f32.gmra.mrb[56].mxu1 %v10114_v36  ;;  %1048 = vmatprep.mubr.f32.mxu0 %v12923_v7 }
  0xaa   : > { %1395 = vmatprep.mubr.f32.mxu1 %v12923_v7  ;;  %8765 = vmatpush3.bf16.msra.mxu0 %v8764_v12  ;;  %v8812_v12 = vpack.c.bf16 %v5891_v5, %v5890_v4  ;;  %v5956_v5 = vld [vmem:[%s12920_s3 + $0x290] sm:$0xff] }
  0xab   : > { %8767 = vmatprep.subr.bf16.mxu0 %v8766_v13  ;;  %v8814_v13 = vpack.c.bf16 %v5909_v11, %v5908_v10  ;;  %v5957_v10 = vld [vmem:[%s12920_s3 + $0x298] sm:$0xff] }
  0xac   : > { %1049 = vmatmul.mubr.f32.gmra.mrb[58].mxu0 %v12923_v7  ;;  %v8910_v11 = vpack.c.bf16 %v5957_v10, %v5956_v5  ;;  %v6023_v5 = vld [vmem:[%s12919_s2 + $0x7a8] sm:$0xff] }
  0xad   : > { %1396 = vmatmul.mubr.f32.gmra.mrb[58].mxu1 %v12923_v7  ;;  %1053 = vmatprep.mubr.f32.mxu0 %v10003_v53 }
  0xae   : > { %1400 = vmatprep.mubr.f32.mxu1 %v10174_v55  ;;  %8769 = vmatpush3.bf16.msra.mxu0 %v8768_v19  ;;  %v8816_v19 = vpack.c.bf16 %v5893_v15, %v5892_v14  ;;  %v5960_v15 = vld [vmem:[%s12920_s3 + $0x2b0] sm:$0xff] }
  0xaf   : > { %8771 = vmatprep.subr.bf16.mxu0 %v8770_v22  ;;  %v8818_v22 = vpack.c.bf16 %v5911_v18, %v5910_v16  ;;  %v5961_v16 = vld [vmem:[%s12920_s3 + $0x2b8] sm:$0xff]  ;;  %v5962_v18 = vld [vmem:[%s12920_s3 + $0x2c0] sm:$0xff] }
  0xb0   : > { %1054 = vmatmul.mubr.f32.gmra.mrb[60].mxu0 %v10079_v20 }
  0xb1   : > { %1401 = vmatmul.mubr.f32.gmra.mrb[60].mxu1 %v10180_v57  ;;  %1058 = vmatprep.mubr.f32.mxu0 %v12923_v7 }
  0xb2   : > { %1405 = vmatprep.mubr.f32.mxu1 %v12923_v7  ;;  %8773 = vmatpush3.bf16.msra.mxu0 %v8772_v8  ;;  %v8820_v8 = vpack.c.bf16 %v5895_v26, %v5894_v23  ;;  %v5964_v23 = vld [vmem:[%s12920_s3 + $0x2d0] sm:$0xff]  ;;  %v5965_v26 = vld [vmem:[%s12920_s3 + $0x2d8] sm:$0xff] }
  0xb3   : > { %8775 = vmatprep.subr.bf16.mxu0 %v8774_v32  ;;  %v8822_v32 = vpack.c.bf16 %v5913_v28, %v5912_v27  ;;  %v8926_v27 = vpack.c.bf16 %v5965_v26, %v5964_v23  ;;  %v5966_v28 = vld [vmem:[%s12920_s3 + $0x2e0] sm:$0xff]  ;;  %v5928_v26 = vld [vmem:[%s12920_s3 + $0x1b0] sm:$0xff] }
  0xb4   : > { %1059 = vmatmul.mubr.f32.gmra.mrb[62].mxu0 %v12923_v7 }
  0xb5   : > { %1406 = vmatmul.mubr.f32.gmra.mrb[62].mxu1 %v12923_v7  ;;  %1063 = vmatprep.mubr.f32.mxu0 %v10003_v53 }
  0xb6   : > { %1750 = vmatprep.mubr.f32.mxu1 %v10257_v29  ;;  %8777 = vmatpush3.bf16.msra.mxu0 %v8776_v39  ;;  %v8824_v39 = vpack.c.bf16 %v5897_v37, %v5896_v33  ;;  %v327_v33 = vld [vmem:[%s10071_s11 + $0x38] sm:$0xff]  ;;  %v5968_v37 = vld [vmem:[%s12920_s3 + $0x2f0] sm:$0xff]  ;;  %s5725_s11 = sshll.u32 %s230_s10, 6 }
  0xb7   : > { %8811 = vmatprep.subr.bf16.mxu0 %v8810_v41  ;;  %v8826_v41 = vpack.c.bf16 %v5915_v21, %v5914_v17  ;;  %v5969_v17 = vld [vmem:[%s12920_s3 + $0x2f8] sm:$0xff]  ;;  %s232_s14 = scalar_lea.vmem [#allocation5], %s5725_s11 }
  0xb8   : > { %1064 = vmatmul.mubr.f32.gmra.mrb[64].mxu0 %v10079_v20  ;;  %v8934_v44 = vpack.c.bf16 %v5969_v17, %v5968_v37  ;;  %v6008_v37 = vld [vmem:[%s12919_s2 + $0x730] sm:$0xff]  ;;  %v6009_v17 = vld [vmem:[%s12919_s2 + $0x738] sm:$0xff]  ;;  %s5647_s15 = sshll.u32 %s232_s14, 4  ;;  %s12874_s15 = int_to_ptr.vmem [resolvable:$true] %s5647_s15 }
  0xb9   : > { %1751 = vmatmul.mubr.f32.vlgmr.msra.gmra.mrb[64].mxu1 %v10267_v35  ;;  %1068 = vmatprep.mubr.f32.mxu0 %v12923_v7  ;;  %s9707_s25 = scalar_lea.vmem %s12874_s15, 1024  ;;  %p9714_p0 = scmp.lt.s32.totalorder %s12874_s15, %s9712_s6 }
  0xba   : > { %1755 = vmatprep.mubr.f32.mxu1 %v12923_v7  ;;  %8877 = vmatpush3.bf16.msra.mxu1 %v10631_v45  ;;  %v8886_v45 = vpack.c.bf16 %v5945_v49, %v5944_v48  ;;  %v5900_v48 = vld [vmem:[%s12919_s2 + $0x550] sm:$0xff]  ;;  %v5901_v49 = vld [vmem:[%s12919_s2 + $0x558] sm:$0xff]  ;;  %p9708_p11 = scmp.ne.s32.totalorder %s12874_s15, %s9707_s25  ;;  %p9715_p1 = scmp.lt.s32.totalorder %s9713_s7, %s9707_s25 }
  0xbb   : > { %8879 = vmatprep.subr.bf16.mxu1 %v8878_v31  ;;  %v8832_v52 = vpack.c.bf16 %v5901_v49, %v5900_v48 }
  0xbc   : > { %1069 = vmatmul.mubr.f32.gmra.mrb[66].mxu0 %v12923_v7  ;;  %p9709_p12 = pnand %p9708_p11, %p9844_p5  ;;  %p9716_p2 = por %p9715_p1, %p9714_p0 }
  0xbd   : > { %1756 = vmatmul.mubr.f32.gmra.mrb[66].mxu1 %v12923_v7  ;;  %1073 = vmatprep.mubr.f32.mxu0 %v10108_v9 }
  0xbe   : > { %1760 = vmatprep.mubr.f32.mxu1 %v10257_v29  ;;  %8881 = vmatpush3.bf16.msra.mxu1 %v8878_v31  ;;  %v5916_v31 = vld [vmem:[%s12919_s2 + $0x5d0] sm:$0xff]  ;;  %p9710_p13 = pneg %p9709_p12 }
  0xbf   : > { %8883 = vmatprep.subr.bf16.mxu1 %v8882_v40 }
  0xc0   : > { %1074 = vmatmul.mubr.f32.gmra.mrb[68].mxu0 %v10114_v36  ;;  %p9717_p3 = pnand %p9716_p2, %p9710_p13 }
  0xc1   : > { %1761 = vmatmul.mubr.f32.gmra.mrb[68].mxu1 %v10267_v35  ;;  %1078 = vmatprep.mubr.f32.mxu0 %v12923_v7 }
  0xc2   : > { %1765 = vmatprep.mubr.f32.mxu1 %v12923_v7  ;;  %8885 = vmatpush3.bf16.msra.mxu1 %v8882_v40  ;;  %v8830_v40 = vpack.c.bf16 %v5917_v46, %v5916_v31  ;;  %v6018_v31 = vld [vmem:[%s12919_s2 + $0x780] sm:$0xff]  ;;  %v6019_v46 = vld [vmem:[%s12919_s2 + $0x788] sm:$0xff] }
  0xc3   : > { %8887 = vmatprep.subr.bf16.mxu1 %v8886_v45  ;;  %v8970_v49 = vpack.c.bf16 %v6019_v46, %v6018_v31  ;;  %v5930_v46 = vld [vmem:[%s12920_s3 + $0x1c0] sm:$0xff] }
  0xc4   : > { %1079 = vmatmul.mubr.f32.gmra.mrb[70].mxu0 %v12923_v7 }
  0xc5   : > { %1766 = vmatmul.mubr.f32.gmra.mrb[70].mxu1 %v12923_v7  ;;  %1083 = vmatprep.mubr.f32.mxu0 %v10108_v9 }
  0xc6   : > { %1770 = vmatprep.mubr.f32.mxu1 %v10003_v53  ;;  %8889 = vmatpush3.bf16.msra.mxu1 %v8886_v45  ;;  %v5918_v45 = vld [vmem:[%s12919_s2 + $0x5e0] sm:$0xff] }
  0xc7   : > { %8891 = vmatprep.subr.bf16.mxu1 %v8890_v50 }
  0xc8   : > { %1084 = vmatmul.mubr.f32.gmra.mrb[72].mxu0 %v10114_v36 }
  0xc9   : > { %1771 = vmatmul.mubr.f32.gmra.mrb[72].mxu1 %v10079_v20  ;;  %1088 = vmatprep.mubr.f32.mxu0 %v12923_v7 }
  0xca   : > { %1775 = vmatprep.mubr.f32.mxu1 %v12923_v7  ;;  %8893 = vmatpush3.bf16.msra.mxu1 %v8890_v50  ;;  %v8834_v50 = vpack.c.bf16 %v5919_v51, %v5918_v45  ;;  %v6002_v45 = vld [vmem:[%s12919_s2 + $0x700] sm:$0xff]  ;;  %v6003_v51 = vld [vmem:[%s12919_s2 + $0x708] sm:$0xff] }
  0xcb   : > { %8895 = vmatprep.subr.bf16.mxu1 %v8894_v54 }
  0xcc   : > { %1089 = vmatmul.mubr.f32.gmra.mrb[74].mxu0 %v12923_v7 }
  0xcd   : > { %1776 = vmatmul.mubr.f32.gmra.mrb[74].mxu1 %v12923_v7  ;;  %1093 = vmatprep.mubr.f32.mxu0 %v10174_v55 }
  0xce   : > { %1780 = vmatprep.mubr.f32.mxu1 %v10003_v53  ;;  %8897 = vmatpush3.bf16.msra.mxu1 %v8894_v54  ;;  %v5920_v54 = vld [vmem:[%s12919_s2 + $0x5f0] sm:$0xff] }
  0xcf   : > { %8899 = vmatprep.subr.bf16.mxu1 %v8898_v62 }
  0xd0   : > { %1094 = vmatmul.mubr.f32.gmra.mrb[76].mxu0 %v10180_v57 }
  0xd1   : > { %1781 = vmatmul.mubr.f32.gmra.mrb[76].mxu1 %v10079_v20  ;;  %1098 = vmatprep.mubr.f32.mxu0 %v12923_v7 }
  0xd2   : > { %1785 = vmatprep.mubr.f32.mxu1 %v12923_v7  ;;  %8901 = vmatpush3.bf16.msra.mxu1 %v8898_v62  ;;  %v8838_v62 = vpack.c.bf16 %v5921_v60, %v5920_v54  ;;  %v5925_v54 = vld [vmem:[%s12920_s3 + $0x198] sm:$0xff] }
  0xd3   : > { %8903 = vmatprep.subr.bf16.mxu1 %v8902_v1 }
  0xd4   : > { %1099 = vmatmul.mubr.f32.gmra.mrb[78].mxu0 %v12923_v7 }
  0xd5   : > { %1786 = vmatmul.mubr.f32.gmra.mrb[78].mxu1 %v12923_v7  ;;  %1556 = vmatprep.mubr.f32.mxu0 %v10257_v29 }
  0xd6   : > { %1790 = vmatprep.mubr.f32.mxu1 %v10108_v9  ;;  %8905 = vmatpush3.bf16.msra.mxu1 %v8902_v1  ;;  %v5922_v1 = vld [vmem:[%s12920_s3 + $0x180] sm:$0xff] }
  0xd7   : > { %8907 = vmatprep.subr.bf16.mxu1 %v10836_v6  ;;  %v10961_v4 = vpack.c.bf16 %v5923_v2, %v5922_v1  ;;  %v6005_v1 = vld [vmem:[%s12919_s2 + $0x718] sm:$0xff]  ;;  %v8846_v2 = vpack.c.bf16 %v5925_v54, %v5924_v58 }
  0xd8   : > { %1557 = vmatmul.mubr.f32.vlgmr.msra.gmra.mrb[80].mxu0 %v10267_v35  ;;  %v6029_v58 = vld [vmem:[%s12919_s2 + $0x7d8] sm:$0xff] }
  0xd9   : > { %1791 = vmatmul.mubr.f32.gmra.mrb[80].mxu1 %v10114_v36  ;;  %8813 = vmatpush3.bf16.msra.mxu0 %v8812_v12  ;;  %v5958_v12 = vld [vmem:[%s12920_s3 + $0x2a0] sm:$0xff] }
  0xda   : > { %1561 = vmatprep.mubr.f32.mxu0 %v12923_v7  ;;  %1795 = vmatprep.mubr.f32.mxu1 %v12923_v7 }
  0xdb   : > { %8815 = vmatprep.subr.bf16.mxu0 %v8814_v13  ;;  %v5959_v13 = vld [vmem:[%s12920_s3 + $0x2a8] sm:$0xff] }
  0xdc   : > { %1562 = vmatmul.mubr.f32.gmra.mrb[82].mxu0 %v12923_v7  ;;  %v8914_v14 = vpack.c.bf16 %v5959_v13, %v5958_v12  ;;  %v5927_v12 = vld [vmem:[%s12920_s3 + $0x1a8] sm:$0xff] }
  0xdd   : > { %1796 = vmatmul.mubr.f32.gmra.mrb[82].mxu1 %v12923_v7  ;;  %1566 = vmatprep.mubr.f32.mxu0 %v10257_v29 }
  0xde   : > { %1800 = vmatprep.mubr.f32.mxu1 %v10108_v9  ;;  %8817 = vmatpush3.bf16.msra.mxu0 %v8816_v19  ;;  %v5963_v19 = vld [vmem:[%s12920_s3 + $0x2c8] sm:$0xff] }
  0xdf   : > { %8819 = vmatprep.subr.bf16.mxu0 %v8818_v22  ;;  %v8922_v22 = vpack.c.bf16 %v5963_v19, %v5962_v18  ;;  %v6024_v18 = vld [vmem:[%s12919_s2 + $0x7b0] sm:$0xff]  ;;  %v6025_v19 = vld [vmem:[%s12919_s2 + $0x7b8] sm:$0xff] }
  0xe0   : > { %1567 = vmatmul.mubr.f32.gmra.mrb[84].mxu0 %v10267_v35 }
  0xe1   : > { %1801 = vmatmul.mubr.f32.gmra.mrb[84].mxu1 %v10114_v36  ;;  %1571 = vmatprep.mubr.f32.mxu0 %v12923_v7 }
  0xe2   : > { %1805 = vmatprep.mubr.f32.mxu1 %v12923_v7  ;;  %8821 = vmatpush3.bf16.msra.mxu0 %v8820_v8  ;;  %v5967_v8 = vld [vmem:[%s12920_s3 + $0x2e8] sm:$0xff] }
  0xe3   : > { %8823 = vmatprep.subr.bf16.mxu0 %v8822_v32  ;;  %v8930_v32 = vpack.c.bf16 %v5967_v8, %v5966_v28 }
  0xe4   : > { %1572 = vmatmul.mubr.f32.gmra.mrb[86].mxu0 %v12923_v7 }
  0xe5   : > { %1806 = vmatmul.mubr.f32.gmra.mrb[86].mxu1 %v12923_v7  ;;  %1576 = vmatprep.mubr.f32.mxu0 %v10003_v53 }
  0xe6   : > { %1810 = vmatprep.mubr.f32.mxu1 %v10174_v55  ;;  %8825 = vmatpush3.bf16.msra.mxu0 %v8824_v39 }
  0xe7   : > { %8827 = vmatprep.subr.bf16.mxu0 %v8826_v41  ;;  %v11036_v41 = vmax.f32 %v327_v33, 0.0  ;;  %v8982_v33 = vpack.c.bf16 %v6025_v19, %v6024_v18 }
  0xe8   : > { %1577 = vmatmul.mubr.f32.gmra.mrb[88].mxu0 %v10079_v20 }
  0xe9   : > { %1811 = vmatmul.mubr.f32.gmra.mrb[88].mxu1 %v10180_v57  ;;  %1581 = vmatprep.mubr.f32.mxu0 %v12923_v7 }
  0xea   : > { %1815 = vmatprep.mubr.f32.mxu1 %v12923_v7  ;;  %8829 = vmatpush3.bf16.msra.mxu0 %v8828_v47 }
  0xeb   : > { %8831 = vmatprep.subr.bf16.mxu0 %v8830_v40 }
  0xec   : > { %1582 = vmatmul.mubr.f32.gmra.mrb[90].mxu0 %v12923_v7 }
  0xed   : > { %1816 = vmatmul.mubr.f32.gmra.mrb[90].mxu1 %v12923_v7  ;;  %1586 = vmatprep.mubr.f32.mxu0 %v10003_v53 }
  0xee   : > { %1820 = vmatprep.mubr.f32.mxu1 %v10174_v55  ;;  %8833 = vmatpush3.bf16.msra.mxu0 %v8832_v52  ;;  %v6020_v52 = vld [vmem:[%s12919_s2 + $0x790] sm:$0xff] }
  0xef   : > { %8835 = vmatprep.subr.bf16.mxu0 %v8834_v50  ;;  %v6021_v50 = vld [vmem:[%s12919_s2 + $0x798] sm:$0xff] }
  0xf0   : > { %1587 = vmatmul.mubr.f32.gmra.mrb[92].mxu0 %v10079_v20  ;;  %v8974_v63 = vpack.c.bf16 %v6021_v50, %v6020_v52  ;;  %v6010_v52 = vld [vmem:[%s12919_s2 + $0x740] sm:$0xff]  ;;  %v6011_v50 = vld [vmem:[%s12919_s2 + $0x748] sm:$0xff] }
  0xf1   : > { %1821 = vmatmul.mubr.f32.gmra.mrb[92].mxu1 %v10180_v57  ;;  %1591 = vmatprep.mubr.f32.mxu0 %v12923_v7 }
  0xf2   : > { %1825 = vmatprep.mubr.f32.mxu1 %v12923_v7  ;;  %8837 = vmatpush3.bf16.msra.mxu0 %v8836_v61  ;;  %v8972_v61 = vpack.c.bf16 %v6003_v51, %v6002_v45 }
  0xf3   : > { %8839 = vmatprep.subr.bf16.mxu0 %v8838_v62 }
  0xf4   : > { %1592 = vmatmul.mubr.f32.gmra.mrb[94].mxu0 %v12923_v7 }
  0xf5   : > { %1826 = vmatmul.mubr.f32.gmra.mrb[94].mxu1 %v12923_v7  ;;  %1596 = vmatprep.mubr.f32.mxu0 %v10108_v9 }
  0xf6   : > { %7802 = vmatprep.mubr.f32.mxu1 %v10089_v24  ;;  %8841 = vmatpush3.bf16.msra.mxu0 %v8840_v3  ;;  %v6022_v3 = vld [vmem:[%s12919_s2 + $0x7a0] sm:$0xff] }
  0xf7   : > { %8843 = vmatprep.subr.bf16.mxu0 %v10961_v4 }
  0xf8   : > { %1597 = vmatmul.mubr.f32.gmra.mrb[96].mxu0 %v10114_v36 }
  0xf9   : > { %7803 = vmatmul.mubr.f32.vlgmr.msra.gmra.mrb[96].mxu1 %v12923_v7  ;;  %1601 = vmatprep.mubr.f32.mxu0 %v12923_v7 }
  0xfa   : > { %8909 = vmatpush3.bf16.msra.mxu1 %v10836_v6  ;;  %7805 = vmatprep.mubr.f32.mxu1 %v10103_v30  ;;  %v8918_v6 = vpack.c.bf16 %v5961_v16, %v5960_v15  ;;  %v8978_v16 = vpack.c.bf16 %v6023_v5, %v6022_v3  ;;  %v6012_v5 = vld [vmem:[%s12919_s2 + $0x750] sm:$0xff] }
  0xfb   : > { %8911 = vmatprep.subr.bf16.mxu1 %v8910_v11 }
  0xfc   : > { %1602 = vmatmul.mubr.f32.gmra.mrb[98].mxu0 %v12923_v7 }
  0xfd   : > { %7806 = vmatmul.mubr.f32.gmra.mrb[98].mxu1 %v12923_v7  ;;  %1606 = vmatprep.mubr.f32.mxu0 %v10108_v9 }
  0xfe   : > { %8913 = vmatpush3.bf16.msra.mxu1 %v8910_v11  ;;  %7808 = vmatprep.mubr.f32.mxu1 %v10123_v38  ;;  %v5926_v11 = vld [vmem:[%s12920_s3 + $0x1a0] sm:$0xff] }
  0xff   : > { %8915 = vmatprep.subr.bf16.mxu1 %v8914_v14 }
 0x100   : > { %1607 = vmatmul.mubr.f32.gmra.mrb[100].mxu0 %v10114_v36 }
 0x101   : > { %7809 = vmatmul.mubr.f32.gmra.mrb[100].mxu1 %v12923_v7  ;;  %1611 = vmatprep.mubr.f32.mxu0 %v12923_v7 }
 0x102   : > { %8917 = vmatpush3.bf16.msra.mxu1 %v8914_v14  ;;  %7811 = vmatprep.mubr.f32.mxu1 %v10138_v25  ;;  %v8976_v14 = vpack.c.bf16 %v6005_v1, %v6004_v0  ;;  %v8988_v1 = vpack.c.bf16 %v6011_v50, %v6010_v52  ;;  %v6082_v52 = vld [vmem:[%s12920_s3 + $0x380] sm:$0xff]  ;;  %v6083_v50 = vld [vmem:[%s12920_s3 + $0x388] sm:$0xff] }
 0x103   : > { %8919 = vmatprep.subr.bf16.mxu1 %v8918_v6 }
 0x104   : > { %1612 = vmatmul.mubr.f32.gmra.mrb[102].mxu0 %v12923_v7 }
 0x105   : > { %7812 = vmatmul.mubr.f32.gmra.mrb[102].mxu1 %v12923_v7  ;;  %1616 = vmatprep.mubr.f32.mxu0 %v10174_v55 }
 0x106   : > { %8921 = vmatpush3.bf16.msra.mxu1 %v8918_v6  ;;  %7814 = vmatprep.mubr.f32.mxu1 %v10153_v34  ;;  %v6007_v6 = vld [vmem:[%s12919_s2 + $0x728] sm:$0xff] }
 0x107   : > { %8923 = vmatprep.subr.bf16.mxu1 %v8922_v22 }
 0x108   : > { %1617 = vmatmul.mubr.f32.gmra.mrb[104].mxu0 %v10180_v57 }
 0x109   : > { %7815 = vmatmul.mubr.f32.gmra.mrb[104].mxu1 %v12923_v7  ;;  %1621 = vmatprep.mubr.f32.mxu0 %v12923_v7 }
 0x10a   : > { %8925 = vmatpush3.bf16.msra.mxu1 %v8922_v22  ;;  %7817 = vmatprep.mubr.f32.mxu1 %v10169_v43  ;;  %v8850_v22 = vpack.c.bf16 %v5927_v12, %v5926_v11  ;;  %v6030_v11 = vld [vmem:[%s12919_s2 + $0x7e0] sm:$0xff]  ;;  %v6031_v12 = vld [vmem:[%s12919_s2 + $0x7e8] sm:$0xff] }
 0x10b   : > { %8927 = vmatprep.subr.bf16.mxu1 %v8926_v27 }
 0x10c   : > { %1622 = vmatmul.mubr.f32.gmra.mrb[106].mxu0 %v12923_v7  ;;  %v6338_v21 = vpop.f32.mrb[0].mxu1 }
 0x10d   : > { %7818 = vmatmul.mubr.f32.gmra.mrb[106].mxu1 %v12923_v7  ;;  %1626 = vmatprep.mubr.f32.mxu0 %v10174_v55  ;;  %v6339_v39 = vpop.f32.mrb[1].mxu1 }
 0x10e   : > { %8929 = vmatpush3.bf16.msra.mxu1 %v8926_v27  ;;  %7820 = vmatprep.mubr.f32.mxu1 %v10189_v59  ;;  %v11038_v42 = vadd.f32 %v6339_v39, %v6338_v21  ;;  %v5929_v27 = vld [vmem:[%s12920_s3 + $0x1b8] sm:$0xff]  ;;  %v6026_v21 = vld [vmem:[%s12919_s2 + $0x7c0] sm:$0xff]  ;;  %v6027_v39 = vld [vmem:[%s12919_s2 + $0x7c8] sm:$0xff] }
 0x10f   : > { %8931 = vmatprep.subr.bf16.mxu1 %v8930_v32  ;;  %v8986_v51 = vpack.c.bf16 %v6027_v39, %v6026_v21  ;;  %v5936_v21 = vld [vmem:[%s12920_s3 + $0x1f0] sm:$0xff]  ;;  %v5937_v39 = vld [vmem:[%s12920_s3 + $0x1f8] sm:$0xff] }
 0x110   : > { %1627 = vmatmul.mubr.f32.gmra.mrb[108].mxu0 %v10180_v57  ;;  %v6341_v47 = vpop.f32.mrb[2].mxu1 }
 0x111   : > { %7821 = vmatmul.mubr.f32.gmra.mrb[108].mxu1 %v12923_v7  ;;  %1631 = vmatprep.mubr.f32.mxu0 %v12923_v7  ;;  %v6342_v40 = vpop.f32.mrb[3].mxu1 }
 0x112   : > { %8933 = vmatpush3.bf16.msra.mxu1 %v8930_v32  ;;  %7823 = vmatprep.mubr.f32.mxu1 %v11036_v41  ;;  %v11050_v48 = vadd.f32 %v6342_v40, %v6341_v47  ;;  %v5931_v47 = vld [vmem:[%s12920_s3 + $0x1c8] sm:$0xff] }
 0x113   : > { %8935 = vmatprep.subr.bf16.mxu1 %v8934_v44  ;;  %v8858_v54 = vpack.c.bf16 %v5931_v47, %v5930_v46  ;;  %v6016_v47 = vld [vmem:[%s12919_s2 + $0x770] sm:$0xff] }
 0x114   : > { %1632 = vmatmul.mubr.f32.gmra.mrb[110].mxu0 %v12923_v7  ;;  %v6344_v56 = vpop.f32.mrb[4].mxu1 }
 0x115   : > { %7824 = vmatmul.mubr.f32.gmra.mrb[110].mxu1 %v12923_v7  ;;  %1944 = vmatprep.mubr.f32.mxu0 %v10257_v29  ;;  %v6345_v60 = vpop.f32.mrb[5].mxu1 }
 0x116   : > { %8937 = vmatpush3.bf16.msra.mxu1 %v8934_v44  ;;  %7858 = vmatprep.mubr.f32.mxu1 %v10089_v24  ;;  %v11074_v62 = vadd.f32 %v6345_v60, %v6344_v56  ;;  %v8854_v44 = vpack.c.bf16 %v5929_v27, %v5928_v26  ;;  %v6028_v56 = vld [vmem:[%s12919_s2 + $0x7d0] sm:$0xff]  ;;  %v6014_v26 = vld [vmem:[%s12919_s2 + $0x760] sm:$0xff]  ;;  %v6015_v27 = vld [vmem:[%s12919_s2 + $0x768] sm:$0xff] }
 0x117   : > { %8971 = vmatprep.subr.bf16.mxu1 %v8970_v49  ;;  %v8984_v49 = vpack.c.bf16 %v6009_v17, %v6008_v37  ;;  %v8990_v3 = vpack.c.bf16 %v6029_v58, %v6028_v56  ;;  %v5986_v58 = vld [vmem:[%s12919_s2 + $0x680] sm:$0xff] }
 0x118   : > { %1945 = vmatmul.mubr.f32.vlgmr.msra.gmra.mrb[112].mxu0 %v10267_v35  ;;  %v6347_v10 = vpop.f32.mrb[6].mxu1 }
 0x119   : > { %7859 = vmatmul.mubr.f32.vlgmr.msra.gmra.mrb[16].mxu1 %v12923_v7  ;;  %8845 = vmatpush3.bf16.msra.mxu0 %v10961_v4  ;;  %v6348_v13 = vpop.f32.mrb[7].mxu1  ;;  %v6006_v4 = vld [vmem:[%s12919_s2 + $0x720] sm:$0xff] }
 0x11a   : > { %8973 = vmatpush3.bf16.msra.mxu1 %v8972_v61  ;;  %1949 = vmatprep.mubr.f32.mxu0 %v12923_v7  ;;  %v11098_v15 = vadd.f32 %v6348_v13, %v6347_v10  ;;  %v8980_v8 = vpack.c.bf16 %v6007_v6, %v6006_v4  ;;  %v5932_v61 = vld [vmem:[%s12920_s3 + $0x1d0] sm:$0xff]  ;;  %v6013_v10 = vld [vmem:[%s12919_s2 + $0x758] sm:$0xff]  ;;  %v5935_v4 = vld [vmem:[%s12920_s3 + $0x1e8] sm:$0xff] }
 0x11b   : > { %7861 = vmatprep.mubr.f32.mxu1 %v10103_v30  ;;  %8975 = vmatprep.subr.bf16.mxu1 %v8974_v63  ;;  %v5933_v63 = vld [vmem:[%s12920_s3 + $0x1d8] sm:$0xff]  ;;  %v8992_v18 = vpack.c.bf16 %v6013_v10, %v6012_v5 }
 0x11c   : > { %1950 = vmatmul.mubr.f32.gmra.mrb[114].mxu0 %v12923_v7  ;;  %8847 = vmatprep.subr.bf16.mxu0 %v8846_v2  ;;  %v6350_v23 = vpop.f32.mrb[8].mxu1  ;;  %v8862_v13 = vpack.c.bf16 %v5933_v63, %v5932_v61  ;;  %v9066_v63 = vpack.c.bf16 %v6083_v50, %v6082_v52  ;;  %v6085_v5 = vld [vmem:[%s12920_s3 + $0x398] sm:$0xff] }
 0x11d   : > { %7862 = vmatmul.mubr.f32.gmra.mrb[18].mxu1 %v12923_v7  ;;  %1954 = vmatprep.mubr.f32.mxu0 %v10257_v29  ;;  %v6351_v28 = vpop.f32.mrb[9].mxu1 }
 0x11e   : > { %8977 = vmatpush3.bf16.msra.mxu1 %v8976_v14  ;;  %7864 = vmatprep.mubr.f32.mxu1 %v10123_v38  ;;  %v11123_v32 = vadd.f32 %v6351_v28, %v6350_v23  ;;  %v8994_v23 = vpack.c.bf16 %v6031_v12, %v6030_v11 }
 0x11f   : > { %8979 = vmatprep.subr.bf16.mxu1 %v8978_v16  ;;  %8849 = vmatpush3.bf16.msra.mxu0 %v8846_v2  ;;  %v5934_v16 = vld [vmem:[%s12920_s3 + $0x1e0] sm:$0xff] }
 0x120   : > { %1955 = vmatmul.mubr.f32.gmra.mrb[116].mxu0 %v10267_v35  ;;  %8851 = vmatprep.subr.bf16.mxu0 %v8850_v22  ;;  %v6353_v31 = vpop.f32.mrb[10].mxu1  ;;  %v8866_v37 = vpack.c.bf16 %v5935_v4, %v5934_v16  ;;  %v6087_v16 = vld [vmem:[%s12920_s3 + $0x3a8] sm:$0xff] }
 0x121   : > { %7865 = vmatmul.mubr.f32.gmra.mrb[20].mxu1 %v12923_v7  ;;  %1959 = vmatprep.mubr.f32.mxu0 %v12923_v7  ;;  %v6354_v40 = vpop.f32.mrb[11].mxu1 }
 0x122   : > { %8981 = vmatpush3.bf16.msra.mxu1 %v8980_v8  ;;  %7867 = vmatprep.mubr.f32.mxu1 %v10138_v25  ;;  %v11147_v45 = vadd.f32 %v6354_v40, %v6353_v31  ;;  %v6032_v8 = vld [vmem:[%s12919_s2 + $0x7f0] sm:$0xff]  ;;  %v6017_v40 = vld [vmem:[%s12919_s2 + $0x778] sm:$0xff] }
 0x123   : > { %8983 = vmatprep.subr.bf16.mxu1 %v8982_v33  ;;  %8853 = vmatpush3.bf16.msra.mxu0 %v8850_v22  ;;  %v6033_v33 = vld [vmem:[%s12919_s2 + $0x7f8] sm:$0xff] }
 0x124   : > { %1960 = vmatmul.mubr.f32.gmra.mrb[118].mxu0 %v12923_v7  ;;  %8855 = vmatprep.subr.bf16.mxu0 %v8854_v44  ;;  %v6356_v60 = vpop.f32.mrb[12].mxu1  ;;  %v8998_v46 = vpack.c.bf16 %v6033_v33, %v6032_v8 }
 0x125   : > { %7868 = vmatmul.mubr.f32.gmra.mrb[22].mxu1 %v12923_v7  ;;  %1964 = vmatprep.mubr.f32.mxu0 %v10003_v53  ;;  %v6357_v0 = vpop.f32.mrb[13].mxu1 }
 0x126   : > { %8985 = vmatpush3.bf16.msra.mxu1 %v8984_v49  ;;  %7870 = vmatprep.mubr.f32.mxu1 %v10153_v34  ;;  %v11171_v2 = vadd.f32 %v6357_v0, %v6356_v60  ;;  %v9000_v60 = vpack.c.bf16 %v6017_v40, %v6016_v47  ;;  %v6092_v47 = vld [vmem:[%s12920_s3 + $0x3d0] sm:$0xff]  ;;  %v6093_v40 = vld [vmem:[%s12920_s3 + $0x3d8] sm:$0xff] }
 0x127   : > { %8987 = vmatprep.subr.bf16.mxu1 %v8986_v51  ;;  %8857 = vmatpush3.bf16.msra.mxu0 %v8854_v44  ;;  %v8996_v44 = vpack.c.bf16 %v6015_v27, %v6014_v26  ;;  %v8870_v51 = vpack.c.bf16 %v5937_v39, %v5936_v21  ;;  %v6089_v26 = vld [vmem:[%s12920_s3 + $0x3b8] sm:$0xff]  ;;  %v6091_v21 = vld [vmem:[%s12920_s3 + $0x3c8] sm:$0xff]  ;;  %v9086_v52 = vpack.c.bf16 %v6093_v40, %v6092_v47 }
 0x128   : > { %1965 = vmatmul.mubr.f32.gmra.mrb[120].mxu0 %v10079_v20  ;;  %8859 = vmatprep.subr.bf16.mxu0 %v8858_v54  ;;  %v6359_v14 = vpop.f32.mrb[14].mxu1 }
 0x129   : > { %7871 = vmatmul.mubr.f32.gmra.mrb[24].mxu1 %v12923_v7  ;;  %1969 = vmatprep.mubr.f32.mxu0 %v12923_v7  ;;  %v6360_v6 = vpop.f32.mrb[15].mxu1 }
 0x12a   : > { %8989 = vmatpush3.bf16.msra.mxu1 %v8988_v1  ;;  %7873 = vmatprep.mubr.f32.mxu1 %v10169_v43  ;;  %v11195_v19 = vadd.f32 %v6360_v6, %v6359_v14  ;;  %v6086_v14 = vld [vmem:[%s12920_s3 + $0x3a0] sm:$0xff] }
 0x12b   : > { %v6314_v22 = vpop.f32.mrb[16].mxu0  ;;  %8991 = vmatprep.subr.bf16.mxu1 %v8990_v3  ;;  %8861 = vmatpush3.bf16.msra.mxu0 %v8858_v54  ;;  %v5987_v54 = vld [vmem:[%s12919_s2 + $0x688] sm:$0xff]  ;;  %v6084_v3 = vld [vmem:[%s12920_s3 + $0x390] sm:$0xff] }
 0x12c   : > { %v6315_v28 = vpop.f32.mrb[17].mxu0  ;;  %1970 = vmatmul.mubr.f32.gmra.mrb[122].mxu0 %v12923_v7  ;;  %8863 = vmatprep.subr.bf16.mxu0 %v8862_v13  ;;  %v8938_v1 = vpack.c.bf16 %v5987_v54, %v5986_v58  ;;  %v9070_v12 = vpack.c.bf16 %v6085_v5, %v6084_v3  ;;  %v6094_v58 = vld [vmem:[%s12920_s3 + $0x3e0] sm:$0xff]  ;;  %v6095_v54 = vld [vmem:[%s12920_s3 + $0x3e8] sm:$0xff]  ;;  %v6096_v3 = vld [vmem:[%s12920_s3 + $0x3f0] sm:$0xff] }
 0x12d   : > { %v11210_v17 = vadd.f32 %v6315_v28, %v6314_v22  ;;  %7874 = vmatmul.mubr.f32.gmra.mrb[26].mxu1 %v12923_v7  ;;  %1974 = vmatprep.mubr.f32.mxu0 %v10003_v53  ;;  %v6097_v5 = vld [vmem:[%s12920_s3 + $0x3f8] sm:$0xff] }
 0x12e   : > { %8993 = vmatpush3.bf16.msra.mxu1 %v8992_v18  ;;  %7876 = vmatprep.mubr.f32.mxu1 %v10189_v59  ;;  %v9074_v18 = vpack.c.bf16 %v6087_v16, %v6086_v14  ;;  %v9094_v14 = vpack.c.bf16 %v6097_v5, %v6096_v3 }
 0x12f   : > { %v6317_v31 = vpop.f32.mrb[18].mxu0  ;;  %8995 = vmatprep.subr.bf16.mxu1 %v8994_v23  ;;  %8865 = vmatpush3.bf16.msra.mxu0 %v8862_v13  ;;  %v6088_v23 = vld [vmem:[%s12920_s3 + $0x3b0] sm:$0xff] }
 0x130   : > { %v6318_v49 = vpop.f32.mrb[19].mxu0  ;;  %1975 = vmatmul.mubr.f32.gmra.mrb[124].mxu0 %v10079_v20  ;;  %8867 = vmatprep.subr.bf16.mxu0 %v8866_v37  ;;  %v9078_v8 = vpack.c.bf16 %v6089_v26, %v6088_v23  ;;  %v5970_v26 = vld [vmem:[%s12919_s2 + $0x600] sm:$0xff] }
 0x131   : > { %v11234_v56 = vadd.f32 %v6318_v49, %v6317_v31  ;;  %7877 = vmatmul.mubr.f32.gmra.mrb[28].mxu1 %v12923_v7  ;;  %1979 = vmatprep.mubr.f32.mxu0 %v12923_v7 }
 0x132   : > { %8997 = vmatpush3.bf16.msra.mxu1 %v8996_v44  ;;  %7879 = vmatprep.mubr.f32.mxu1 %v11036_v41 }
 0x133   : > { %v6320_v61 = vpop.f32.mrb[20].mxu0  ;;  %8999 = vmatprep.subr.bf16.mxu1 %v8998_v46  ;;  %8869 = vmatpush3.bf16.msra.mxu0 %v8866_v37  ;;  %v6090_v37 = vld [vmem:[%s12920_s3 + $0x3c0] sm:$0xff] }
 0x134   : > { %v6321_v0 = vpop.f32.mrb[21].mxu0  ;;  %1980 = vmatmul.mubr.f32.gmra.mrb[126].mxu0 %v12923_v7  ;;  %8871 = vmatprep.subr.bf16.mxu0 %v8870_v51  ;;  %v9082_v31 = vpack.c.bf16 %v6091_v21, %v6090_v37 }
 0x135   : > { %v11252_v10 = vadd.f32 %v6321_v0, %v6320_v61  ;;  %7880 = vmatmul.mubr.f32.gmra.mrb[30].mxu1 %v12923_v7  ;;  %1984 = vmatprep.mubr.f32.mxu0 %v10108_v9 }
 0x136   : > { %9001 = vmatpush3.bf16.msra.mxu1 %v9000_v60  ;;  %2916 = vmatprep.mubr.f32.mxu1 %v10257_v29 }
 0x137   : > { %v6323_v11 = vpop.f32.mrb[22].mxu0  ;;  %8873 = vmatpush3.bf16.msra.mxu0 %v8870_v51  ;;  %9067 = vmatprep.subr.bf16.mxu1 %v9066_v63 }
 0x138   : > { %v6324_v13 = vpop.f32.mrb[23].mxu0  ;;  %1985 = vmatmul.mubr.f32.gmra.mrb[128].mxu0 %v10114_v36  ;;  %8939 = vmatprep.subr.bf16.mxu0 %v8938_v1 }
 0x139   : > { %v11264_v4 = vadd.f32 %v6324_v13, %v6323_v11  ;;  %2917 = vmatmul.mubr.f32.vlgmr.msra.gmra.mrb[112].mxu1 %v10267_v35  ;;  %1989 = vmatprep.mubr.f32.mxu0 %v12923_v7 }
 0x13a   : > { %2921 = vmatprep.mubr.f32.mxu1 %v12923_v7  ;;  %9069 = vmatpush3.bf16.msra.mxu1 %v9066_v63  ;;  %v9090_v63 = vpack.c.bf16 %v6095_v54, %v6094_v58 }
 0x13b   : > { %v6326_v6 = vpop.f32.mrb[24].mxu0  ;;  %9071 = vmatprep.subr.bf16.mxu1 %v9070_v12 }
 0x13c   : > { %v6327_v22 = vpop.f32.mrb[25].mxu0  ;;  %1990 = vmatmul.mubr.f32.gmra.mrb[130].mxu0 %v12923_v7 }
 0x13d   : > { %v11276_v27 = vadd.f32 %v6327_v22, %v6326_v6  ;;  %2922 = vmatmul.mubr.f32.gmra.mrb[114].mxu1 %v12923_v7  ;;  %1994 = vmatprep.mubr.f32.mxu0 %v10108_v9  ;;  %v6099_v22 = vld [vmem:[%s12920_s3 + $0x408] sm:$0xff] }
 0x13e   : > { %2926 = vmatprep.mubr.f32.mxu1 %v10003_v53  ;;  %9073 = vmatpush3.bf16.msra.mxu1 %v9070_v12 }
 0x13f   : > { %v6329_v28 = vpop.f32.mrb[26].mxu0  ;;  %9075 = vmatprep.subr.bf16.mxu1 %v9074_v18 }
 0x140   : > { %v6330_v33 = vpop.f32.mrb[27].mxu0  ;;  %1995 = vmatmul.mubr.f32.gmra.mrb[132].mxu0 %v10114_v36 }
 0x141   : > { %v11288_v39 = vadd.f32 %v6330_v33, %v6329_v28  ;;  %2927 = vmatmul.mubr.f32.gmra.mrb[116].mxu1 %v10079_v20  ;;  %1999 = vmatprep.mubr.f32.mxu0 %v12923_v7  ;;  %v5971_v28 = vld [vmem:[%s12919_s2 + $0x608] sm:$0xff] }
 0x142   : > { %2931 = vmatprep.mubr.f32.mxu1 %v12923_v7  ;;  %9077 = vmatpush3.bf16.msra.mxu1 %v9074_v18  ;;  %v6098_v18 = vld [vmem:[%s12920_s3 + $0x400] sm:$0xff]  ;;  %v8940_v47 = vpack.c.bf16 %v5971_v28, %v5970_v26  ;;  %v5993_v26 = vld [vmem:[%s12919_s2 + $0x6b8] sm:$0xff] }
 0x143   : > { %v6332_v44 = vpop.f32.mrb[28].mxu0  ;;  %9079 = vmatprep.subr.bf16.mxu1 %v9078_v8  ;;  %v11351_v37 = vpack.c.bf16 %v6099_v22, %v6098_v18 }
 0x144   : > { %v6333_v46 = vpop.f32.mrb[29].mxu0  ;;  %2000 = vmatmul.mubr.f32.gmra.mrb[134].mxu0 %v12923_v7 }
 0x145   : > { %v11300_v49 = vadd.f32 %v6333_v46, %v6332_v44  ;;  %2932 = vmatmul.mubr.f32.gmra.mrb[118].mxu1 %v12923_v7  ;;  %2004 = vmatprep.mubr.f32.mxu0 %v10174_v55  ;;  %v5988_v44 = vld [vmem:[%s12919_s2 + $0x690] sm:$0xff] }
 0x146   : > { %2936 = vmatprep.mubr.f32.mxu1 %v10003_v53  ;;  %9081 = vmatpush3.bf16.msra.mxu1 %v9078_v8 }
 0x147   : > { %v6335_v51 = vpop.f32.mrb[30].mxu0  ;;  %9083 = vmatprep.subr.bf16.mxu1 %v9082_v31 }
 0x148   : > { %v6336_v50 = vpop.f32.mrb[31].mxu0  ;;  %2005 = vmatmul.mubr.f32.gmra.mrb[136].mxu0 %v10180_v57 }
 0x149   : > { %v11312_v60 = vadd.f32 %v6336_v50, %v6335_v51  ;;  %2937 = vmatmul.mubr.f32.gmra.mrb[120].mxu1 %v10079_v20  ;;  %2009 = vmatprep.mubr.f32.mxu0 %v12923_v7  ;;  %v5972_v51 = vld [vmem:[%s12919_s2 + $0x610] sm:$0xff] }
 0x14a   : > { %2941 = vmatprep.mubr.f32.mxu1 %v12923_v7  ;;  %9085 = vmatpush3.bf16.msra.mxu1 %v9082_v31  ;;  %v5989_v31 = vld [vmem:[%s12919_s2 + $0x698] sm:$0xff] }
 0x14b   : > { %v7636_v61 = vpop.f32.mrb[32].mxu0  ;;  %9087 = vmatprep.subr.bf16.mxu1 %v9086_v52  ;;  %v8942_v54 = vpack.c.bf16 %v5989_v31, %v5988_v44  ;;  %v5976_v31 = vld [vmem:[%s12919_s2 + $0x630] sm:$0xff] }
 0x14c   : > { %v11317_v0 = vpop.f32.mrb[33].mxu0  ;;  %2010 = vmatmul.mubr.f32.gmra.mrb[138].mxu0 %v12923_v7  ;;  %v6538_v1 = vpop.f32.mrb[32].mxu1  ;;  %v5990_v61 = vld [vmem:[%s12919_s2 + $0x6a0] sm:$0xff] }
 0x14d   : > { %2942 = vmatmul.mubr.f32.gmra.mrb[122].mxu1 %v12923_v7  ;;  %2014 = vmatprep.mubr.f32.mxu0 %v10174_v55  ;;  %v6539_v11 = vpop.f32.mrb[33].mxu1 }
 0x14e   : > { %2946 = vmatprep.mubr.f32.mxu1 %v10108_v9  ;;  %v11329_v12 = vadd.f32 %v6539_v11, %v6538_v1  ;;  %9089 = vmatpush3.bf16.msra.mxu1 %v9086_v52  ;;  %v5973_v52 = vld [vmem:[%s12919_s2 + $0x618] sm:$0xff]  ;;  %v5974_v11 = vld [vmem:[%s12919_s2 + $0x620] sm:$0xff] }
 0x14f   : > { %v7639_v13 = vpop.f32.mrb[34].mxu0  ;;  %9091 = vmatprep.subr.bf16.mxu1 %v9090_v63  ;;  %v8944_v3 = vpack.c.bf16 %v5973_v52, %v5972_v51 }
 0x150   : > { %v11331_v16 = vpop.f32.mrb[35].mxu0  ;;  %2015 = vmatmul.mubr.f32.gmra.mrb[140].mxu0 %v10180_v57  ;;  %v6541_v6 = vpop.f32.mrb[34].mxu1  ;;  %v5975_v13 = vld [vmem:[%s12919_s2 + $0x628] sm:$0xff] }
 0x151   : > { %2947 = vmatmul.mubr.f32.gmra.mrb[124].mxu1 %v10114_v36  ;;  %2019 = vmatprep.mubr.f32.mxu0 %v12923_v7  ;;  %v6542_v23 = vpop.f32.mrb[35].mxu1 }
 0x152   : > { %2951 = vmatprep.mubr.f32.mxu1 %v12923_v7  ;;  %v11349_v8 = vadd.f32 %v6542_v23, %v6541_v6  ;;  %9093 = vmatpush3.bf16.msra.mxu1 %v9090_v63  ;;  %v5991_v63 = vld [vmem:[%s12919_s2 + $0x6a8] sm:$0xff]  ;;  %v5992_v23 = vld [vmem:[%s12919_s2 + $0x6b0] sm:$0xff] }
 0x153   : > { %v7642_v33 = vpop.f32.mrb[36].mxu0  ;;  %9095 = vmatprep.subr.bf16.mxu1 %v9094_v14  ;;  %v8946_v18 = vpack.c.bf16 %v5991_v63, %v5990_v61  ;;  %v8950_v51 = vpack.c.bf16 %v5993_v26, %v5992_v23  ;;  %v5996_v23 = vld [vmem:[%s12919_s2 + $0x6d0] sm:$0xff]  ;;  %v5997_v26 = vld [vmem:[%s12919_s2 + $0x6d8] sm:$0xff] }
 0x154   : > { %v11353_v21 = vpop.f32.mrb[37].mxu0  ;;  %2020 = vmatmul.mubr.f32.gmra.mrb[142].mxu0 %v12923_v7  ;;  %v6544_v46 = vpop.f32.mrb[36].mxu1  ;;  %v8948_v33 = vpack.c.bf16 %v5975_v13, %v5974_v11 }
 0x155   : > { %2952 = vmatmul.mubr.f32.gmra.mrb[126].mxu1 %v12923_v7  ;;  %7746 = vmatprep.mubr.f32.mxu0 %v10089_v24  ;;  %v6545_v40 = vpop.f32.mrb[37].mxu1 }
 0x156   : > { %2956 = vmatprep.mubr.f32.mxu1 %v10108_v9  ;;  %v11371_v50 = vadd.f32 %v6545_v40, %v6544_v46  ;;  %9097 = vmatpush3.bf16.msra.mxu1 %v9094_v14  ;;  %v5977_v46 = vld [vmem:[%s12919_s2 + $0x638] sm:$0xff] }
 0x157   : > { %v7645_v58 = vpop.f32.mrb[38].mxu0  ;;  %9099 = vmatprep.subr.bf16.mxu1 %v11351_v37  ;;  %v8952_v63 = vpack.c.bf16 %v5977_v46, %v5976_v31  ;;  %v5980_v31 = vld [vmem:[%s12919_s2 + $0x650] sm:$0xff]  ;;  %v5981_v46 = vld [vmem:[%s12919_s2 + $0x658] sm:$0xff] }
 0x158   : > { %v11374_v24 = vpop.f32.mrb[39].mxu0  ;;  %7747 = vmatmul.mubr.f32.vlgmr.msra.gmra.mrb[0].mxu0 %v12923_v7  ;;  %v6547_v1 = vpop.f32.mrb[38].mxu1  ;;  %v5994_v58 = vld [vmem:[%s12919_s2 + $0x6c0] sm:$0xff] }
 0x159   : > { %2957 = vmatmul.mubr.f32.gmra.mrb[128].mxu1 %v10114_v36  ;;  %8941 = vmatpush3.bf16.msra.mxu0 %v8940_v47  ;;  %v6548_v5 = vpop.f32.mrb[39].mxu1 }
 0x15a   : > { %7749 = vmatprep.mubr.f32.mxu0 %v10103_v30  ;;  %2961 = vmatprep.mubr.f32.mxu1 %v12923_v7  ;;  %v11392_v14 = vadd.f32 %v6548_v5, %v6547_v1  ;;  %v5979_v5 = vld [vmem:[%s12919_s2 + $0x648] sm:$0xff] }
 0x15b   : > { %v7648_v6 = vpop.f32.mrb[40].mxu0  ;;  %8943 = vmatprep.subr.bf16.mxu0 %v8942_v54  ;;  %v5995_v54 = vld [vmem:[%s12919_s2 + $0x6c8] sm:$0xff] }
 0x15c   : > { %12930 = vst [vmem:[#allocation8_spill] sm:$0xff] %v11392_v14  ;;  %v11394_v22 = vpop.f32.mrb[41].mxu0  ;;  %7750 = vmatmul.mubr.f32.gmra.mrb[2].mxu0 %v12923_v7  ;;  %v6550_v28 = vpop.f32.mrb[40].mxu1  ;;  %v8954_v6 = vpack.c.bf16 %v5995_v54, %v5994_v58  ;;  %v8958_v58 = vpack.c.bf16 %v5997_v26, %v5996_v23 }
 0x15d   : > { %2962 = vmatmul.mubr.f32.gmra.mrb[130].mxu1 %v12923_v7  ;;  %8945 = vmatpush3.bf16.msra.mxu0 %v8944_v3  ;;  %v6551_v44 = vpop.f32.mrb[41].mxu1  ;;  %v5978_v3 = vld [vmem:[%s12919_s2 + $0x640] sm:$0xff] }
 0x15e   : > { %7752 = vmatprep.mubr.f32.mxu0 %v10123_v38  ;;  %2966 = vmatprep.mubr.f32.mxu1 %v10174_v55  ;;  %v11412_v47 = vadd.f32 %v6551_v44, %v6550_v28 }
 0x15f   : > { %v7651_v40 = vpop.f32.mrb[42].mxu0  ;;  %8947 = vmatprep.subr.bf16.mxu0 %v8946_v18 }
 0x160   : > { %12931 = vst [vmem:[#allocation9_spill] sm:$0xff] %v11412_v47  ;;  %v11414_v52 = vpop.f32.mrb[43].mxu0  ;;  %7753 = vmatmul.mubr.f32.gmra.mrb[4].mxu0 %v12923_v7  ;;  %v6553_v61 = vpop.f32.mrb[42].mxu1 }
 0x161   : > { %2967 = vmatmul.mubr.f32.gmra.mrb[132].mxu1 %v10180_v57  ;;  %8949 = vmatpush3.bf16.msra.mxu0 %v8948_v33  ;;  %v6554_v1 = vpop.f32.mrb[43].mxu1  ;;  %v8956_v33 = vpack.c.bf16 %v5979_v5, %v5978_v3  ;;  %v8960_v3 = vpack.c.bf16 %v5981_v46, %v5980_v31  ;;  %v6001_v31 = vld [vmem:[%s12919_s2 + $0x6f8] sm:$0xff] }
 0x162   : > { %7755 = vmatprep.mubr.f32.mxu0 %v10138_v25  ;;  %2971 = vmatprep.mubr.f32.mxu1 %v12923_v7  ;;  %v11432_v11 = vadd.f32 %v6554_v1, %v6553_v61  ;;  %v5998_v61 = vld [vmem:[%s12919_s2 + $0x6e0] sm:$0xff] }
 0x163   : > { %v7654_v13 = vpop.f32.mrb[44].mxu0  ;;  %8951 = vmatprep.subr.bf16.mxu0 %v8950_v51 }
 0x164   : > { %12932 = vst [vmem:[#allocation10_spill] sm:$0xff] %v11432_v11  ;;  %v11434_v18 = vpop.f32.mrb[45].mxu0  ;;  %7756 = vmatmul.mubr.f32.gmra.mrb[6].mxu0 %v12923_v7  ;;  %v6556_v28 = vpop.f32.mrb[44].mxu1  ;;  %v5982_v13 = vld [vmem:[%s12919_s2 + $0x660] sm:$0xff] }
 0x165   : > { %2972 = vmatmul.mubr.f32.gmra.mrb[134].mxu1 %v12923_v7  ;;  %8953 = vmatpush3.bf16.msra.mxu0 %v8952_v63  ;;  %v6557_v44 = vpop.f32.mrb[45].mxu1  ;;  %v5999_v63 = vld [vmem:[%s12919_s2 + $0x6e8] sm:$0xff] }
 0x166   : > { %7758 = vmatprep.mubr.f32.mxu0 %v10153_v34  ;;  %2976 = vmatprep.mubr.f32.mxu1 %v10174_v55  ;;  %v11452_v40 = vadd.f32 %v6557_v44, %v6556_v28  ;;  %v8962_v28 = vpack.c.bf16 %v5999_v63, %v5998_v61  ;;  %v6000_v44 = vld [vmem:[%s12919_s2 + $0x6f0] sm:$0xff]  ;;  %v5985_v61 = vld [vmem:[%s12919_s2 + $0x678] sm:$0xff] }
 0x167   : > { %v7657_v51 = vpop.f32.mrb[46].mxu0  ;;  %8955 = vmatprep.subr.bf16.mxu0 %v8954_v6  ;;  %v5983_v6 = vld [vmem:[%s12919_s2 + $0x668] sm:$0xff] }
 0x168   : > { %12933 = vst [vmem:[#allocation11_spill] sm:$0xff] %v11452_v40  ;;  %v11454_v54 = vpop.f32.mrb[47].mxu0  ;;  %7759 = vmatmul.mubr.f32.gmra.mrb[8].mxu0 %v12923_v7  ;;  %v6559_v1 = vpop.f32.mrb[46].mxu1 }
 0x169   : > { %2977 = vmatmul.mubr.f32.gmra.mrb[136].mxu1 %v10180_v57  ;;  %8957 = vmatpush3.bf16.msra.mxu0 %v8956_v33  ;;  %v6560_v5 = vpop.f32.mrb[47].mxu1 }
 0x16a   : > { %7761 = vmatprep.mubr.f32.mxu0 %v10169_v43  ;;  %2981 = vmatprep.mubr.f32.mxu1 %v12923_v7  ;;  %v11472_v23 = vadd.f32 %v6560_v5, %v6559_v1  ;;  %v8964_v1 = vpack.c.bf16 %v5983_v6, %v5982_v13  ;;  %v8966_v13 = vpack.c.bf16 %v6001_v31, %v6000_v44  ;;  %v6035_v44 = vld [vmem:[%s12919_s2 + $0x808] sm:$0xff] }
 0x16b   : > { %v6426_v26 = vpop.f32.mrb[48].mxu0  ;;  %8959 = vmatprep.subr.bf16.mxu0 %v8958_v58  ;;  %v5984_v58 = vld [vmem:[%s12919_s2 + $0x670] sm:$0xff] }
 0x16c   : > { %12934 = vst [vmem:[#allocation12_spill] sm:$0xff] %v11472_v23  ;;  %v6427_v33 = vpop.f32.mrb[49].mxu0  ;;  %7762 = vmatmul.mubr.f32.gmra.mrb[10].mxu0 %v12923_v7  ;;  %v6562_v46 = vpop.f32.mrb[48].mxu1  ;;  %v6051_v23 = vld [vmem:[%s12919_s2 + $0x888] sm:$0xff] }
 0x16d   : > { %v6428_v51 = vadd.f32 %v6427_v33, %v6426_v26  ;;  %2982 = vmatmul.mubr.f32.gmra.mrb[138].mxu1 %v12923_v7  ;;  %8961 = vmatpush3.bf16.msra.mxu0 %v8960_v3  ;;  %v6563_v5 = vpop.f32.mrb[49].mxu1  ;;  %v6050_v33 = vld [vmem:[%s12919_s2 + $0x880] sm:$0xff] }
 0x16e   : > { %7764 = vmatprep.mubr.f32.mxu0 %v10189_v59  ;;  %2986 = vmatprep.mubr.f32.mxu1 %v12923_v7  ;;  %v11490_v63 = vadd.f32 %v6563_v5, %v6562_v46  ;;  %v9002_v5 = vpack.c.bf16 %v6051_v23, %v6050_v33  ;;  %v6052_v23 = vld [vmem:[%s12919_s2 + $0x890] sm:$0xff] }
 0x16f   : > { %v11493_v26 = vadd.f32 %v6428_v51, %v11317_v0  ;;  %v6429_v3 = vpop.f32.mrb[50].mxu0  ;;  %8963 = vmatprep.subr.bf16.mxu0 %v8962_v28  ;;  %v8968_v0 = vpack.c.bf16 %v5985_v61, %v5984_v58  ;;  %v6034_v28 = vld [vmem:[%s12919_s2 + $0x800] sm:$0xff]  ;;  %v6100_v58 = vld [vmem:[%s12920_s3 + $0x410] sm:$0xff]  ;;  %v6101_v61 = vld [vmem:[%s12920_s3 + $0x418] sm:$0xff] }
 0x170   : > { %12935 = vst [vmem:[#allocation13_spill] sm:$0xff] %v11490_v63  ;;  %v6430_v6 = vpop.f32.mrb[51].mxu0  ;;  %7765 = vmatmul.mubr.f32.gmra.mrb[12].mxu0 %v12923_v7  ;;  %v6565_v40 = vpop.f32.mrb[50].mxu1 }
 0x171   : > { %2987 = vmatmul.mubr.f32.gmra.mrb[140].mxu1 %v12923_v7  ;;  %8965 = vmatpush3.bf16.msra.mxu0 %v8964_v1  ;;  %v6566_v46 = vpop.f32.mrb[51].mxu1 }
 0x172   : > { %7767 = vmatprep.mubr.f32.mxu0 %v11036_v41  ;;  %2991 = vmatprep.mubr.f32.mxu1 %v12923_v7  ;;  %v11511_v31 = vadd.f32 %v6566_v46, %v6565_v40  ;;  %v9004_v40 = vpack.c.bf16 %v6035_v44, %v6034_v28  ;;  %v9102_v28 = vpack.c.bf16 %v6101_v61, %v6100_v58  ;;  %v6102_v44 = vld [vmem:[%s12920_s3 + $0x420] sm:$0xff]  ;;  %v12938_v58 = vmov 0.0  }
 0x173   : > { %v6432_v51 = vpop.f32.mrb[52].mxu0  ;;  %8967 = vmatprep.subr.bf16.mxu0 %v8966_v13  ;;  %v6053_v13 = vld [vmem:[%s12919_s2 + $0x898] sm:$0xff] }
 0x174   : > { %12936 = vst [vmem:[#allocation14_spill] sm:$0xff] %v11511_v31  ;;  %v6433_v1 = vpop.f32.mrb[53].mxu0  ;;  %7768 = vmatmul.mubr.f32.gmra.mrb[14].mxu0 %v12923_v7  ;;  %v6568_v3 = vpop.f32.mrb[52].mxu1  ;;  %v6103_v31 = vld [vmem:[%s12920_s3 + $0x428] sm:$0xff] }
 0x175   : > { %v6434_v6 = vadd.f32 %v6433_v1, %v6432_v51  ;;  %2992 = vmatmul.mubr.f32.gmra.mrb[142].mxu1 %v12923_v7  ;;  %8969 = vmatpush3.bf16.msra.mxu0 %v8968_v0  ;;  %v6569_v46 = vpop.f32.mrb[53].mxu1  ;;  %v9006_v7 = vpack.c.bf16 %v6053_v13, %v6052_v23 }
 0x176   : > { %2722 = vmatprep.mubr.f32.mxu0 %v10257_v29  ;;  %7970 = vmatprep.mubr.f32.mxu1 %v10103_v30  ;;  %v11529_v33 = vadd.f32 %v6569_v46, %v6568_v3  ;;  %v6055_v46 = vld [vmem:[%s12919_s2 + $0x8a8] sm:$0xff] }
 0x177   : > { %v11532_v51 = vadd.f32 %v6434_v6, %v11331_v16  ;;  %v6435_v0 = vpop.f32.mrb[54].mxu0  ;;  %9003 = vmatprep.subr.bf16.mxu0 %v9002_v5  ;;  %v6036_v16 = vld [vmem:[%s12919_s2 + $0x810] sm:$0xff]  ;;  %v6037_v5 = vld [vmem:[%s12919_s2 + $0x818] sm:$0xff]  ;;  %v6054_v6 = vld [vmem:[%s12919_s2 + $0x8a0] sm:$0xff] }
 0x178   : > { %12937 = vst [vmem:[#allocation15_spill] sm:$0xff] %v11529_v33  ;;  %v6436_v1 = vpop.f32.mrb[55].mxu0  ;;  %2723 = vmatmul.mubr.f32.vlgmr.msra.gmra.mrb[144].mxu0 %v10267_v35  ;;  %v6571_v3 = vpop.f32.mrb[54].mxu1  ;;  %v9008_v0 = vpack.c.bf16 %v6037_v5, %v6036_v16  ;;  %v6056_v16 = vld [vmem:[%s12919_s2 + $0x8b0] sm:$0xff]  ;;  %v6057_v5 = vld [vmem:[%s12919_s2 + $0x8b8] sm:$0xff] }
 0x179   : > { %7971 = vmatmul.mubr.f32.vlgmr.msra.gmra.mrb[144].mxu1 %v12938_v58  ;;  %9005 = vmatpush3.bf16.msra.mxu0 %v9004_v40  ;;  %v6572_v61 = vpop.f32.mrb[55].mxu1  ;;  %v9106_v40 = vpack.c.bf16 %v6103_v31, %v6102_v44  ;;  %v6104_v1 = vld [vmem:[%s12920_s3 + $0x430] sm:$0xff]  ;;  %v6039_v31 = vld [vmem:[%s12919_s2 + $0x828] sm:$0xff] }
 0x17a   : > { %9101 = vmatpush3.bf16.msra.mxu1 %v11351_v37  ;;  %2727 = vmatprep.mubr.f32.mxu0 %v12938_v58  ;;  %v11556_v23 = vadd.f32 %v6572_v61, %v6571_v3  ;;  %v6105_v37 = vld [vmem:[%s12920_s3 + $0x438] sm:$0xff]  ;;  %v9010_v3 = vpack.c.bf16 %v6055_v46, %v6054_v6  ;;  %v6038_v61 = vld [vmem:[%s12919_s2 + $0x820] sm:$0xff] }
 0x17b   : > { %v6438_v13 = vpop.f32.mrb[56].mxu0  ;;  %7973 = vmatprep.mubr.f32.mxu1 %v10123_v38  ;;  %9103 = vmatprep.subr.bf16.mxu1 %v9102_v28  ;;  %v9012_v11 = vpack.c.bf16 %v6039_v31, %v6038_v61 }
 0x17c   : > { %12939 = vst [vmem:[#allocation16_spill] sm:$0xff] %v11556_v23  ;;  %v6439_v33 = vpop.f32.mrb[57].mxu0  ;;  %2728 = vmatmul.mubr.f32.gmra.mrb[146].mxu0 %v12938_v58  ;;  %9007 = vmatprep.subr.bf16.mxu0 %v9006_v7  ;;  %v6574_v63 = vpop.f32.mrb[56].mxu1  ;;  %v6106_v23 = vld [vmem:[%s12920_s3 + $0x440] sm:$0xff] }
 0x17d   : > { %v6440_v44 = vadd.f32 %v6439_v33, %v6438_v13  ;;  %7974 = vmatmul.mubr.f32.gmra.mrb[146].mxu1 %v12938_v58  ;;  %2732 = vmatprep.mubr.f32.mxu0 %v10003_v53  ;;  %v6575_v7 = vpop.f32.mrb[57].mxu1  ;;  %v9110_v13 = vpack.c.bf16 %v6105_v37, %v6104_v1  ;;  %v6041_v1 = vld [vmem:[%s12919_s2 + $0x838] sm:$0xff]  ;;  %v6058_v37 = vld [vmem:[%s12919_s2 + $0x8c0] sm:$0xff] }
 0x17e   : > { %9105 = vmatpush3.bf16.msra.mxu1 %v9102_v28  ;;  %7976 = vmatprep.mubr.f32.mxu1 %v10138_v25  ;;  %v11581_v6 = vadd.f32 %v6575_v7, %v6574_v63  ;;  %v6107_v63 = vld [vmem:[%s12920_s3 + $0x448] sm:$0xff]  ;;  %v6108_v7 = vld [vmem:[%s12920_s3 + $0x450] sm:$0xff] }
 0x17f   : > { %v11584_v33 = vadd.f32 %v6440_v44, %v11353_v21  ;;  %v6441_v46 = vpop.f32.mrb[58].mxu0  ;;  %9107 = vmatprep.subr.bf16.mxu1 %v9106_v40  ;;  %9009 = vmatpush3.bf16.msra.mxu0 %v9008_v0  ;;  %v9014_v21 = vpack.c.bf16 %v6057_v5, %v6056_v16  ;;  %v6040_v0 = vld [vmem:[%s12919_s2 + $0x830] sm:$0xff]  ;;  %v9114_v44 = vpack.c.bf16 %v6107_v63, %v6106_v23  ;;  %v6042_v23 = vld [vmem:[%s12919_s2 + $0x840] sm:$0xff] }
 0x180   : > { %12940 = vst [vmem:[#allocation17_spill] sm:$0xff] %v11581_v6  ;;  %v6442_v47 = vpop.f32.mrb[59].mxu0  ;;  %2733 = vmatmul.mubr.f32.gmra.mrb[148].mxu0 %v10079_v20  ;;  %v6577_v28 = vpop.f32.mrb[58].mxu1  ;;  %9011 = vmatprep.subr.bf16.mxu0 %v9010_v3  ;;  %v6059_v3 = vld [vmem:[%s12919_s2 + $0x8c8] sm:$0xff]  ;;  %v9016_v16 = vpack.c.bf16 %v6041_v1, %v6040_v0  ;;  %v6060_v1 = vld [vmem:[%s12919_s2 + $0x8d0] sm:$0xff] }
 0x181   : > { %7977 = vmatmul.mubr.f32.gmra.mrb[148].mxu1 %v12938_v58  ;;  %2737 = vmatprep.mubr.f32.mxu0 %v12938_v58  ;;  %v6578_v47 = vpop.f32.mrb[59].mxu1 }
 0x182   : > { %9109 = vmatpush3.bf16.msra.mxu1 %v9106_v40  ;;  %7979 = vmatprep.mubr.f32.mxu1 %v10153_v34  ;;  %v11608_v61 = vadd.f32 %v6578_v47, %v6577_v28  ;;  %v6109_v40 = vld [vmem:[%s12920_s3 + $0x458] sm:$0xff]  ;;  %v9018_v28 = vpack.c.bf16 %v6059_v3, %v6058_v37 }
 0x183   : > { %v6444_v31 = vpop.f32.mrb[60].mxu0  ;;  %9111 = vmatprep.subr.bf16.mxu1 %v9110_v13  ;;  %9013 = vmatpush3.bf16.msra.mxu0 %v9012_v11  ;;  %v6043_v11 = vld [vmem:[%s12919_s2 + $0x848] sm:$0xff] }
 0x184   : > { %12941 = vst [vmem:[#allocation18_spill] sm:$0xff] %v11608_v61  ;;  %v6445_v5 = vpop.f32.mrb[61].mxu0  ;;  %2738 = vmatmul.mubr.f32.gmra.mrb[150].mxu0 %v12938_v58  ;;  %v6580_v46 = vpop.f32.mrb[60].mxu1  ;;  %9015 = vmatprep.subr.bf16.mxu0 %v9014_v21  ;;  %v6061_v21 = vld [vmem:[%s12919_s2 + $0x8d8] sm:$0xff]  ;;  %v9020_v61 = vpack.c.bf16 %v6043_v11, %v6042_v23 }
 0x185   : > { %v6446_v63 = vadd.f32 %v6445_v5, %v6444_v31  ;;  %7980 = vmatmul.mubr.f32.gmra.mrb[150].mxu1 %v12938_v58  ;;  %2742 = vmatprep.mubr.f32.mxu0 %v10003_v53  ;;  %v6581_v0 = vpop.f32.mrb[61].mxu1  ;;  %v9118_v31 = vpack.c.bf16 %v6109_v40, %v6108_v7  ;;  %v6110_v5 = vld [vmem:[%s12920_s3 + $0x460] sm:$0xff]  ;;  %v6044_v7 = vld [vmem:[%s12919_s2 + $0x850] sm:$0xff]  ;;  %v6045_v40 = vld [vmem:[%s12919_s2 + $0x858] sm:$0xff] }
 0x186   : > { %9113 = vmatpush3.bf16.msra.mxu1 %v9110_v13  ;;  %7982 = vmatprep.mubr.f32.mxu1 %v10169_v43  ;;  %v11632_v47 = vadd.f32 %v6581_v0, %v6580_v46  ;;  %v6111_v46 = vld [vmem:[%s12920_s3 + $0x468] sm:$0xff]  ;;  %v6112_v0 = vld [vmem:[%s12920_s3 + $0x470] sm:$0xff] }
 0x187   : > { %v11635_v37 = vadd.f32 %v6446_v63, %v11374_v24  ;;  %v6447_v3 = vpop.f32.mrb[62].mxu0  ;;  %9115 = vmatprep.subr.bf16.mxu1 %v9114_v44  ;;  %9017 = vmatpush3.bf16.msra.mxu0 %v9016_v16  ;;  %v9022_v24 = vpack.c.bf16 %v6061_v21, %v6060_v1  ;;  %v6062_v16 = vld [vmem:[%s12919_s2 + $0x8e0] sm:$0xff]  ;;  %v9122_v63 = vpack.c.bf16 %v6111_v46, %v6110_v5  ;;  %v6047_v46 = vld [vmem:[%s12919_s2 + $0x868] sm:$0xff] }
 0x188   : > { %12942 = vst [vmem:[#allocation19_spill] sm:$0xff] %v11632_v47  ;;  %v6448_v6 = vpop.f32.mrb[63].mxu0  ;;  %2743 = vmatmul.mubr.f32.gmra.mrb[152].mxu0 %v10079_v20  ;;  %v6583_v13 = vpop.f32.mrb[62].mxu1  ;;  %9019 = vmatprep.subr.bf16.mxu0 %v9018_v28  ;;  %v6063_v28 = vld [vmem:[%s12919_s2 + $0x8e8] sm:$0xff]  ;;  %v9024_v1 = vpack.c.bf16 %v6045_v40, %v6044_v7  ;;  %v6046_v5 = vld [vmem:[%s12919_s2 + $0x860] sm:$0xff]  ;;  %v6064_v40 = vld [vmem:[%s12919_s2 + $0x8f0] sm:$0xff] }
 0x189   : > { %7983 = vmatmul.mubr.f32.gmra.mrb[152].mxu1 %v12938_v58  ;;  %v6584_v6 = vpop.f32.mrb[63].mxu1  ;;  %2747 = vmatprep.mubr.f32.mxu0 %v12938_v58 }
 0x18a   : > { %9117 = vmatpush3.bf16.msra.mxu1 %v9114_v44  ;;  %v11658_v23 = vadd.f32 %v6584_v6, %v6583_v13  ;;  %7985 = vmatprep.mubr.f32.mxu1 %v10189_v59  ;;  %v6113_v44 = vld [vmem:[%s12920_s3 + $0x478] sm:$0xff]  ;;  %v9026_v13 = vpack.c.bf16 %v6063_v28, %v6062_v16 }
 0x18b   : > { %v6450_v11 = vpop.f32.mrb[64].mxu0  ;;  %9119 = vmatprep.subr.bf16.mxu1 %v9118_v31  ;;  %9021 = vmatpush3.bf16.msra.mxu0 %v9020_v61 }
 0x18c   : > { %12943 = vst [vmem:[#allocation20_spill] sm:$0xff] %v11658_v23  ;;  %v6698_v21 = vpop.f32.mrb[64].mxu1  ;;  %v6451_v3 = vpop.f32.mrb[65].mxu0  ;;  %2748 = vmatmul.mubr.f32.gmra.mrb[154].mxu0 %v12938_v58  ;;  %9023 = vmatprep.subr.bf16.mxu0 %v9022_v24  ;;  %v6065_v24 = vld [vmem:[%s12919_s2 + $0x8f8] sm:$0xff] }
 0x18d   : > { %v6452_v61 = vadd.f32 %v6451_v3, %v6450_v11  ;;  %v6699_v7 = vpop.f32.mrb[65].mxu1  ;;  %7986 = vmatmul.mubr.f32.gmra.mrb[154].mxu1 %v12938_v58  ;;  %2752 = vmatprep.mubr.f32.mxu0 %v10108_v9  ;;  %v9126_v11 = vpack.c.bf16 %v6113_v44, %v6112_v0  ;;  %v9028_v3 = vpack.c.bf16 %v6047_v46, %v6046_v5 }
 0x18e   : > { %v6700_v6 = vadd.f32 %v6699_v7, %v6698_v21  ;;  %9121 = vmatpush3.bf16.msra.mxu1 %v9118_v31  ;;  %7988 = vmatprep.mubr.f32.mxu1 %v11036_v41  ;;  %v9030_v14 = vpack.c.bf16 %v6065_v24, %v6064_v40  ;;  %v6048_v31 = vld [vmem:[%s12919_s2 + $0x870] sm:$0xff] }
 0x18f   : > { %v11684_v16 = vadd.f32 %v6452_v61, %v11394_v22  ;;  %v6453_v28 = vpop.f32.mrb[66].mxu0  ;;  %9123 = vmatprep.subr.bf16.mxu1 %v9122_v63  ;;  %9025 = vmatpush3.bf16.msra.mxu0 %v9024_v1  ;;  %v6049_v22 = vld [vmem:[%s12919_s2 + $0x878] sm:$0xff] }
 0x190   : > { %v6454_v23 = vpop.f32.mrb[67].mxu0  ;;  %2753 = vmatmul.mubr.f32.gmra.mrb[156].mxu0 %v10114_v36  ;;  %v6701_v47 = vpop.f32.mrb[66].mxu1  ;;  %9027 = vmatprep.subr.bf16.mxu0 %v9026_v13  ;;  %v11694_v21 = vadd.f32 %v6700_v6, %v11493_v26  ;;  %v9032_v26 = vpack.c.bf16 %v6049_v22, %v6048_v31 }
 0x191   : > { %7989 = vmatmul.mubr.f32.gmra.mrb[156].mxu1 %v12938_v58  ;;  %v6702_v0 = vpop.f32.mrb[67].mxu1  ;;  %2757 = vmatprep.mubr.f32.mxu0 %v12938_v58  ;;  %v6066_v47 = vld [vmem:[%s12920_s3 + $0x300] sm:$0xff]  ;;  %v6067_v23 = vld [vmem:[%s12920_s3 + $0x308] sm:$0xff] }
 0x192   : > { %9125 = vmatpush3.bf16.msra.mxu1 %v9122_v63  ;;  %7991 = vmatprep.mubr.f32.mxu1 %v12938_v58  ;;  %v11706_v5 = vpack.c.bf16 %v6067_v23, %v6066_v47 }
 0x193   : > { %v6456_v1 = vpop.f32.mrb[68].mxu0  ;;  %9127 = vmatprep.subr.bf16.mxu1 %v9126_v11  ;;  %9029 = vmatpush3.bf16.msra.mxu0 %v9028_v3 }
 0x194   : > { %v6704_v44 = vpop.f32.mrb[68].mxu1  ;;  %v6457_v13 = vpop.f32.mrb[69].mxu0  ;;  %2758 = vmatmul.mubr.f32.gmra.mrb[158].mxu0 %v12938_v58  ;;  %9031 = vmatprep.subr.bf16.mxu0 %v9030_v14 }
 0x195   : > { %v6458_v46 = vadd.f32 %v6457_v13, %v6456_v1  ;;  %v6705_v61 = vpop.f32.mrb[69].mxu1  ;;  %7992 = vmatmul.mubr.f32.gmra.mrb[158].mxu1 %v12938_v58  ;;  %2762 = vmatprep.mubr.f32.mxu0 %v10108_v9 }
 0x196   : > { %v6706_v63 = vadd.f32 %v6705_v61, %v6704_v44  ;;  %9129 = vmatpush3.bf16.msra.mxu1 %v9126_v11  ;;  %8026 = vmatprep.mubr.f32.mxu1 %v10103_v30 }
 0x197   : > { %v11712_v7 = vadd.f32 %v6458_v46, %v11414_v52  ;;  %v6459_v40 = vpop.f32.mrb[70].mxu0  ;;  %9033 = vmatpush3.bf16.msra.mxu0 %v9032_v26 }
 0x198   : > { %v6460_v24 = vpop.f32.mrb[71].mxu0  ;;  %2763 = vmatmul.mubr.f32.gmra.mrb[160].mxu0 %v10114_v36  ;;  %v6707_v14 = vpop.f32.mrb[70].mxu1  ;;  %9035 = vmatprep.subr.bf16.mxu0 %v11706_v5  ;;  %v11717_v6 = vadd.f32 %v6706_v63, %v11532_v51 }
 0x199   : > { %8027 = vmatmul.mubr.f32.vlgmr.msra.gmra.mrb[16].mxu1 %v12938_v58  ;;  %v6708_v28 = vpop.f32.mrb[71].mxu1  ;;  %2767 = vmatprep.mubr.f32.mxu0 %v12938_v58 }
 0x19a   : > { %8029 = vmatprep.mubr.f32.mxu1 %v10123_v38 }
 0x19b   : > { %v6462_v52 = vpop.f32.mrb[72].mxu0 }
 0x19c   : > { %v6710_v11 = vpop.f32.mrb[72].mxu1  ;;  %v6463_v3 = vpop.f32.mrb[73].mxu0  ;;  %2768 = vmatmul.mubr.f32.gmra.mrb[162].mxu0 %v12938_v58 }
 0x19d   : > { %v6464_v31 = vadd.f32 %v6463_v3, %v6462_v52  ;;  %v6711_v22 = vpop.f32.mrb[73].mxu1  ;;  %8030 = vmatmul.mubr.f32.gmra.mrb[18].mxu1 %v12938_v58  ;;  %2772 = vmatprep.mubr.f32.mxu0 %v10174_v55 }
 0x19e   : > { %v6712_v51 = vadd.f32 %v6711_v22, %v6710_v11  ;;  %8032 = vmatprep.mubr.f32.mxu1 %v10138_v25 }
 0x19f   : > { %v11727_v0 = vadd.f32 %v6464_v31, %v11434_v18  ;;  %v6465_v47 = vpop.f32.mrb[74].mxu0 }
 0x1a0   : > { %v6466_v23 = vpop.f32.mrb[75].mxu0  ;;  %2773 = vmatmul.mubr.f32.gmra.mrb[164].mxu0 %v10180_v57  ;;  %v6713_v1 = vpop.f32.mrb[74].mxu1  ;;  %v11731_v26 = vadd.f32 %v6712_v51, %v11584_v33 }
 0x1a1   : > { %8033 = vmatmul.mubr.f32.gmra.mrb[20].mxu1 %v12938_v58  ;;  %v6714_v44 = vpop.f32.mrb[75].mxu1  ;;  %2777 = vmatprep.mubr.f32.mxu0 %v12938_v58 }
 0x1a2   : > { %8035 = vmatprep.mubr.f32.mxu1 %v10153_v34 }
 0x1a3   : > { %v6468_v13 = vpop.f32.mrb[76].mxu0 }
 0x1a4   : > { %v6716_v46 = vpop.f32.mrb[76].mxu1  ;;  %v6469_v61 = vpop.f32.mrb[77].mxu0  ;;  %2778 = vmatmul.mubr.f32.gmra.mrb[166].mxu0 %v12938_v58 }
 0x1a5   : > { %v6470_v18 = vadd.f32 %v6469_v61, %v6468_v13  ;;  %v6717_v63 = vpop.f32.mrb[77].mxu1  ;;  %8036 = vmatmul.mubr.f32.gmra.mrb[22].mxu1 %v12938_v58  ;;  %2782 = vmatprep.mubr.f32.mxu0 %v10174_v55 }
 0x1a6   : > { %v6718_v33 = vadd.f32 %v6717_v63, %v6716_v46  ;;  %8038 = vmatprep.mubr.f32.mxu1 %v10169_v43  ;;  %v6068_v63 = vld [vmem:[%s12920_s3 + $0x310] sm:$0xff] }
 0x1a7   : > { %v11741_v40 = vadd.f32 %v6470_v18, %v11454_v54  ;;  %v6471_v24 = vpop.f32.mrb[78].mxu0 }
 0x1a8   : > { %v6472_v14 = vpop.f32.mrb[79].mxu0  ;;  %2783 = vmatmul.mubr.f32.gmra.mrb[168].mxu0 %v10180_v57  ;;  %v6719_v28 = vpop.f32.mrb[78].mxu1  ;;  %v11745_v52 = vadd.f32 %v6718_v33, %v11635_v37 }
 0x1a9   : > { %8039 = vmatmul.mubr.f32.gmra.mrb[24].mxu1 %v12938_v58  ;;  %v6720_v11 = vpop.f32.mrb[79].mxu1  ;;  %2787 = vmatprep.mubr.f32.mxu0 %v12938_v58 }
 0x1aa   : > { %8041 = vmatprep.mubr.f32.mxu1 %v10189_v59 }
 0x1ab   : > { %v6618_v3 = vpop.f32.mrb[80].mxu0 }
 0x1ac   : > { %v6722_v31 = vpop.f32.mrb[80].mxu1  ;;  %v6619_v22 = vpop.f32.mrb[81].mxu0  ;;  %2788 = vmatmul.mubr.f32.gmra.mrb[170].mxu0 %v12938_v58 }
 0x1ad   : > { %v6620_v54 = vadd.f32 %v6619_v22, %v6618_v3  ;;  %v6723_v51 = vpop.f32.mrb[81].mxu1  ;;  %8042 = vmatmul.mubr.f32.gmra.mrb[26].mxu1 %v12938_v58  ;;  %2792 = vmatprep.mubr.f32.mxu0 %v12938_v58  ;;  %v6070_v22 = vld [vmem:[%s12920_s3 + $0x320] sm:$0xff] }
 0x1ae   : > { %v6724_v37 = vadd.f32 %v6723_v51, %v6722_v31  ;;  %8044 = vmatprep.mubr.f32.mxu1 %v11036_v41 }
 0x1af   : > { %v11755_v47 = vadd.f32 %v6620_v54, %v11210_v17  ;;  %v6621_v23 = vpop.f32.mrb[82].mxu0  ;;  %v6071_v54 = vld [vmem:[%s12920_s3 + $0x328] sm:$0xff] }
 0x1b0   : > { %v6622_v1 = vpop.f32.mrb[83].mxu0  ;;  %2793 = vmatmul.mubr.f32.gmra.mrb[172].mxu0 %v12938_v58  ;;  %v6725_v44 = vpop.f32.mrb[82].mxu1  ;;  %v11759_v13 = vadd.f32 %v6724_v37, %v11684_v16  ;;  %v6069_v16 = vld [vmem:[%s12920_s3 + $0x318] sm:$0xff] }
 0x1b1   : > { %v6623_v46 = vadd.f32 %v6622_v1, %v6621_v23  ;;  %8045 = vmatmul.mubr.f32.gmra.mrb[28].mxu1 %v12938_v58  ;;  %v6726_v61 = vpop.f32.mrb[83].mxu1  ;;  %2797 = vmatprep.mubr.f32.mxu0 %v12938_v58  ;;  %v9038_v11 = vpack.c.bf16 %v6069_v16, %v6068_v63  ;;  %v9042_v1 = vpack.c.bf16 %v6071_v54, %v6070_v22 }
 0x1b2   : > { %8047 = vmatprep.mubr.f32.mxu1 %v12938_v58 }
 0x1b3   : > { %v11765_v18 = vadd.f32 %v6623_v46, %v11234_v56  ;;  %v6624_v17 = vpop.f32.mrb[84].mxu0 }
 0x1b4   : > { %v6728_v33 = vpop.f32.mrb[84].mxu1  ;;  %v6625_v24 = vpop.f32.mrb[85].mxu0  ;;  %2798 = vmatmul.mubr.f32.gmra.mrb[174].mxu0 %v12938_v58 }
 0x1b5   : > { %v6626_v14 = vadd.f32 %v6625_v24, %v6624_v17  ;;  %v6729_v28 = vpop.f32.mrb[85].mxu1  ;;  %8048 = vmatmul.mubr.f32.gmra.mrb[30].mxu1 %v12938_v58  ;;  %3110 = vmatprep.mubr.f32.mxu0 %v10257_v29 }
 0x1b6   : > { %v6730_v56 = vadd.f32 %v6729_v28, %v6728_v33  ;;  %v6075_v28 = vld [vmem:[%s12920_s3 + $0x348] sm:$0xff] }
 0x1b7   : > { %v11777_v3 = vadd.f32 %v6626_v14, %v11252_v10  ;;  %v6627_v31 = vpop.f32.mrb[86].mxu0  ;;  %v6074_v14 = vld [vmem:[%s12920_s3 + $0x340] sm:$0xff] }
 0x1b8   : > { %v6628_v51 = vpop.f32.mrb[87].mxu0  ;;  %3111 = vmatmul.mubr.f32.vlgmr.msra.gmra.mrb[176].mxu0 %v10267_v35  ;;  %v6731_v37 = vpop.f32.mrb[86].mxu1  ;;  %v11787_v29 = vadd.f32 %v6730_v56, %v11712_v7  ;;  %v6072_v35 = vld [vmem:[%s12920_s3 + $0x330] sm:$0xff]  ;;  %v6073_v7 = vld [vmem:[%s12920_s3 + $0x338] sm:$0xff] }
 0x1b9   : > { %v6629_v23 = vadd.f32 %v6628_v51, %v6627_v31  ;;  %9037 = vmatpush3.bf16.msra.mxu0 %v11706_v5  ;;  %v6732_v10 = vpop.f32.mrb[87].mxu1  ;;  %3115 = vmatprep.mubr.f32.mxu0 %v12938_v58  ;;  %v9046_v16 = vpack.c.bf16 %v6073_v7, %v6072_v35 }
 0x1ba   : > { %9039 = vmatprep.subr.bf16.mxu0 %v9038_v11 }
 0x1bb   : > { %v11792_v44 = vadd.f32 %v6629_v23, %v11264_v4  ;;  %v6630_v46 = vpop.f32.mrb[88].mxu0  ;;  %v6076_v23 = vld [vmem:[%s12920_s3 + $0x350] sm:$0xff] }
 0x1bc   : > { %v6734_v61 = vpop.f32.mrb[88].mxu1  ;;  %v6631_v17 = vpop.f32.mrb[89].mxu0  ;;  %3116 = vmatmul.mubr.f32.gmra.mrb[178].mxu0 %v12938_v58 }
 0x1bd   : > { %v6632_v5 = vadd.f32 %v6631_v17, %v6630_v46  ;;  %v6735_v63 = vpop.f32.mrb[89].mxu1  ;;  %3120 = vmatprep.mubr.f32.mxu0 %v10003_v53  ;;  %9041 = vmatpush3.bf16.msra.mxu0 %v9038_v11 }
 0x1be   : > { %v6736_v4 = vadd.f32 %v6735_v63, %v6734_v61  ;;  %9043 = vmatprep.subr.bf16.mxu0 %v9042_v1  ;;  %v6079_v63 = vld [vmem:[%s12920_s3 + $0x368] sm:$0xff] }
 0x1bf   : > { %v11803_v33 = vadd.f32 %v6632_v5, %v11276_v27  ;;  %v6633_v24 = vpop.f32.mrb[90].mxu0  ;;  %v9050_v27 = vpack.c.bf16 %v6075_v28, %v6074_v14  ;;  %v6078_v5 = vld [vmem:[%s12920_s3 + $0x360] sm:$0xff] }
 0x1c0   : > { %v6634_v56 = vpop.f32.mrb[91].mxu0  ;;  %3121 = vmatmul.mubr.f32.gmra.mrb[180].mxu0 %v10079_v20  ;;  %v6737_v31 = vpop.f32.mrb[90].mxu1  ;;  %v11813_v11 = vadd.f32 %v6736_v4, %v11727_v0  ;;  %v6077_v0 = vld [vmem:[%s12920_s3 + $0x358] sm:$0xff] }
 0x1c1   : > { %v6635_v22 = vadd.f32 %v6634_v56, %v6633_v24  ;;  %v6738_v54 = vpop.f32.mrb[91].mxu1  ;;  %3125 = vmatprep.mubr.f32.mxu0 %v12938_v58  ;;  %9045 = vmatpush3.bf16.msra.mxu0 %v9042_v1  ;;  %v9054_v7 = vpack.c.bf16 %v6077_v0, %v6076_v23  ;;  %v6080_v31 = vld [vmem:[%s12920_s3 + $0x370] sm:$0xff] }
 0x1c2   : > { %9047 = vmatprep.subr.bf16.mxu0 %v9046_v16 }
 0x1c3   : > { %v11817_v51 = vadd.f32 %v6635_v22, %v11288_v39  ;;  %v6636_v37 = vpop.f32.mrb[92].mxu0 }
 0x1c4   : > { %v6740_v10 = vpop.f32.mrb[92].mxu1  ;;  %v6637_v46 = vpop.f32.mrb[93].mxu0  ;;  %3126 = vmatmul.mubr.f32.gmra.mrb[182].mxu0 %v12938_v58 }
 0x1c5   : > { %v6638_v35 = vadd.f32 %v6637_v46, %v6636_v37  ;;  %v6741_v1 = vpop.f32.mrb[93].mxu1  ;;  %3130 = vmatprep.mubr.f32.mxu0 %v10003_v53  ;;  %9049 = vmatpush3.bf16.msra.mxu0 %v9046_v16 }
 0x1c6   : > { %v6742_v39 = vadd.f32 %v6741_v1, %v6740_v10  ;;  %9051 = vmatprep.subr.bf16.mxu0 %v9050_v27 }
 0x1c7   : > { %v11828_v61 = vadd.f32 %v6638_v35, %v11300_v49  ;;  %v6639_v17 = vpop.f32.mrb[94].mxu0  ;;  %v9058_v49 = vpack.c.bf16 %v6079_v63, %v6078_v5 }
 0x1c8   : > { %v6640_v4 = vpop.f32.mrb[95].mxu0  ;;  %3131 = vmatmul.mubr.f32.gmra.mrb[184].mxu0 %v10079_v20  ;;  %v6743_v53 = vpop.f32.mrb[94].mxu1  ;;  %v11838_v16 = vadd.f32 %v6742_v39, %v11741_v40  ;;  %v6081_v20 = vld [vmem:[%s12920_s3 + $0x378] sm:$0xff] }
 0x1c9   : > { %v6641_v24 = vadd.f32 %v6640_v4, %v6639_v17  ;;  %v6744_v14 = vpop.f32.mrb[95].mxu1  ;;  %3135 = vmatprep.mubr.f32.mxu0 %v12938_v58  ;;  %9053 = vmatpush3.bf16.msra.mxu0 %v9050_v27  ;;  %v9062_v37 = vpack.c.bf16 %v6081_v20, %v6080_v31 }
 0x1ca   : > { %9055 = vmatprep.subr.bf16.mxu0 %v9054_v7 }
 0x1cb   : > { %v11842_v28 = vadd.f32 %v6641_v24, %v11312_v60  ;;  %v6642_v56 = vpop.f32.mrb[96].mxu0 }
 0x1cc   : > { %v7804_v40 = vpop.f32.mrb[96].mxu1  ;;  %v6643_v22 = vpop.f32.mrb[97].mxu0  ;;  %3136 = vmatmul.mubr.f32.gmra.mrb[186].mxu0 %v12938_v58 }
 0x1cd   : > { %v6644_v54 = vadd.f32 %v6643_v22, %v6642_v56  ;;  %v2302_v27 = vpop.f32.mrb[97].mxu1  ;;  %3140 = vmatprep.mubr.f32.mxu0 %v10108_v9  ;;  %9057 = vmatpush3.bf16.msra.mxu0 %v9054_v7 }
 0x1ce   : > { %v11853_v60 = vadd.f32 %v2302_v27, %v11694_v21  ;;  %9059 = vmatprep.subr.bf16.mxu0 %v9058_v49 }
 0x1cf   : > { %v11856_v23 = vadd.f32 %v6644_v54, %v11038_v42  ;;  %v6645_v0 = vpop.f32.mrb[98].mxu0 }
 0x1d0   : > { %v7807_v10 = vpop.f32.mrb[98].mxu1  ;;  %v6646_v46 = vpop.f32.mrb[99].mxu0  ;;  %3141 = vmatmul.mubr.f32.gmra.mrb[188].mxu0 %v10114_v36 }
 0x1d1   : > { %v6647_v35 = vadd.f32 %v6646_v46, %v6645_v0  ;;  %v2312_v1 = vpop.f32.mrb[99].mxu1  ;;  %3145 = vmatprep.mubr.f32.mxu0 %v12938_v58  ;;  %9061 = vmatpush3.bf16.msra.mxu0 %v9058_v49 }
 0x1d2   : > { %v11861_v39 = vadd.f32 %v2312_v1, %v11717_v6  ;;  %9063 = vmatprep.subr.bf16.mxu0 %v9062_v37 }
 0x1d3   : > { %v11864_v21 = vadd.f32 %v6647_v35, %v11050_v48  ;;  %v6648_v7 = vpop.f32.mrb[100].mxu0 }
 0x1d4   : > { %v7810_v42 = vpop.f32.mrb[100].mxu1  ;;  %v6649_v17 = vpop.f32.mrb[101].mxu0  ;;  %3146 = vmatmul.mubr.f32.gmra.mrb[190].mxu0 %v12938_v58 }
 0x1d5   : > { %v6650_v5 = vadd.f32 %v6649_v17, %v6648_v7  ;;  %v2322_v63 = vpop.f32.mrb[101].mxu1  ;;  %3150 = vmatprep.mubr.f32.mxu0 %v10108_v9  ;;  %9065 = vmatpush3.bf16.msra.mxu0 %v9062_v37 }
 0x1d6   : > { %v11869_v4 = vadd.f32 %v2322_v63, %v11731_v26 }
 0x1d7   : > { %v11872_v6 = vadd.f32 %v6650_v5, %v11074_v62  ;;  %v6651_v53 = vpop.f32.mrb[102].mxu0 }
 0x1d8   : > { %v7813_v24 = vpop.f32.mrb[102].mxu1  ;;  %v6652_v48 = vpop.f32.mrb[103].mxu0  ;;  %3151 = vmatmul.mubr.f32.gmra.mrb[192].mxu0 %v10114_v36 }
 0x1d9   : > { %v6653_v14 = vadd.f32 %v6652_v48, %v6651_v53  ;;  %v2332_v49 = vpop.f32.mrb[103].mxu1  ;;  %3155 = vmatprep.mubr.f32.mxu0 %v12938_v58 }
 0x1da   : > { %v11877_v56 = vadd.f32 %v2332_v49, %v11745_v52 }
 0x1db   : > { %v11880_v9 = vadd.f32 %v6653_v14, %v11098_v15  ;;  %v6654_v26 = vpop.f32.mrb[104].mxu0 }
 0x1dc   : > { %v7816_v31 = vpop.f32.mrb[104].mxu1  ;;  %v6655_v20 = vpop.f32.mrb[105].mxu0  ;;  %3156 = vmatmul.mubr.f32.gmra.mrb[194].mxu0 %v12938_v58 }
 0x1dd   : > { %v6656_v62 = vadd.f32 %v6655_v20, %v6654_v26  ;;  %v2342_v40 = vpop.f32.mrb[105].mxu1  ;;  %3160 = vmatprep.mubr.f32.mxu0 %v10174_v55 }
 0x1de   : > { %v11885_v36 = vadd.f32 %v2342_v40, %v11759_v13 }
 0x1df   : > { %v11888_v22 = vadd.f32 %v6656_v62, %v11123_v32  ;;  %v6657_v52 = vpop.f32.mrb[106].mxu0 }
 0x1e0   : > { %v7819_v54 = vpop.f32.mrb[106].mxu1  ;;  %v6658_v27 = vpop.f32.mrb[107].mxu0  ;;  %3161 = vmatmul.mubr.f32.gmra.mrb[196].mxu0 %v10180_v57 }
 0x1e1   : > { %v6659_v15 = vadd.f32 %v6658_v27, %v6657_v52  ;;  %v2352_v37 = vpop.f32.mrb[107].mxu1  ;;  %3165 = vmatprep.mubr.f32.mxu0 %v12938_v58  ;;  %v12944_v52 = vld [vmem:[#allocation8_spill] sm:$0xff] }
 0x1e2   : > { %v11893_v0 = vadd.f32 %v2352_v37, %v11787_v29 }
 0x1e3   : > { %v11896_v10 = vadd.f32 %v6659_v15, %v11147_v45  ;;  %v6660_v13 = vpop.f32.mrb[108].mxu0 }
 0x1e4   : > { %v7822_v46 = vpop.f32.mrb[108].mxu1  ;;  %v6661_v35 = vpop.f32.mrb[109].mxu0  ;;  %3166 = vmatmul.mubr.f32.gmra.mrb[198].mxu0 %v12938_v58 }
 0x1e5   : > { %v6662_v32 = vadd.f32 %v6661_v35, %v6660_v13  ;;  %v2362_v1 = vpop.f32.mrb[109].mxu1  ;;  %3170 = vmatprep.mubr.f32.mxu0 %v10174_v55 }
 0x1e6   : > { %v11901_v7 = vadd.f32 %v2362_v1, %v11813_v11 }
 0x1e7   : > { %v11904_v42 = vadd.f32 %v6662_v32, %v11171_v2  ;;  %v6663_v29 = vpop.f32.mrb[110].mxu0 }
 0x1e8   : > { %v7825_v17 = vpop.f32.mrb[110].mxu1  ;;  %v6664_v5 = vpop.f32.mrb[111].mxu0  ;;  %3171 = vmatmul.mubr.f32.gmra.mrb[200].mxu0 %v10180_v57 }
 0x1e9   : > { %v6665_v45 = vadd.f32 %v6664_v5, %v6663_v29  ;;  %v2372_v63 = vpop.f32.mrb[111].mxu1  ;;  %3175 = vmatprep.mubr.f32.mxu0 %v12938_v58 }
 0x1ea   : > { %v11909_v53 = vadd.f32 %v2372_v63, %v11838_v16 }
 0x1eb   : > { %v11912_v55 = vadd.f32 %v6665_v45, %v11195_v19  ;;  %v6778_v11 = vpop.f32.mrb[112].mxu0 }
 0x1ec   : > { %v6779_v24 = vpop.f32.mrb[113].mxu0  ;;  %3176 = vmatmul.mubr.f32.gmra.mrb[202].mxu0 %v12938_v58 }
 0x1ed   : > { %v6780_v2 = vadd.f32 %v6779_v24, %v6778_v11  ;;  %3180 = vmatprep.mubr.f32.mxu0 %v12938_v58 }
 0x1ef   : > { %v11917_v48 = vadd.f32 %v6780_v2, %v11329_v12  ;;  %v6781_v57 = vpop.f32.mrb[114].mxu0 }
 0x1f0   : > { %v6782_v14 = vpop.f32.mrb[115].mxu0  ;;  %3181 = vmatmul.mubr.f32.gmra.mrb[204].mxu0 %v12938_v58 }
 0x1f1   : > { %v6783_v49 = vadd.f32 %v6782_v14, %v6781_v57  ;;  %3185 = vmatprep.mubr.f32.mxu0 %v12938_v58 }
 0x1f3   : > { %v11922_v19 = vadd.f32 %v6783_v49, %v11349_v8  ;;  %v6784_v16 = vpop.f32.mrb[116].mxu0 }
 0x1f4   : > { %v6785_v26 = vpop.f32.mrb[117].mxu0  ;;  %3186 = vmatmul.mubr.f32.gmra.mrb[206].mxu0 %v12938_v58 }
 0x1f5   : > { %v6786_v31 = vadd.f32 %v6785_v26, %v6784_v16  ;;  %7914 = vmatprep.mubr.f32.mxu0 %v10103_v30  ;;  %v12945_v30 = vld [vmem:[#allocation9_spill] sm:$0xff] }
 0x1f6   : > { %v12949_v16 = vld [vmem:[#allocation13_spill] sm:$0xff] }
 0x1f7   : > { %v11927_v12 = vadd.f32 %v6786_v31, %v11371_v50  ;;  %v6787_v20 = vpop.f32.mrb[118].mxu0 }
 0x1f8   : > { %v6788_v62 = vpop.f32.mrb[119].mxu0  ;;  %7915 = vmatmul.mubr.f32.vlgmr.msra.gmra.mrb[0].mxu0 %v12938_v58 }
 0x1f9   : > { %v6789_v40 = vadd.f32 %v6788_v62, %v6787_v20  ;;  %7917 = vmatprep.mubr.f32.mxu0 %v10123_v38  ;;  %v12946_v38 = vld [vmem:[#allocation10_spill] sm:$0xff] }
 0x1fb   : > { %v11932_v8 = vadd.f32 %v6789_v40, %v12944_v52  ;;  %v6790_v54 = vpop.f32.mrb[120].mxu0 }
 0x1fc   : > { %v6791_v27 = vpop.f32.mrb[121].mxu0  ;;  %7918 = vmatmul.mubr.f32.gmra.mrb[2].mxu0 %v12938_v58 }
 0x1fd   : > { %v6792_v15 = vadd.f32 %v6791_v27, %v6790_v54  ;;  %7920 = vmatprep.mubr.f32.mxu0 %v10138_v25  ;;  %v12947_v25 = vld [vmem:[#allocation11_spill] sm:$0xff]  ;;  %v12950_v54 = vld [vmem:[#allocation14_spill] sm:$0xff] }
 0x1ff   : > { %v11937_v50 = vadd.f32 %v6792_v15, %v12945_v30  ;;  %v6793_v37 = vpop.f32.mrb[122].mxu0 }
 0x200   : > { %v6794_v13 = vpop.f32.mrb[123].mxu0  ;;  %7921 = vmatmul.mubr.f32.gmra.mrb[4].mxu0 %v12938_v58 }
 0x201   : > { %v6795_v46 = vadd.f32 %v6794_v13, %v6793_v37  ;;  %7923 = vmatprep.mubr.f32.mxu0 %v10153_v34  ;;  %v12948_v34 = vld [vmem:[#allocation12_spill] sm:$0xff] }
 0x203   : > { %v11942_v35 = vadd.f32 %v6795_v46, %v12946_v38  ;;  %v6796_v32 = vpop.f32.mrb[124].mxu0  ;;  %v12951_v38 = vld [vmem:[#allocation15_spill] sm:$0xff] }
 0x204   : > { %v6797_v1 = vpop.f32.mrb[125].mxu0  ;;  %7924 = vmatmul.mubr.f32.gmra.mrb[6].mxu0 %v12938_v58 }
 0x205   : > { %v6798_v29 = vadd.f32 %v6797_v1, %v6796_v32  ;;  %7926 = vmatprep.mubr.f32.mxu0 %v10169_v43 }
 0x207   : > { %v11947_v17 = vadd.f32 %v6798_v29, %v12947_v25  ;;  %v6799_v5 = vpop.f32.mrb[126].mxu0 }
 0x208   : > { %v6800_v45 = vpop.f32.mrb[127].mxu0  ;;  %7927 = vmatmul.mubr.f32.gmra.mrb[8].mxu0 %v12938_v58 }
 0x209   : > { %v6801_v63 = vadd.f32 %v6800_v45, %v6799_v5  ;;  %7929 = vmatprep.mubr.f32.mxu0 %v10189_v59 }
 0x20b   : > { %v11952_v11 = vadd.f32 %v6801_v63, %v12948_v34  ;;  %v6802_v24 = vpop.f32.mrb[128].mxu0  ;;  %v12952_v63 = vld [vmem:[#allocation16_spill] sm:$0xff] }
 0x20c   : > { %v7034_v2 = vpop.f32.mrb[112].mxu1  ;;  %v6803_v57 = vpop.f32.mrb[129].mxu0  ;;  %7930 = vmatmul.mubr.f32.gmra.mrb[10].mxu0 %v12938_v58 }
 0x20d   : > { %v6804_v14 = vadd.f32 %v6803_v57, %v6802_v24  ;;  %v7035_v43 = vpop.f32.mrb[113].mxu1  ;;  %7932 = vmatprep.mubr.f32.mxu0 %v11036_v41 }
 0x20e   : > { %v7036_v49 = vadd.f32 %v7035_v43, %v7034_v2 }
 0x20f   : > { %v11957_v26 = vadd.f32 %v6804_v14, %v12949_v16  ;;  %v6805_v31 = vpop.f32.mrb[130].mxu0  ;;  %v12953_v16 = vld [vmem:[#allocation17_spill] sm:$0xff] }
 0x210   : > { %v6806_v20 = vpop.f32.mrb[131].mxu0  ;;  %7933 = vmatmul.mubr.f32.gmra.mrb[12].mxu0 %v12938_v58  ;;  %v7037_v59 = vpop.f32.mrb[114].mxu1  ;;  %v11961_v62 = vadd.f32 %v7036_v49, %v11853_v60 }
 0x211   : > { %v6807_v40 = vadd.f32 %v6806_v20, %v6805_v31  ;;  %v7038_v52 = vpop.f32.mrb[115].mxu1  ;;  %7935 = vmatprep.mubr.f32.mxu0 %v12938_v58 }
 0x213   : > { %v11965_v27 = vadd.f32 %v6807_v40, %v12950_v54  ;;  %v6808_v41 = vpop.f32.mrb[132].mxu0 }
 0x214   : > { %v7040_v15 = vpop.f32.mrb[116].mxu1  ;;  %v6809_v30 = vpop.f32.mrb[133].mxu0  ;;  %7936 = vmatmul.mubr.f32.gmra.mrb[14].mxu0 %v12938_v58 }
 0x215   : > { %v6810_v37 = vadd.f32 %v6809_v30, %v6808_v41  ;;  %v7041_v13 = vpop.f32.mrb[117].mxu1  ;;  %v12954_v41 = vld [vmem:[#allocation18_spill] sm:$0xff] }
 0x216   : > { %v7042_v46 = vadd.f32 %v7041_v13, %v7040_v15 }
 0x217   : > { %v11969_v32 = vadd.f32 %v6810_v37, %v12951_v38  ;;  %v6811_v60 = vpop.f32.mrb[134].mxu0 }
 0x218   : > { %v6812_v1 = vpop.f32.mrb[135].mxu0  ;;  %v7043_v29 = vpop.f32.mrb[118].mxu1  ;;  %v11972_v25 = vadd.f32 %v7042_v46, %v11861_v39 }
 0x219   : > { %v6813_v5 = vadd.f32 %v6812_v1, %v6811_v60  ;;  %v7044_v45 = vpop.f32.mrb[119].mxu1  ;;  %v12955_v1 = vld [vmem:[#allocation19_spill] sm:$0xff] }
 0x21b   : > { %v11975_v34 = vadd.f32 %v6813_v5, %v12952_v63  ;;  %v6814_v24 = vpop.f32.mrb[136].mxu0 }
 0x21c   : > { %v7046_v2 = vpop.f32.mrb[120].mxu1  ;;  %v6815_v57 = vpop.f32.mrb[137].mxu0 }
 0x21d   : > { %v6816_v14 = vadd.f32 %v6815_v57, %v6814_v24  ;;  %v7047_v43 = vpop.f32.mrb[121].mxu1  ;;  %v12956_v57 = vld [vmem:[#allocation20_spill] sm:$0xff] }
 0x21e   : > { %v7048_v49 = vadd.f32 %v7047_v43, %v7046_v2 }
 0x21f   : > { %v11978_v31 = vadd.f32 %v6816_v14, %v12953_v16  ;;  %v6817_v20 = vpop.f32.mrb[138].mxu0 }
 0x220   : > { %v6818_v59 = vpop.f32.mrb[139].mxu0  ;;  %v7049_v40 = vpop.f32.mrb[122].mxu1  ;;  %v11981_v39 = vadd.f32 %v7048_v49, %v11869_v4 }
 0x221   : > { %v6819_v52 = vadd.f32 %v6818_v59, %v6817_v20  ;;  %v7050_v54 = vpop.f32.mrb[123].mxu1 }
 0x223   : > { %v11984_v15 = vadd.f32 %v6819_v52, %v12954_v41  ;;  %v6820_v30 = vpop.f32.mrb[140].mxu0 }
 0x224   : > { %v7052_v37 = vpop.f32.mrb[124].mxu1  ;;  %v6821_v13 = vpop.f32.mrb[141].mxu0 }
 0x225   : > { %v6822_v46 = vadd.f32 %v6821_v13, %v6820_v30  ;;  %v7053_v38 = vpop.f32.mrb[125].mxu1 }
 0x226   : > { %v7054_v60 = vadd.f32 %v7053_v38, %v7052_v37 }
 0x227   : > { %v11987_v29 = vadd.f32 %v6822_v46, %v12955_v1  ;;  %v6823_v5 = vpop.f32.mrb[142].mxu0 }
 0x228   : > { %v6824_v45 = vpop.f32.mrb[143].mxu0  ;;  %v7055_v63 = vpop.f32.mrb[126].mxu1  ;;  %v11990_v4 = vadd.f32 %v7054_v60, %v11877_v56 }
 0x229   : > { %v6825_v24 = vadd.f32 %v6824_v45, %v6823_v5  ;;  %v7056_v2 = vpop.f32.mrb[127].mxu1 }
 0x22b   : > { %v11993_v14 = vadd.f32 %v6825_v24, %v12956_v57 }
 0x22c   : > { %v7058_v43 = vpop.f32.mrb[128].mxu1 }
 0x22d   : > { %v7059_v49 = vpop.f32.mrb[129].mxu1 }
 0x22e   : > { %v7060_v16 = vadd.f32 %v7059_v49, %v7058_v43 }
 0x230   : > { %v7061_v20 = vpop.f32.mrb[130].mxu1  ;;  %v11996_v59 = vadd.f32 %v7060_v16, %v11885_v36 }
 0x231   : > { %v7062_v40 = vpop.f32.mrb[131].mxu1 }
 0x234   : > { %v7064_v52 = vpop.f32.mrb[132].mxu1 }
 0x235   : > { %v7065_v54 = vpop.f32.mrb[133].mxu1 }
 0x236   : > { %v7066_v41 = vadd.f32 %v7065_v54, %v7064_v52 }
 0x238   : > { %v7067_v30 = vpop.f32.mrb[134].mxu1  ;;  %v11999_v56 = vadd.f32 %v7066_v41, %v11893_v0 }
 0x239   : > { %v7068_v37 = vpop.f32.mrb[135].mxu1 }
 0x23c   : > { %v7070_v13 = vpop.f32.mrb[136].mxu1 }
 0x23d   : > { %v7071_v46 = vpop.f32.mrb[137].mxu1 }
 0x23e   : > { %v7072_v38 = vadd.f32 %v7071_v46, %v7070_v13  ;;  %v6146_v13 = vld [vmem:[%s12921_s4 + $0x180] sm:$0xff] }
 0x240   : > { %v7073_v60 = vpop.f32.mrb[138].mxu1  ;;  %v12002_v1 = vadd.f32 %v7072_v38, %v11901_v7 }
 0x241   : > { %v7074_v5 = vpop.f32.mrb[139].mxu1 }
 0x244   : > { %v7076_v45 = vpop.f32.mrb[140].mxu1 }
 0x245   : > { %v7077_v36 = vpop.f32.mrb[141].mxu1 }
 0x246   : > { %v7078_v63 = vadd.f32 %v7077_v36, %v7076_v45 }
 0x248   : > { %v7079_v24 = vpop.f32.mrb[142].mxu1  ;;  %v12005_v2 = vadd.f32 %v7078_v63, %v11909_v53 }
 0x249   : > { %v7080_v57 = vpop.f32.mrb[143].mxu1 }
 0x24b   : > { %v6954_v43 = vpop.f32.mrb[144].mxu0 }
 0x24c   : > { %v7972_v0 = vpop.f32.mrb[144].mxu1  ;;  %v6955_v49 = vpop.f32.mrb[145].mxu0 }
 0x24d   : > { %v6956_v16 = vadd.f32 %v6955_v49, %v6954_v43  ;;  %v3468_v20 = vpop.f32.mrb[145].mxu1  ;;  %v6149_v43 = vld [vmem:[%s12921_s4 + $0x198] sm:$0xff]  ;;  %v6164_v0 = vld [vmem:[%s12921_s4 + $0x210] sm:$0xff] }
 0x24e   : > { %v12008_v40 = vadd.f32 %v3468_v20, %v11961_v62  ;;  %v6147_v62 = vld [vmem:[%s12921_s4 + $0x188] sm:$0xff]  ;;  %v6165_v20 = vld [vmem:[%s12921_s4 + $0x218] sm:$0xff] }
 0x24f   : > { %v6957_v52 = vpop.f32.mrb[146].mxu0  ;;  %v12011_v7 = vadd.f32 %v11755_v47, %v6956_v16  ;;  %v6162_v47 = vld [vmem:[%s12921_s4 + $0x200] sm:$0xff]  ;;  %v9130_v60 = vpack.c.bf16 %v6147_v62, %v6146_v13  ;;  %v6151_v62 = vld [vmem:[%s12921_s4 + $0x1a8] sm:$0xff] }
 0x250   : > { %12957 = vst [vmem:[#allocation8_spill] sm:$0xff] %v12008_v40  ;;  %v7975_v54 = vpop.f32.mrb[146].mxu1  ;;  %v6958_v41 = vpop.f32.mrb[147].mxu0 }
 0x251   : > { %v6959_v30 = vadd.f32 %v6958_v41, %v6957_v52  ;;  %v3478_v37 = vpop.f32.mrb[147].mxu1  ;;  %9131 = vmatprep.subr.bf16.mxu1 %v9130_v60  ;;  %v9198_v41 = vpack.c.bf16 %v6165_v20, %v6164_v0  ;;  %v6168_v0 = vld [vmem:[%s12921_s4 + $0x230] sm:$0xff]  ;;  %v6169_v20 = vld [vmem:[%s12921_s4 + $0x238] sm:$0xff] }
 0x252   : > { %v12014_v53 = vadd.f32 %v3478_v37, %v11972_v25  ;;  %v6163_v25 = vld [vmem:[%s12921_s4 + $0x208] sm:$0xff]  ;;  %9133 = vmatpush3.bf16.msra.mxu1 %v9130_v60 }
 0x253   : > { %v6960_v46 = vpop.f32.mrb[148].mxu0  ;;  %v12026_v38 = vadd.f32 %v11765_v18, %v6959_v30  ;;  %v9194_v36 = vpack.c.bf16 %v6163_v25, %v6162_v47  ;;  %v6148_v18 = vld [vmem:[%s12921_s4 + $0x190] sm:$0xff]  ;;  %v6166_v47 = vld [vmem:[%s12921_s4 + $0x220] sm:$0xff]  ;;  %v6167_v25 = vld [vmem:[%s12921_s4 + $0x228] sm:$0xff] }
 0x254   : > { %v7978_v5 = vpop.f32.mrb[148].mxu1  ;;  %v6961_v45 = vpop.f32.mrb[149].mxu0 }
 0x255   : > { %v6962_v63 = vadd.f32 %v6961_v45, %v6960_v46  ;;  %v3488_v24 = vpop.f32.mrb[149].mxu1  ;;  %9195 = vmatprep.subr.bf16.mxu0 %v9194_v36 }
 0x256   : > { %v12032_v57 = vadd.f32 %v3488_v24, %v11981_v39  ;;  %9197 = vmatpush3.bf16.msra.mxu0 %v9194_v36  ;;  %v9134_v39 = vpack.c.bf16 %v6149_v43, %v6148_v18  ;;  %v9202_v36 = vpack.c.bf16 %v6167_v25, %v6166_v47  ;;  %v6153_v43 = vld [vmem:[%s12921_s4 + $0x1b8] sm:$0xff]  ;;  %v6170_v47 = vld [vmem:[%s12921_s4 + $0x240] sm:$0xff]  ;;  %v6171_v25 = vld [vmem:[%s12921_s4 + $0x248] sm:$0xff] }
 0x257   : > { %v6963_v49 = vpop.f32.mrb[150].mxu0  ;;  %v12044_v16 = vadd.f32 %v11777_v3, %v6962_v63  ;;  %9199 = vmatprep.subr.bf16.mxu0 %v9198_v41  ;;  %v6150_v3 = vld [vmem:[%s12921_s4 + $0x1a0] sm:$0xff] }
 0x258   : > { %v7981_v52 = vpop.f32.mrb[150].mxu1  ;;  %v6964_v54 = vpop.f32.mrb[151].mxu0  ;;  %9135 = vmatprep.subr.bf16.mxu1 %v9134_v39 }
 0x259   : > { %v6965_v30 = vadd.f32 %v6964_v54, %v6963_v49  ;;  %v3498_v37 = vpop.f32.mrb[151].mxu1  ;;  %9137 = vmatpush3.bf16.msra.mxu1 %v9134_v39 }
 0x25a   : > { %v12050_v13 = vadd.f32 %v3498_v37, %v11990_v4  ;;  %9201 = vmatpush3.bf16.msra.mxu0 %v9198_v41  ;;  %v9138_v4 = vpack.c.bf16 %v6151_v62, %v6150_v3  ;;  %v9206_v41 = vpack.c.bf16 %v6169_v20, %v6168_v0  ;;  %v6155_v62 = vld [vmem:[%s12921_s4 + $0x1c8] sm:$0xff]  ;;  %v6172_v0 = vld [vmem:[%s12921_s4 + $0x250] sm:$0xff]  ;;  %v6173_v20 = vld [vmem:[%s12921_s4 + $0x258] sm:$0xff] }
 0x25b   : > { %v6966_v46 = vpop.f32.mrb[152].mxu0  ;;  %v12062_v60 = vadd.f32 %v11792_v44, %v6965_v30  ;;  %9203 = vmatprep.subr.bf16.mxu0 %v9202_v36  ;;  %v6152_v44 = vld [vmem:[%s12921_s4 + $0x1b0] sm:$0xff] }
 0x25c   : > { %v7984_v5 = vpop.f32.mrb[152].mxu1  ;;  %v6967_v45 = vpop.f32.mrb[153].mxu0  ;;  %9139 = vmatprep.subr.bf16.mxu1 %v9138_v4 }
 0x25d   : > { %v6968_v63 = vadd.f32 %v6967_v45, %v6966_v46  ;;  %v3508_v24 = vpop.f32.mrb[153].mxu1  ;;  %9141 = vmatpush3.bf16.msra.mxu1 %v9138_v4 }
 0x25e   : > { %v12068_v18 = vadd.f32 %v3508_v24, %v11996_v59  ;;  %9205 = vmatpush3.bf16.msra.mxu0 %v9202_v36  ;;  %v9142_v59 = vpack.c.bf16 %v6153_v43, %v6152_v44  ;;  %v9210_v36 = vpack.c.bf16 %v6171_v25, %v6170_v47  ;;  %v6157_v43 = vld [vmem:[%s12921_s4 + $0x1d8] sm:$0xff]  ;;  %v6174_v47 = vld [vmem:[%s12921_s4 + $0x260] sm:$0xff]  ;;  %v6175_v25 = vld [vmem:[%s12921_s4 + $0x268] sm:$0xff] }
 0x25f   : > { %v6969_v49 = vpop.f32.mrb[154].mxu0  ;;  %v12080_v39 = vadd.f32 %v11803_v33, %v6968_v63  ;;  %9207 = vmatprep.subr.bf16.mxu0 %v9206_v41  ;;  %v6154_v33 = vld [vmem:[%s12921_s4 + $0x1c0] sm:$0xff] }
 0x260   : > { %12958 = vst [vmem:[#allocation9_spill] sm:$0xff] %v12068_v18  ;;  %v7987_v52 = vpop.f32.mrb[154].mxu1  ;;  %v6970_v54 = vpop.f32.mrb[155].mxu0  ;;  %9143 = vmatprep.subr.bf16.mxu1 %v9142_v59 }
 0x261   : > { %v6971_v30 = vadd.f32 %v6970_v54, %v6969_v49  ;;  %v3518_v37 = vpop.f32.mrb[155].mxu1  ;;  %9145 = vmatpush3.bf16.msra.mxu1 %v9142_v59 }
 0x262   : > { %v12086_v3 = vadd.f32 %v3518_v37, %v11999_v56  ;;  %9209 = vmatpush3.bf16.msra.mxu0 %v9206_v41  ;;  %v9146_v56 = vpack.c.bf16 %v6155_v62, %v6154_v33  ;;  %v9214_v41 = vpack.c.bf16 %v6173_v20, %v6172_v0  ;;  %v6159_v62 = vld [vmem:[%s12921_s4 + $0x1e8] sm:$0xff]  ;;  %v6177_v20 = vld [vmem:[%s12921_s4 + $0x278] sm:$0xff] }
 0x263   : > { %v6972_v46 = vpop.f32.mrb[156].mxu0  ;;  %v12098_v4 = vadd.f32 %v11817_v51, %v6971_v30  ;;  %9211 = vmatprep.subr.bf16.mxu0 %v9210_v36  ;;  %v6156_v51 = vld [vmem:[%s12921_s4 + $0x1d0] sm:$0xff] }
 0x264   : > { %12959 = vst [vmem:[#allocation10_spill] sm:$0xff] %v12086_v3  ;;  %v7990_v5 = vpop.f32.mrb[156].mxu1  ;;  %v6973_v45 = vpop.f32.mrb[157].mxu0  ;;  %9147 = vmatprep.subr.bf16.mxu1 %v9146_v56 }
 0x265   : > { %v6974_v63 = vadd.f32 %v6973_v45, %v6972_v46  ;;  %v3528_v24 = vpop.f32.mrb[157].mxu1  ;;  %9149 = vmatpush3.bf16.msra.mxu1 %v9146_v56 }
 0x266   : > { %v12104_v44 = vadd.f32 %v3528_v24, %v12002_v1  ;;  %9213 = vmatpush3.bf16.msra.mxu0 %v9210_v36  ;;  %v9150_v1 = vpack.c.bf16 %v6157_v43, %v6156_v51  ;;  %v9218_v36 = vpack.c.bf16 %v6175_v25, %v6174_v47  ;;  %v6161_v51 = vld [vmem:[%s12921_s4 + $0x1f8] sm:$0xff]  ;;  %v6176_v43 = vld [vmem:[%s12921_s4 + $0x270] sm:$0xff]  ;;  %v6115_v25 = vld [vmem:[%s12921_s4 + $0x88] sm:$0xff] }
 0x267   : > { %v6975_v49 = vpop.f32.mrb[158].mxu0  ;;  %v12116_v59 = vadd.f32 %v11828_v61, %v6974_v63  ;;  %9215 = vmatprep.subr.bf16.mxu0 %v9214_v41  ;;  %v6158_v61 = vld [vmem:[%s12921_s4 + $0x1e0] sm:$0xff] }
 0x268   : > { %12960 = vst [vmem:[#allocation11_spill] sm:$0xff] %v12104_v44  ;;  %v7993_v52 = vpop.f32.mrb[158].mxu1  ;;  %v6976_v54 = vpop.f32.mrb[159].mxu0  ;;  %9151 = vmatprep.subr.bf16.mxu1 %v9150_v1 }
 0x269   : > { %v6977_v30 = vadd.f32 %v6976_v54, %v6975_v49  ;;  %v3538_v37 = vpop.f32.mrb[159].mxu1  ;;  %9153 = vmatpush3.bf16.msra.mxu1 %v9150_v1 }
 0x26a   : > { %v12122_v33 = vadd.f32 %v3538_v37, %v12005_v2  ;;  %9217 = vmatpush3.bf16.msra.mxu0 %v9214_v41  ;;  %v9154_v2 = vpack.c.bf16 %v6159_v62, %v6158_v61  ;;  %v9222_v41 = vpack.c.bf16 %v6177_v20, %v6176_v43  ;;  %v3970_v61 = vld [vmem:[%s12921_s4 + $0x8] sm:$0xff]  ;;  %v6114_v62 = vld [vmem:[%s12921_s4 + $0x80] sm:$0xff] }
 0x26b   : > { %v6978_v46 = vpop.f32.mrb[160].mxu0  ;;  %v12134_v56 = vadd.f32 %v11842_v28, %v6977_v30  ;;  %9219 = vmatprep.subr.bf16.mxu0 %v9218_v36  ;;  %v6160_v28 = vld [vmem:[%s12921_s4 + $0x1f0] sm:$0xff] }
 0x26c   : > { %12961 = vst [vmem:[#allocation12_spill] sm:$0xff] %v12122_v33  ;;  %v12139_v5 = vpop.f32.mrb[16].mxu1  ;;  %v6979_v45 = vpop.f32.mrb[161].mxu0  ;;  %9155 = vmatprep.subr.bf16.mxu1 %v9154_v2  ;;  %v9158_v1 = vpack.c.bf16 %v6161_v51, %v6160_v28 }
 0x26d   : > { %v6980_v63 = vadd.f32 %v6979_v45, %v6978_v46  ;;  %v12141_v24 = vpop.f32.mrb[17].mxu1  ;;  %9157 = vmatpush3.bf16.msra.mxu1 %v9154_v2 }
 0x26e   : > { %9221 = vmatpush3.bf16.msra.mxu0 %v9218_v36  ;;  %9159 = vmatprep.subr.bf16.mxu1 %v9158_v1 }
 0x26f   : > { %v6981_v0 = vpop.f32.mrb[162].mxu0  ;;  %v12153_v49 = vadd.f32 %v11856_v23, %v6980_v63  ;;  %9223 = vmatprep.subr.bf16.mxu0 %v9222_v41  ;;  %v3969_v23 = vld [vmem:[%s12921_s4] sm:$0xff]  ;;  %v12181_v63 = vpack.c.bf16 %v6115_v25, %v6114_v62 }
 0x270   : > { %v12158_v52 = vpop.f32.mrb[18].mxu1  ;;  %v6982_v54 = vpop.f32.mrb[163].mxu0  ;;  %v12174_v2 = vpack.c.bf16 %v3970_v61, %v3969_v23 }
 0x271   : > { %v6983_v30 = vadd.f32 %v6982_v54, %v6981_v0  ;;  %v12160_v37 = vpop.f32.mrb[19].mxu1  ;;  %9161 = vmatpush3.bf16.msra.mxu1 %v9158_v1  ;;  %12963 = vst [vmem:[#allocation14_spill] sm:$0xff] %v12181_v63 }
 0x272   : > { %9225 = vmatpush3.bf16.msra.mxu0 %v9222_v41  ;;  %12962 = vst [vmem:[#allocation13_spill] sm:$0xff] %v12174_v2  ;;  %9163 = vmatprep.subr.bf16.mxu1 %v12174_v2 }
 0x273   : > { %v6984_v47 = vpop.f32.mrb[164].mxu0  ;;  %v12172_v46 = vadd.f32 %v11864_v21, %v6983_v30  ;;  %9227 = vmatprep.subr.bf16.mxu0 %v12181_v63 }
 0x274   : > { %v12179_v45 = vpop.f32.mrb[20].mxu1  ;;  %v6985_v36 = vpop.f32.mrb[165].mxu0 }
 0x275   : > { %v6986_v28 = vadd.f32 %v6985_v36, %v6984_v47  ;;  %v12183_v51 = vpop.f32.mrb[21].mxu1 }
 0x277   : > { %v6987_v21 = vpop.f32.mrb[166].mxu0  ;;  %v12188_v43 = vadd.f32 %v11872_v6, %v6986_v28 }
 0x278   : > { %v12190_v0 = vpop.f32.mrb[22].mxu1  ;;  %v6988_v1 = vpop.f32.mrb[167].mxu0 }
 0x279   : > { %v6989_v20 = vadd.f32 %v6988_v1, %v6987_v21  ;;  %v12192_v54 = vpop.f32.mrb[23].mxu1 }
 0x27b   : > { %v6990_v41 = vpop.f32.mrb[168].mxu0  ;;  %v12195_v30 = vadd.f32 %v11880_v9, %v6989_v20 }
 0x27c   : > { %v12197_v23 = vpop.f32.mrb[24].mxu1  ;;  %v6991_v61 = vpop.f32.mrb[169].mxu0 }
 0x27d   : > { %v6992_v62 = vadd.f32 %v6991_v61, %v6990_v41  ;;  %v12199_v47 = vpop.f32.mrb[25].mxu1 }
 0x27f   : > { %v6993_v25 = vpop.f32.mrb[170].mxu0  ;;  %v12202_v6 = vadd.f32 %v11888_v22, %v6992_v62 }
 0x280   : > { %v12204_v36 = vpop.f32.mrb[26].mxu1  ;;  %v6994_v28 = vpop.f32.mrb[171].mxu0 }
 0x281   : > { %12964 = vst [vmem:[#allocation15_spill] sm:$0xff] %v12202_v6  ;;  %v6995_v21 = vadd.f32 %v6994_v28, %v6993_v25  ;;  %v12206_v1 = vpop.f32.mrb[27].mxu1 }
 0x283   : > { %v6996_v63 = vpop.f32.mrb[172].mxu0  ;;  %v12209_v9 = vadd.f32 %v11896_v10, %v6995_v21 }
 0x284   : > { %v12211_v20 = vpop.f32.mrb[28].mxu1  ;;  %v6997_v2 = vpop.f32.mrb[173].mxu0 }
 0x285   : > { %12965 = vst [vmem:[#allocation16_spill] sm:$0xff] %v12209_v9  ;;  %v6998_v41 = vadd.f32 %v6997_v2, %v6996_v63  ;;  %v12213_v61 = vpop.f32.mrb[29].mxu1 }
 0x287   : > { %v6999_v58 = vpop.f32.mrb[174].mxu0  ;;  %v12216_v22 = vadd.f32 %v11904_v42, %v6998_v41 }
 0x288   : > { %v12218_v62 = vpop.f32.mrb[30].mxu1  ;;  %v7000_v33 = vpop.f32.mrb[175].mxu0 }
 0x289   : > { %12966 = vst [vmem:[#allocation17_spill] sm:$0xff] %v12216_v22  ;;  %v7001_v25 = vadd.f32 %v7000_v33, %v6999_v58  ;;  %v12220_v28 = vpop.f32.mrb[31].mxu1 }
 0x28b   : > { %v7114_v40 = vpop.f32.mrb[176].mxu0  ;;  %v12223_v10 = vadd.f32 %v11912_v55, %v7001_v25 }
 0x28c   : > { %v7115_v21 = vpop.f32.mrb[177].mxu0 }
 0x28d   : > { %v7116_v44 = vadd.f32 %v7115_v21, %v7114_v40 }
 0x28f   : > { %v9486_v2 = vadd.f32 %v11917_v48, %v7116_v44  ;;  %v7117_v63 = vpop.f32.mrb[178].mxu0 }
 0x290   : > { %v7118_v3 = vpop.f32.mrb[179].mxu0 }
 0x291   : > { %v9487_v6 = vadd.f32 %v9486_v2, %v12141_v24  ;;  %v7119_v42 = vadd.f32 %v7118_v3, %v7117_v63 }
 0x293   : > { %v9483_v41 = vadd.f32 %v11922_v19, %v7119_v42  ;;  %v7120_v22 = vpop.f32.mrb[180].mxu0  ;;  %v3840_v18 = vrot.slane %v9487_v6, 1 }
 0x294   : > { %v7121_v9 = vpop.f32.mrb[181].mxu0 }
 0x295   : > { %v9484_v58 = vadd.f32 %v9483_v41, %v12139_v5  ;;  %v7122_v33 = vadd.f32 %v7121_v9, %v7120_v22 }
 0x297   : > { %v3841_v55 = vrot.slane %v9484_v58, 1  ;;  %v9492_v25 = vadd.f32 %v11927_v12, %v7122_v33  ;;  %v7123_v40 = vpop.f32.mrb[182].mxu0 }
 0x298   : > { %v7124_v21 = vpop.f32.mrb[183].mxu0 }
 0x299   : > { %v9493_v48 = vadd.f32 %v9492_v25, %v12160_v37  ;;  %v7125_v44 = vadd.f32 %v7124_v21, %v7123_v40  ;;  %v12232_v24 = vsel %vm3839_vm0, %v3840_v18, %v3841_v55 }
 0x29b   : > { %v9489_v19 = vadd.f32 %v11932_v8, %v7125_v44  ;;  %v7126_v3 = vpop.f32.mrb[184].mxu0  ;;  %v3843_v22 = vrot.slane %v9493_v48, 1 }
 0x29c   : > { %v7127_v2 = vpop.f32.mrb[185].mxu0 }
 0x29d   : > { %v9490_v5 = vadd.f32 %v9489_v19, %v12158_v52  ;;  %v7128_v9 = vadd.f32 %v7127_v2, %v7126_v3 }
 0x29f   : > { %v3845_v6 = vrot.slane %v9490_v5, 1  ;;  %v9498_v63 = vadd.f32 %v11937_v50, %v7128_v9  ;;  %v7129_v12 = vpop.f32.mrb[186].mxu0 }
 0x2a0   : > { %v7130_v42 = vpop.f32.mrb[187].mxu0 }
 0x2a1   : > { %v9499_v41 = vadd.f32 %v9498_v63, %v12183_v51  ;;  %v7131_v37 = vadd.f32 %v7130_v42, %v7129_v12  ;;  %v12239_v58 = vsel %vm3839_vm0, %v3843_v22, %v3845_v6 }
 0x2a3   : > { %v9495_v18 = vadd.f32 %v11942_v35, %v7131_v37  ;;  %v7132_v8 = vpop.f32.mrb[188].mxu0  ;;  %v3847_v25 = vrot.slane %v9499_v41, 1 }
 0x2a4   : > { %v7133_v33 = vpop.f32.mrb[189].mxu0 }
 0x2a5   : > { %v9496_v55 = vadd.f32 %v9495_v18, %v12179_v45  ;;  %v7134_v52 = vadd.f32 %v7133_v33, %v7132_v8 }
 0x2a7   : > { %v3849_v40 = vrot.slane %v9496_v55, 1  ;;  %v9504_v21 = vadd.f32 %v11947_v17, %v7134_v52  ;;  %v7135_v50 = vpop.f32.mrb[190].mxu0 }
 0x2a8   : > { %v7136_v48 = vpop.f32.mrb[191].mxu0 }
 0x2a9   : > { %v9505_v44 = vadd.f32 %v9504_v21, %v12192_v54  ;;  %v7137_v51 = vadd.f32 %v7136_v48, %v7135_v50  ;;  %v12246_v19 = vsel %vm3839_vm0, %v3847_v25, %v3849_v40 }
 0x2ab   : > { %v9501_v3 = vadd.f32 %v11952_v11, %v7137_v51  ;;  %v7138_v35 = vpop.f32.mrb[192].mxu0  ;;  %v3851_v9 = vrot.slane %v9505_v44, 1 }
 0x2ac   : > { %v7139_v2 = vpop.f32.mrb[193].mxu0 }
 0x2ad   : > { %v9502_v5 = vadd.f32 %v9501_v3, %v12190_v0  ;;  %v7140_v45 = vadd.f32 %v7139_v2, %v7138_v35 }
 0x2af   : > { %v3853_v22 = vrot.slane %v9502_v5, 1  ;;  %v9510_v6 = vadd.f32 %v11957_v26, %v7140_v45  ;;  %v7141_v17 = vpop.f32.mrb[194].mxu0 }
 0x2b0   : > { %v7142_v63 = vpop.f32.mrb[195].mxu0 }
 0x2b1   : > { %v9511_v12 = vadd.f32 %v9510_v6, %v12199_v47  ;;  %v7143_v54 = vadd.f32 %v7142_v63, %v7141_v17  ;;  %v12253_v42 = vsel %vm3839_vm0, %v3851_v9, %v3853_v22 }
 0x2b3   : > { %v9507_v41 = vadd.f32 %v11965_v27, %v7143_v54  ;;  %v7144_v11 = vpop.f32.mrb[196].mxu0  ;;  %v3855_v8 = vrot.slane %v9511_v12, 1 }
 0x2b4   : > { %v7145_v37 = vpop.f32.mrb[197].mxu0 }
 0x2b5   : > { %v9508_v18 = vadd.f32 %v9507_v41, %v12197_v23  ;;  %v7146_v0 = vadd.f32 %v7145_v37, %v7144_v11 }
 0x2b7   : > { %v3857_v33 = vrot.slane %v9508_v18, 1  ;;  %v9516_v55 = vadd.f32 %v11969_v32, %v7146_v0  ;;  %v7147_v26 = vpop.f32.mrb[198].mxu0 }
 0x2b8   : > { %v7148_v52 = vpop.f32.mrb[199].mxu0 }
 0x2b9   : > { %v9517_v25 = vadd.f32 %v9516_v55, %v12206_v1  ;;  %v7149_v47 = vadd.f32 %v7148_v52, %v7147_v26  ;;  %v12260_v40 = vsel %vm3839_vm0, %v3855_v8, %v3857_v33 }
 0x2bb   : > { %v9513_v21 = vadd.f32 %v11975_v34, %v7149_v47  ;;  %v7150_v27 = vpop.f32.mrb[200].mxu0  ;;  %v3859_v44 = vrot.slane %v9517_v25, 1 }
 0x2bc   : > { %v7151_v50 = vpop.f32.mrb[201].mxu0 }
 0x2bd   : > { %v9514_v48 = vadd.f32 %v9513_v21, %v12204_v36  ;;  %v7152_v23 = vadd.f32 %v7151_v50, %v7150_v27 }
 0x2bf   : > { %v3861_v51 = vrot.slane %v9514_v48, 1  ;;  %v9522_v3 = vadd.f32 %v11978_v31, %v7152_v23  ;;  %v7153_v32 = vpop.f32.mrb[202].mxu0 }
 0x2c0   : > { %v7154_v35 = vpop.f32.mrb[203].mxu0 }
 0x2c1   : > { %v9523_v2 = vadd.f32 %v9522_v3, %v12213_v61  ;;  %v7155_v1 = vadd.f32 %v7154_v35, %v7153_v32  ;;  %v12267_v5 = vsel %vm3839_vm0, %v3859_v44, %v3861_v51 }
 0x2c3   : > { %v9519_v45 = vadd.f32 %v11984_v15, %v7155_v1  ;;  %v7156_v34 = vpop.f32.mrb[204].mxu0  ;;  %v3863_v6 = vrot.slane %v9523_v2, 1 }
 0x2c4   : > { %v7157_v9 = vpop.f32.mrb[205].mxu0 }
 0x2c5   : > { %v9520_v22 = vadd.f32 %v9519_v45, %v12211_v20  ;;  %v7158_v36 = vadd.f32 %v7157_v9, %v7156_v34 }
 0x2c7   : > { %v3865_v17 = vrot.slane %v9520_v22, 1  ;;  %v9528_v63 = vadd.f32 %v11987_v29, %v7158_v36  ;;  %v7159_v31 = vpop.f32.mrb[206].mxu0 }
 0x2c8   : > { %v7160_v12 = vpop.f32.mrb[207].mxu0 }
 0x2c9   : > { %v9529_v54 = vadd.f32 %v9528_v63, %v12220_v28  ;;  %v7161_v61 = vadd.f32 %v7160_v12, %v7159_v31  ;;  %v12274_v41 = vsel %vm3839_vm0, %v3863_v6, %v3865_v17  ;;  %v12967_v6 = vld [vmem:[#allocation9_spill] sm:$0xff]  ;;  %v12968_v12 = vld [vmem:[#allocation16_spill] sm:$0xff] }
 0x2cb   : > { %v9525_v11 = vadd.f32 %v11993_v14, %v7161_v61  ;;  %v7916_v15 = vpop.f32.mrb[0].mxu0  ;;  %v3867_v29 = vrot.slane %v9529_v54, 1 }
 0x2cc   : > { %v9436_v37 = vadd.f32 %v12026_v38, %v7916_v15  ;;  %v3290_v18 = vpop.f32.mrb[1].mxu0  ;;  %v12970_v15 = vld [vmem:[#allocation10_spill] sm:$0xff] }
 0x2cd   : > { %v9526_v20 = vadd.f32 %v9525_v11, %v12218_v62  ;;  %v12280_v0 = vadd.f32 %v12011_v7, %v3290_v18  ;;  %v12969_v11 = vld [vmem:[#allocation15_spill] sm:$0xff] }
 0x2ce   : > { %v3761_v14 = vrot.slane %v9436_v37, 7 }
 0x2cf   : > { %v3869_v8 = vrot.slane %v9526_v20, 1  ;;  %v7919_v33 = vpop.f32.mrb[2].mxu0 }
 0x2d0   : > { %v9442_v28 = vadd.f32 %v12062_v60, %v7919_v33  ;;  %v3300_v55 = vpop.f32.mrb[3].mxu0 }
 0x2d1   : > { %v9445_v26 = vadd.f32 %v12044_v16, %v3300_v55  ;;  %v12285_v52 = vsel %vm3839_vm0, %v3867_v29, %v3869_v8 }
 0x2d2   : > { %v3765_v60 = vrot.slane %v9442_v28, 7  ;;  %v12971_v28 = vld [vmem:[#allocation17_spill] sm:$0xff] }
 0x2d3   : > { %v3763_v38 = vrot.slane %v9445_v26, 7  ;;  %v7922_v25 = vpop.f32.mrb[4].mxu0  ;;  %v3760_v26 = vrot.slane %v12280_v0, 7  ;;  %v3971_v0 = vld [vmem:[%s12921_s4 + $0x10] sm:$0xff] }
 0x2d4   : > { %v9448_v62 = vadd.f32 %v12098_v4, %v7922_v25  ;;  %v3310_v47 = vpop.f32.mrb[5].mxu0 }
 0x2d5   : > { %v3764_v7 = vsel %vm3759_vm1, %v3761_v14, %v3763_v38  ;;  %v9451_v21 = vadd.f32 %v12080_v39, %v3310_v47  ;;  %v12972_v14 = vld [vmem:[#allocation11_spill] sm:$0xff] }
 0x2d6   : > { %v3809_v27 = vadd.f32 %v3764_v7, %v12014_v53  ;;  %v3769_v32 = vrot.slane %v9448_v62, 7 }
 0x2d7   : > { %v3767_v50 = vrot.slane %v9451_v21, 7  ;;  %v7925_v48 = vpop.f32.mrb[6].mxu0  ;;  %v12973_v21 = vld [vmem:[#allocation8_spill] sm:$0xff] }
 0x2d8   : > { %v3891_v16 = vadd.f32 %v12239_v58, %v3809_v27  ;;  %v9454_v23 = vadd.f32 %v12134_v56, %v7925_v48  ;;  %v3320_v44 = vpop.f32.mrb[7].mxu0 }
 0x2d9   : > { %v3768_v51 = vsel %vm3759_vm1, %v3765_v60, %v3767_v50  ;;  %v9457_v3 = vadd.f32 %v12116_v59, %v3320_v44  ;;  %v12974_v60 = vld [vmem:[#allocation12_spill] sm:$0xff]  ;;  %v6116_v44 = vld [vmem:[%s12921_s4 + $0x90] sm:$0xff] }
 0x2da   : > { %v3811_v4 = vadd.f32 %v3768_v51, %v12032_v57  ;;  %v3773_v34 = vrot.slane %v9454_v23, 7  ;;  %v6117_v51 = vld [vmem:[%s12921_s4 + $0x98] sm:$0xff] }
 0x2db   : > { %v3771_v35 = vrot.slane %v9457_v3, 7  ;;  %v7928_v2 = vpop.f32.mrb[8].mxu0  ;;  %v12350_v3 = vmax.f32 %v3891_v16, 0.0  ;;  %v6118_v16 = vld [vmem:[%s12921_s4 + $0xa0] sm:$0xff] }
 0x2dc   : > { %v12297_v39 = vadd.f32 %v12246_v19, %v3811_v4  ;;  %v9460_v53 = vadd.f32 %v12172_v46, %v7928_v2  ;;  %v3330_v1 = vpop.f32.mrb[9].mxu0  ;;  %v9230_v4 = vpack.c.bf16 %v6117_v51, %v6116_v44  ;;  %v3974_v2 = vld [vmem:[%s12921_s4 + $0x28] sm:$0xff]  ;;  %v6214_v51 = vld [vmem:[%s12921_s4 + $0x3a0] sm:$0xff] }
 0x2dd   : > { %v3772_v58 = vsel %vm3759_vm1, %v3769_v32, %v3771_v35  ;;  %v9463_v56 = vadd.f32 %v12153_v49, %v3330_v1  ;;  %v3973_v32 = vld [vmem:[%s12921_s4 + $0x20] sm:$0xff]  ;;  %v12975_v35 = vmov 0.0   ;;  %v12976_v1 = vld [vmem:[#allocation13_spill] sm:$0xff] }
 0x2de   : > { %v3813_v45 = vadd.f32 %v3772_v58, %v12050_v13  ;;  %v3777_v63 = vrot.slane %v9460_v53, 7  ;;  %v6119_v53 = vld [vmem:[%s12921_s4 + $0xa8] sm:$0xff]  ;;  %v12977_v58 = vld [vmem:[#allocation14_spill] sm:$0xff] }
 0x2df   : > { %v3775_v9 = vrot.slane %v9463_v56, 7  ;;  %v7931_v59 = vpop.f32.mrb[10].mxu0  ;;  %v12373_v56 = vmax.f32 %v12297_v39, 0.0  ;;  %v6120_v39 = vld [vmem:[%s12921_s4 + $0xb0] sm:$0xff]  ;;  %v6183_v44 = vld [vmem:[%s12921_s4 + $0x2a8] sm:$0xff] }
 0x2e0   : > { %v12304_v57 = vadd.f32 %v12253_v42, %v3813_v45  ;;  %v9466_v22 = vadd.f32 %v12195_v30, %v7931_v59  ;;  %v3340_v36 = vpop.f32.mrb[11].mxu0  ;;  %v9170_v45 = vpack.c.bf16 %v3974_v2, %v3973_v32  ;;  %v3976_v59 = vld [vmem:[%s12921_s4 + $0x38] sm:$0xff]  ;;  %v6184_v2 = vld [vmem:[%s12921_s4 + $0x2b0] sm:$0xff] }
 0x2e1   : > { %v3776_v19 = vsel %vm3759_vm1, %v3773_v34, %v3775_v9  ;;  %v9469_v46 = vadd.f32 %v12188_v43, %v3340_v36  ;;  %v9234_v34 = vpack.c.bf16 %v6119_v53, %v6118_v16  ;;  %v3975_v9 = vld [vmem:[%s12921_s4 + $0x30] sm:$0xff]  ;;  %v6185_v16 = vld [vmem:[%s12921_s4 + $0x2b8] sm:$0xff] }
 0x2e2   : > { %v3815_v17 = vadd.f32 %v3776_v19, %v12967_v6  ;;  %v3781_v18 = vrot.slane %v9466_v22, 7  ;;  %v6121_v22 = vld [vmem:[%s12921_s4 + $0xb8] sm:$0xff]  ;;  %v12392_v36 = vmax.f32 %v12304_v57, 0.0  ;;  %v9174_v19 = vpack.c.bf16 %v3976_v59, %v3975_v9  ;;  %v3977_v6 = vld [vmem:[%s12921_s4 + $0x40] sm:$0xff]  ;;  %v6216_v53 = vld [vmem:[%s12921_s4 + $0x3b0] sm:$0xff] }
 0x2e3   : > { %v3779_v31 = vrot.slane %v9469_v46, 7  ;;  %v7934_v49 = vpop.f32.mrb[12].mxu0  ;;  %v9238_v46 = vpack.c.bf16 %v6121_v22, %v6120_v39  ;;  %v6122_v57 = vld [vmem:[%s12921_s4 + $0xc0] sm:$0xff]  ;;  %v6187_v9 = vld [vmem:[%s12921_s4 + $0x2c8] sm:$0xff] }
 0x2e4   : > { %v12311_v13 = vadd.f32 %v12260_v40, %v3815_v17  ;;  %v9472_v54 = vadd.f32 %v12968_v12, %v7934_v49  ;;  %v3350_v61 = vpop.f32.mrb[13].mxu0  ;;  %v3978_v17 = vld [vmem:[%s12921_s4 + $0x48] sm:$0xff]  ;;  %v6218_v59 = vld [vmem:[%s12921_s4 + $0x3c0] sm:$0xff] }
 0x2e5   : > { %v3780_v42 = vsel %vm3759_vm1, %v3777_v63, %v3779_v31  ;;  %v9475_v30 = vadd.f32 %v12969_v11, %v3350_v61  ;;  %v6123_v63 = vld [vmem:[%s12921_s4 + $0xc8] sm:$0xff]  ;;  %v9178_v49 = vpack.c.bf16 %v3978_v17, %v3977_v6  ;;  %v3980_v61 = vld [vmem:[%s12921_s4 + $0x58] sm:$0xff]  ;;  %v6220_v17 = vld [vmem:[%s12921_s4 + $0x3d0] sm:$0xff] }
 0x2e6   : > { %v3817_v37 = vadd.f32 %v3780_v42, %v12970_v15  ;;  %v3785_v62 = vrot.slane %v9472_v54, 7  ;;  %v12411_v31 = vmax.f32 %v12311_v13, 0.0  ;;  %v9242_v12 = vpack.c.bf16 %v6123_v63, %v6122_v57  ;;  %v3979_v54 = vld [vmem:[%s12921_s4 + $0x50] sm:$0xff]  ;;  %v6125_v42 = vld [vmem:[%s12921_s4 + $0xd8] sm:$0xff]  ;;  %v6219_v39 = vld [vmem:[%s12921_s4 + $0x3c8] sm:$0xff] }
 0x2e7   : > { %v3783_v20 = vrot.slane %v9475_v30, 7  ;;  %v7937_v43 = vpop.f32.mrb[14].mxu0  ;;  %v6124_v13 = vld [vmem:[%s12921_s4 + $0xd0] sm:$0xff]  ;;  %v9182_v30 = vpack.c.bf16 %v3980_v61, %v3979_v54  ;;  %v6189_v6 = vld [vmem:[%s12921_s4 + $0x2d8] sm:$0xff]  ;;  %v6191_v54 = vld [vmem:[%s12921_s4 + $0x2e8] sm:$0xff] }
 0x2e8   : > { %v12318_v29 = vadd.f32 %v12267_v5, %v3817_v37  ;;  %v9478_v8 = vadd.f32 %v12223_v10, %v7937_v43  ;;  %v3360_v33 = vpop.f32.mrb[15].mxu0  ;;  %v9246_v15 = vpack.c.bf16 %v6125_v42, %v6124_v13  ;;  %v3981_v37 = vld [vmem:[%s12921_s4 + $0x60] sm:$0xff]  ;;  %v6127_v43 = vld [vmem:[%s12921_s4 + $0xe8] sm:$0xff]  ;;  %v6221_v57 = vld [vmem:[%s12921_s4 + $0x3d8] sm:$0xff] }
 0x2e9   : > { %v3784_v40 = vsel %vm3759_vm1, %v3781_v18, %v3783_v20  ;;  %v9481_v55 = vadd.f32 %v12971_v28, %v3360_v33  ;;  %v3982_v18 = vld [vmem:[%s12921_s4 + $0x68] sm:$0xff]  ;;  %v6126_v20 = vld [vmem:[%s12921_s4 + $0xe0] sm:$0xff]  ;;  %v3984_v28 = vld [vmem:[%s12921_s4 + $0x78] sm:$0xff] }
 0x2ea   : > { %v3819_v38 = vadd.f32 %v3784_v40, %v12972_v14  ;;  %v3742_v25 = vrot.slane %v9478_v8, 7  ;;  %v12430_v11 = vmax.f32 %v12318_v29, 0.0  ;;  %v9186_v8 = vpack.c.bf16 %v3982_v18, %v3981_v37  ;;  %v3983_v40 = vld [vmem:[%s12921_s4 + $0x70] sm:$0xff]  ;;  %v6222_v61 = vld [vmem:[%s12921_s4 + $0x3e0] sm:$0xff]  ;;  %v6223_v13 = vld [vmem:[%s12921_s4 + $0x3e8] sm:$0xff] }
 0x2eb   : > { %v3787_v47 = vrot.slane %v9481_v55, 7  ;;  %v9250_v33 = vpack.c.bf16 %v6127_v43, %v6126_v20  ;;  %v6128_v55 = vld [vmem:[%s12921_s4 + $0xf0] sm:$0xff]  ;;  %v6193_v37 = vld [vmem:[%s12921_s4 + $0x2f8] sm:$0xff] }
 0x2ec   : > { %v12326_v7 = vadd.f32 %v12274_v41, %v3819_v38  ;;  %v3806_v5 = vsel %vm3759_vm1, %v3742_v25, %v3760_v26  ;;  %v3972_v41 = vld [vmem:[%s12921_s4 + $0x18] sm:$0xff]  ;;  %v9190_v38 = vpack.c.bf16 %v3984_v28, %v3983_v40  ;;  %v6224_v18 = vld [vmem:[%s12921_s4 + $0x3f0] sm:$0xff]  ;;  %v6131_v40 = vld [vmem:[%s12921_s4 + $0x108] sm:$0xff] }
 0x2ed   : > { %v3807_v27 = vadd.f32 %v3806_v5, %v12973_v21  ;;  %v3788_v10 = vsel %vm3759_vm1, %v3785_v62, %v3787_v47  ;;  %v6129_v26 = vld [vmem:[%s12921_s4 + $0xf8] sm:$0xff]  ;;  %v6178_v62 = vld [vmem:[%s12921_s4 + $0x280] sm:$0xff]  ;;  %v6179_v47 = vld [vmem:[%s12921_s4 + $0x288] sm:$0xff] }
 0x2ee   : > { %v3821_v50 = vadd.f32 %v3788_v10, %v12974_v60  ;;  %v12449_v29 = vmax.f32 %v12326_v7, 0.0  ;;  %v9254_v25 = vpack.c.bf16 %v6129_v26, %v6128_v55  ;;  %v6210_v7 = vld [vmem:[%s12921_s4 + $0x380] sm:$0xff]  ;;  %v6211_v5 = vld [vmem:[%s12921_s4 + $0x388] sm:$0xff]  ;;  %v9258_v21 = vpack.c.bf16 %v6179_v47, %v6178_v62  ;;  %v6180_v10 = vld [vmem:[%s12921_s4 + $0x290] sm:$0xff] }
 0x2ef   : > { %v3889_v48 = vadd.f32 %v12232_v24, %v3807_v27  ;;  %v9354_v27 = vpack.c.bf16 %v6211_v5, %v6210_v7  ;;  %v6181_v60 = vld [vmem:[%s12921_s4 + $0x298] sm:$0xff]  ;;  %v6132_v55 = vld [vmem:[%s12921_s4 + $0x110] sm:$0xff]  ;;  %v6135_v62 = vld [vmem:[%s12921_s4 + $0x128] sm:$0xff] }
 0x2f0   : > { %v12337_v23 = vadd.f32 %v12285_v52, %v3821_v50  ;;  %v9166_v52 = vpack.c.bf16 %v3972_v41, %v3971_v0  ;;  %v6212_v50 = vld [vmem:[%s12921_s4 + $0x390] sm:$0xff]  ;;  %v9262_v0 = vpack.c.bf16 %v6181_v60, %v6180_v10  ;;  %v6182_v41 = vld [vmem:[%s12921_s4 + $0x2a0] sm:$0xff]  ;;  %v6225_v20 = vld [vmem:[%s12921_s4 + $0x3f8] sm:$0xff] }
 0x2f1   : > { %v12348_v24 = vmax.f32 %v3889_v48, 0.0  ;;  %v6213_v48 = vld [vmem:[%s12921_s4 + $0x398] sm:$0xff]  ;;  %v6136_v7 = vld [vmem:[%s12921_s4 + $0x130] sm:$0xff]  ;;  %v6139_v10 = vld [vmem:[%s12921_s4 + $0x148] sm:$0xff] }
 0x2f2   : > { %v12468_v14 = vmax.f32 %v12337_v23, 0.0  ;;  %v9358_v23 = vpack.c.bf16 %v6213_v48, %v6212_v50  ;;  %v6133_v26 = vld [vmem:[%s12921_s4 + $0x118] sm:$0xff]  ;;  %v6140_v50 = vld [vmem:[%s12921_s4 + $0x150] sm:$0xff] }
 0x2f3   : > { %8082 = vmatprep.mubr.f32.mxu1 %v12348_v24  ;;  %8194 = vmatprep.mubr.f32.mxu0 %v12348_v24  ;;  %v6137_v5 = vld [vmem:[%s12921_s4 + $0x138] sm:$0xff] }
 0x2f4   : > { %8083 = vmatmul.mubr.f32.vlgmr.msra.gmra.mrb[160].mxu1 %v12975_v35  ;;  %8195 = vmatmul.mubr.f32.vlgmr.msra.gmra.mrb[208].mxu0 %v12975_v35  ;;  %v6141_v48 = vld [vmem:[%s12921_s4 + $0x158] sm:$0xff] }
 0x2f5   : > { %8085 = vmatprep.mubr.f32.mxu1 %v12350_v3  ;;  %9165 = vmatpush3.bf16.msra.mxu1 %v12976_v1  ;;  %v6217_v1 = vld [vmem:[%s12921_s4 + $0x3b8] sm:$0xff] }
 0x2f6   : > { %8197 = vmatprep.mubr.f32.mxu0 %v12350_v3  ;;  %9229 = vmatpush3.bf16.msra.mxu0 %v12977_v58  ;;  %v9270_v58 = vpack.c.bf16 %v6185_v16, %v6184_v2  ;;  %v6195_v2 = vld [vmem:[%s12921_s4 + $0x308] sm:$0xff] }
 0x2f7   : > { %9167 = vmatprep.subr.bf16.mxu1 %v9166_v52  ;;  %9231 = vmatprep.subr.bf16.mxu0 %v9230_v4 }
 0x2f8   : > { %8086 = vmatmul.mubr.f32.gmra.mrb[162].mxu1 %v12975_v35  ;;  %8198 = vmatmul.mubr.f32.gmra.mrb[210].mxu0 %v12975_v35 }
 0x2f9   : > { %8088 = vmatprep.mubr.f32.mxu1 %v12373_v56  ;;  %9169 = vmatpush3.bf16.msra.mxu1 %v9166_v52  ;;  %v6215_v52 = vld [vmem:[%s12921_s4 + $0x3a8] sm:$0xff] }
 0x2fa   : > { %8200 = vmatprep.mubr.f32.mxu0 %v12373_v56  ;;  %9233 = vmatpush3.bf16.msra.mxu0 %v9230_v4  ;;  %v9266_v4 = vpack.c.bf16 %v6183_v44, %v6182_v41  ;;  %v9362_v32 = vpack.c.bf16 %v6215_v52, %v6214_v51  ;;  %v6143_v41 = vld [vmem:[%s12921_s4 + $0x168] sm:$0xff]  ;;  %v6144_v51 = vld [vmem:[%s12921_s4 + $0x170] sm:$0xff]  ;;  %v6145_v52 = vld [vmem:[%s12921_s4 + $0x178] sm:$0xff] }
 0x2fb   : > { %9171 = vmatprep.subr.bf16.mxu1 %v9170_v45  ;;  %9235 = vmatprep.subr.bf16.mxu0 %v9234_v34 }
 0x2fc   : > { %8089 = vmatmul.mubr.f32.gmra.mrb[164].mxu1 %v12975_v35  ;;  %8201 = vmatmul.mubr.f32.gmra.mrb[212].mxu0 %v12975_v35 }
 0x2fd   : > { %8091 = vmatprep.mubr.f32.mxu1 %v12392_v36  ;;  %9173 = vmatpush3.bf16.msra.mxu1 %v9170_v45  ;;  %v9366_v45 = vpack.c.bf16 %v6217_v1, %v6216_v53  ;;  %v6196_v53 = vld [vmem:[%s12921_s4 + $0x310] sm:$0xff]  ;;  %v6197_v1 = vld [vmem:[%s12921_s4 + $0x318] sm:$0xff] }
 0x2fe   : > { %8203 = vmatprep.mubr.f32.mxu0 %v12392_v36  ;;  %9237 = vmatpush3.bf16.msra.mxu0 %v9234_v34  ;;  %v6186_v34 = vld [vmem:[%s12921_s4 + $0x2c0] sm:$0xff] }
 0x2ff   : > { %9175 = vmatprep.subr.bf16.mxu1 %v9174_v19  ;;  %9239 = vmatprep.subr.bf16.mxu0 %v9238_v46  ;;  %v9274_v22 = vpack.c.bf16 %v6187_v9, %v6186_v34  ;;  %v6199_v34 = vld [vmem:[%s12921_s4 + $0x328] sm:$0xff] }
 0x300   : > { %8092 = vmatmul.mubr.f32.gmra.mrb[166].mxu1 %v12975_v35  ;;  %8204 = vmatmul.mubr.f32.gmra.mrb[214].mxu0 %v12975_v35 }
 0x301   : > { %8094 = vmatprep.mubr.f32.mxu1 %v12411_v31  ;;  %9177 = vmatpush3.bf16.msra.mxu1 %v9174_v19  ;;  %v9370_v19 = vpack.c.bf16 %v6219_v39, %v6218_v59  ;;  %v6200_v59 = vld [vmem:[%s12921_s4 + $0x330] sm:$0xff]  ;;  %v6201_v39 = vld [vmem:[%s12921_s4 + $0x338] sm:$0xff] }
 0x302   : > { %8206 = vmatprep.mubr.f32.mxu0 %v12411_v31  ;;  %9241 = vmatpush3.bf16.msra.mxu0 %v9238_v46  ;;  %v6188_v46 = vld [vmem:[%s12921_s4 + $0x2d0] sm:$0xff] }
 0x303   : > { %9179 = vmatprep.subr.bf16.mxu1 %v9178_v49  ;;  %9243 = vmatprep.subr.bf16.mxu0 %v9242_v12  ;;  %v9278_v63 = vpack.c.bf16 %v6189_v6, %v6188_v46  ;;  %v6204_v6 = vld [vmem:[%s12921_s4 + $0x350] sm:$0xff] }
 0x304   : > { %8095 = vmatmul.mubr.f32.gmra.mrb[168].mxu1 %v12975_v35  ;;  %8207 = vmatmul.mubr.f32.gmra.mrb[216].mxu0 %v12975_v35 }
 0x305   : > { %8097 = vmatprep.mubr.f32.mxu1 %v12430_v11  ;;  %9181 = vmatpush3.bf16.msra.mxu1 %v9178_v49  ;;  %v9374_v49 = vpack.c.bf16 %v6221_v57, %v6220_v17  ;;  %v6205_v17 = vld [vmem:[%s12921_s4 + $0x358] sm:$0xff] }
 0x306   : > { %8209 = vmatprep.mubr.f32.mxu0 %v12430_v11  ;;  %9245 = vmatpush3.bf16.msra.mxu0 %v9242_v12  ;;  %v6190_v12 = vld [vmem:[%s12921_s4 + $0x2e0] sm:$0xff]  ;;  %v9342_v57 = vpack.c.bf16 %v6205_v17, %v6204_v6 }
 0x307   : > { %9183 = vmatprep.subr.bf16.mxu1 %v9182_v30  ;;  %9247 = vmatprep.subr.bf16.mxu0 %v9246_v15  ;;  %v9282_v42 = vpack.c.bf16 %v6191_v54, %v6190_v12  ;;  %v6208_v54 = vld [vmem:[%s12921_s4 + $0x370] sm:$0xff] }
 0x308   : > { %8098 = vmatmul.mubr.f32.gmra.mrb[170].mxu1 %v12975_v35  ;;  %8210 = vmatmul.mubr.f32.gmra.mrb[218].mxu0 %v12975_v35 }
 0x309   : > { %8100 = vmatprep.mubr.f32.mxu1 %v12449_v29  ;;  %9185 = vmatpush3.bf16.msra.mxu1 %v9182_v30  ;;  %v9378_v30 = vpack.c.bf16 %v6223_v13, %v6222_v61  ;;  %v6209_v61 = vld [vmem:[%s12921_s4 + $0x378] sm:$0xff] }
 0x30a   : > { %8212 = vmatprep.mubr.f32.mxu0 %v12449_v29  ;;  %9249 = vmatpush3.bf16.msra.mxu0 %v9246_v15  ;;  %v6192_v15 = vld [vmem:[%s12921_s4 + $0x2f0] sm:$0xff]  ;;  %v9350_v13 = vpack.c.bf16 %v6209_v61, %v6208_v54 }
 0x30b   : > { %9187 = vmatprep.subr.bf16.mxu1 %v9186_v8  ;;  %9251 = vmatprep.subr.bf16.mxu0 %v9250_v33  ;;  %v9286_v43 = vpack.c.bf16 %v6193_v37, %v6192_v15  ;;  %v6228_v37 = vld [vmem:[%s12921_s4 + $0x410] sm:$0xff] }
 0x30c   : > { %8101 = vmatmul.mubr.f32.gmra.mrb[172].mxu1 %v12975_v35  ;;  %8213 = vmatmul.mubr.f32.gmra.mrb[220].mxu0 %v12975_v35 }
 0x30d   : > { %8103 = vmatprep.mubr.f32.mxu1 %v12468_v14  ;;  %9189 = vmatpush3.bf16.msra.mxu1 %v9186_v8  ;;  %v9382_v8 = vpack.c.bf16 %v6225_v20, %v6224_v18  ;;  %v6229_v18 = vld [vmem:[%s12921_s4 + $0x418] sm:$0xff] }
 0x30e   : > { %8215 = vmatprep.mubr.f32.mxu0 %v12468_v14  ;;  %9253 = vmatpush3.bf16.msra.mxu0 %v9250_v33  ;;  %v6130_v33 = vld [vmem:[%s12921_s4 + $0x100] sm:$0xff]  ;;  %v9390_v20 = vpack.c.bf16 %v6229_v18, %v6228_v37 }
 0x30f   : > { %9191 = vmatprep.subr.bf16.mxu1 %v9190_v38  ;;  %9255 = vmatprep.subr.bf16.mxu0 %v9254_v25  ;;  %v9290_v28 = vpack.c.bf16 %v6131_v40, %v6130_v33  ;;  %v6232_v40 = vld [vmem:[%s12921_s4 + $0x430] sm:$0xff] }
 0x310   : > { %8104 = vmatmul.mubr.f32.gmra.mrb[174].mxu1 %v12975_v35  ;;  %8216 = vmatmul.mubr.f32.gmra.mrb[222].mxu0 %v12975_v35 }
 0x311   : > { %9193 = vmatpush3.bf16.msra.mxu1 %v9190_v38  ;;  %8138 = vmatprep.mubr.f32.mxu1 %v12975_v35  ;;  %v9294_v38 = vpack.c.bf16 %v6133_v26, %v6132_v55  ;;  %v6234_v26 = vld [vmem:[%s12921_s4 + $0x440] sm:$0xff] }
 0x312   : > { %9257 = vmatpush3.bf16.msra.mxu0 %v9254_v25  ;;  %8250 = vmatprep.mubr.f32.mxu0 %v12975_v35  ;;  %v6134_v25 = vld [vmem:[%s12921_s4 + $0x120] sm:$0xff] }
 0x313   : > { %9259 = vmatprep.subr.bf16.mxu1 %v9258_v21  ;;  %9355 = vmatprep.subr.bf16.mxu0 %v9354_v27  ;;  %v9298_v47 = vpack.c.bf16 %v6135_v62, %v6134_v25  ;;  %v6236_v62 = vld [vmem:[%s12921_s4 + $0x450] sm:$0xff] }
 0x314   : > { %8139 = vmatmul.mubr.f32.vlgmr.msra.gmra.mrb[160].mxu1 %v12975_v35 }
 0x315   : > { %8251 = vmatmul.mubr.f32.vlgmr.msra.gmra.mrb[224].mxu0 %v12975_v35  ;;  %8141 = vmatprep.mubr.f32.mxu1 %v12348_v24 }
 0x316   : > { %8253 = vmatprep.mubr.f32.mxu0 %v12348_v24  ;;  %9261 = vmatpush3.bf16.msra.mxu1 %v9258_v21  ;;  %v9302_v21 = vpack.c.bf16 %v6137_v5, %v6136_v7  ;;  %v6238_v5 = vld [vmem:[%s12921_s4 + $0x460] sm:$0xff] }
 0x317   : > { %9357 = vmatpush3.bf16.msra.mxu0 %v9354_v27  ;;  %9263 = vmatprep.subr.bf16.mxu1 %v9262_v0  ;;  %v6138_v27 = vld [vmem:[%s12921_s4 + $0x140] sm:$0xff] }
 0x318   : > { %8142 = vmatmul.mubr.f32.gmra.mrb[162].mxu1 %v12975_v35  ;;  %9359 = vmatprep.subr.bf16.mxu0 %v9358_v23  ;;  %v9306_v60 = vpack.c.bf16 %v6139_v10, %v6138_v27  ;;  %v6240_v10 = vld [vmem:[%s12921_s4 + $0x470] sm:$0xff] }
 0x319   : > { %8254 = vmatmul.mubr.f32.gmra.mrb[226].mxu0 %v12975_v35  ;;  %8144 = vmatprep.mubr.f32.mxu1 %v12350_v3 }
 0x31a   : > { %8256 = vmatprep.mubr.f32.mxu0 %v12350_v3  ;;  %9265 = vmatpush3.bf16.msra.mxu1 %v9262_v0  ;;  %v9310_v0 = vpack.c.bf16 %v6141_v48, %v6140_v50 }
 0x31b   : > { %9361 = vmatpush3.bf16.msra.mxu0 %v9358_v23  ;;  %9267 = vmatprep.subr.bf16.mxu1 %v9266_v4  ;;  %v6142_v23 = vld [vmem:[%s12921_s4 + $0x160] sm:$0xff] }
 0x31c   : > { %8145 = vmatmul.mubr.f32.gmra.mrb[164].mxu1 %v12975_v35  ;;  %9363 = vmatprep.subr.bf16.mxu0 %v9362_v32  ;;  %v9314_v44 = vpack.c.bf16 %v6143_v41, %v6142_v23 }
 0x31d   : > { %8257 = vmatmul.mubr.f32.gmra.mrb[228].mxu0 %v12975_v35  ;;  %8147 = vmatprep.mubr.f32.mxu1 %v12373_v56 }
 0x31e   : > { %8259 = vmatprep.mubr.f32.mxu0 %v12373_v56  ;;  %9269 = vmatpush3.bf16.msra.mxu1 %v9266_v4  ;;  %v9318_v4 = vpack.c.bf16 %v6145_v52, %v6144_v51 }
 0x31f   : > { %9365 = vmatpush3.bf16.msra.mxu0 %v9362_v32  ;;  %9271 = vmatprep.subr.bf16.mxu1 %v9270_v58  ;;  %v6194_v32 = vld [vmem:[%s12921_s4 + $0x300] sm:$0xff] }
 0x320   : > { %8148 = vmatmul.mubr.f32.gmra.mrb[166].mxu1 %v12975_v35  ;;  %9367 = vmatprep.subr.bf16.mxu0 %v9366_v45  ;;  %v9322_v16 = vpack.c.bf16 %v6195_v2, %v6194_v32 }
 0x321   : > { %8260 = vmatmul.mubr.f32.gmra.mrb[230].mxu0 %v12975_v35  ;;  %8150 = vmatprep.mubr.f32.mxu1 %v12392_v36 }
 0x322   : > { %8262 = vmatprep.mubr.f32.mxu0 %v12392_v36  ;;  %9273 = vmatpush3.bf16.msra.mxu1 %v9270_v58  ;;  %v9326_v58 = vpack.c.bf16 %v6197_v1, %v6196_v53 }
 0x323   : > { %9369 = vmatpush3.bf16.msra.mxu0 %v9366_v45  ;;  %9275 = vmatprep.subr.bf16.mxu1 %v9274_v22  ;;  %v6198_v45 = vld [vmem:[%s12921_s4 + $0x320] sm:$0xff] }
 0x324   : > { %8151 = vmatmul.mubr.f32.gmra.mrb[168].mxu1 %v12975_v35  ;;  %9371 = vmatprep.subr.bf16.mxu0 %v9370_v19  ;;  %v9330_v9 = vpack.c.bf16 %v6199_v34, %v6198_v45 }
 0x325   : > { %8263 = vmatmul.mubr.f32.gmra.mrb[232].mxu0 %v12975_v35  ;;  %8153 = vmatprep.mubr.f32.mxu1 %v12411_v31 }
 0x326   : > { %8265 = vmatprep.mubr.f32.mxu0 %v12411_v31  ;;  %9277 = vmatpush3.bf16.msra.mxu1 %v9274_v22  ;;  %v9334_v22 = vpack.c.bf16 %v6201_v39, %v6200_v59 }
 0x327   : > { %9373 = vmatpush3.bf16.msra.mxu0 %v9370_v19  ;;  %9279 = vmatprep.subr.bf16.mxu1 %v9278_v63  ;;  %v6203_v19 = vld [vmem:[%s12921_s4 + $0x348] sm:$0xff] }
 0x328   : > { %8154 = vmatmul.mubr.f32.gmra.mrb[170].mxu1 %v12975_v35  ;;  %9375 = vmatprep.subr.bf16.mxu0 %v9374_v49 }
 0x329   : > { %8266 = vmatmul.mubr.f32.gmra.mrb[234].mxu0 %v12975_v35  ;;  %8156 = vmatprep.mubr.f32.mxu1 %v12430_v11 }
 0x32a   : > { %8268 = vmatprep.mubr.f32.mxu0 %v12430_v11  ;;  %9281 = vmatpush3.bf16.msra.mxu1 %v9278_v63  ;;  %v6206_v63 = vld [vmem:[%s12921_s4 + $0x360] sm:$0xff] }
 0x32b   : > { %9377 = vmatpush3.bf16.msra.mxu0 %v9374_v49  ;;  %9283 = vmatprep.subr.bf16.mxu1 %v9282_v42  ;;  %v6207_v49 = vld [vmem:[%s12921_s4 + $0x368] sm:$0xff] }
 0x32c   : > { %8157 = vmatmul.mubr.f32.gmra.mrb[172].mxu1 %v12975_v35  ;;  %9379 = vmatprep.subr.bf16.mxu0 %v9378_v30  ;;  %v9346_v12 = vpack.c.bf16 %v6207_v49, %v6206_v63 }
 0x32d   : > { %8269 = vmatmul.mubr.f32.gmra.mrb[236].mxu0 %v12975_v35  ;;  %8159 = vmatprep.mubr.f32.mxu1 %v12449_v29 }
 0x32e   : > { %8271 = vmatprep.mubr.f32.mxu0 %v12449_v29  ;;  %9285 = vmatpush3.bf16.msra.mxu1 %v9282_v42  ;;  %v6226_v42 = vld [vmem:[%s12921_s4 + $0x400] sm:$0xff] }
 0x32f   : > { %9381 = vmatpush3.bf16.msra.mxu0 %v9378_v30  ;;  %9287 = vmatprep.subr.bf16.mxu1 %v9286_v43  ;;  %v6227_v30 = vld [vmem:[%s12921_s4 + $0x408] sm:$0xff] }
 0x330   : > { %8160 = vmatmul.mubr.f32.gmra.mrb[174].mxu1 %v12975_v35  ;;  %9383 = vmatprep.subr.bf16.mxu0 %v9382_v8  ;;  %v9386_v15 = vpack.c.bf16 %v6227_v30, %v6226_v42 }
 0x331   : > { %8272 = vmatmul.mubr.f32.gmra.mrb[238].mxu0 %v12975_v35  ;;  %8306 = vmatprep.mubr.f32.mxu1 %v12348_v24 }
 0x332   : > { %9289 = vmatpush3.bf16.msra.mxu1 %v9286_v43  ;;  %8474 = vmatprep.mubr.f32.mxu0 %v12350_v3  ;;  %v6230_v43 = vld [vmem:[%s12921_s4 + $0x420] sm:$0xff] }
 0x333   : > { %9385 = vmatpush3.bf16.msra.mxu0 %v9382_v8  ;;  %9291 = vmatprep.subr.bf16.mxu1 %v9290_v28  ;;  %v6231_v8 = vld [vmem:[%s12921_s4 + $0x428] sm:$0xff] }
 0x334   : > { %v9394_v33 = vpack.c.bf16 %v6231_v8, %v6230_v43 }
 0x335   : > { %8307 = vmatmul.mubr.f32.vlgmr.msra.gmra.mrb[176].mxu1 %v12975_v35 }
 0x336   : > { %8475 = vmatmul.mubr.f32.vlgmr.msra.gmra.mrb[240].mxu0 %v12975_v35  ;;  %8309 = vmatprep.mubr.f32.mxu1 %v12350_v3 }
 0x337   : > { %9293 = vmatpush3.bf16.msra.mxu1 %v9290_v28  ;;  %8477 = vmatprep.mubr.f32.mxu0 %v12373_v56  ;;  %v6233_v28 = vld [vmem:[%s12921_s4 + $0x438] sm:$0xff] }
 0x338   : > { %9295 = vmatprep.subr.bf16.mxu1 %v9294_v38  ;;  %v9398_v55 = vpack.c.bf16 %v6233_v28, %v6232_v40 }
 0x339   : > { %8310 = vmatmul.mubr.f32.gmra.mrb[178].mxu1 %v12975_v35 }
 0x33a   : > { %8478 = vmatmul.mubr.f32.gmra.mrb[242].mxu0 %v12975_v35  ;;  %8312 = vmatprep.mubr.f32.mxu1 %v12373_v56 }
 0x33b   : > { %9297 = vmatpush3.bf16.msra.mxu1 %v9294_v38  ;;  %8480 = vmatprep.mubr.f32.mxu0 %v12392_v36  ;;  %v6235_v38 = vld [vmem:[%s12921_s4 + $0x448] sm:$0xff] }
 0x33c   : > { %9299 = vmatprep.subr.bf16.mxu1 %v9298_v47  ;;  %v9402_v25 = vpack.c.bf16 %v6235_v38, %v6234_v26 }
 0x33d   : > { %8313 = vmatmul.mubr.f32.gmra.mrb[180].mxu1 %v12975_v35 }
 0x33e   : > { %8481 = vmatmul.mubr.f32.gmra.mrb[244].mxu0 %v12975_v35  ;;  %8315 = vmatprep.mubr.f32.mxu1 %v12392_v36 }
 0x33f   : > { %9301 = vmatpush3.bf16.msra.mxu1 %v9298_v47  ;;  %8483 = vmatprep.mubr.f32.mxu0 %v12411_v31  ;;  %v6237_v47 = vld [vmem:[%s12921_s4 + $0x458] sm:$0xff] }
 0x340   : > { %9303 = vmatprep.subr.bf16.mxu1 %v9302_v21  ;;  %v9406_v7 = vpack.c.bf16 %v6237_v47, %v6236_v62 }
 0x341   : > { %8316 = vmatmul.mubr.f32.gmra.mrb[182].mxu1 %v12975_v35 }
 0x342   : > { %8484 = vmatmul.mubr.f32.gmra.mrb[246].mxu0 %v12975_v35  ;;  %8318 = vmatprep.mubr.f32.mxu1 %v12411_v31 }
 0x343   : > { %9305 = vmatpush3.bf16.msra.mxu1 %v9302_v21  ;;  %8486 = vmatprep.mubr.f32.mxu0 %v12430_v11  ;;  %v6239_v21 = vld [vmem:[%s12921_s4 + $0x468] sm:$0xff] }
 0x344   : > { %9307 = vmatprep.subr.bf16.mxu1 %v9306_v60  ;;  %v9410_v27 = vpack.c.bf16 %v6239_v21, %v6238_v5 }
 0x345   : > { %8319 = vmatmul.mubr.f32.gmra.mrb[184].mxu1 %v12975_v35 }
 0x346   : > { %8487 = vmatmul.mubr.f32.gmra.mrb[248].mxu0 %v12975_v35  ;;  %8321 = vmatprep.mubr.f32.mxu1 %v12430_v11 }
 0x347   : > { %9309 = vmatpush3.bf16.msra.mxu1 %v9306_v60  ;;  %8489 = vmatprep.mubr.f32.mxu0 %v12449_v29  ;;  %v6241_v60 = vld [vmem:[%s12921_s4 + $0x478] sm:$0xff] }
 0x348   : > { %9311 = vmatprep.subr.bf16.mxu1 %v9310_v0  ;;  %v9414_v50 = vpack.c.bf16 %v6241_v60, %v6240_v10 }
 0x349   : > { %8322 = vmatmul.mubr.f32.gmra.mrb[186].mxu1 %v12975_v35 }
 0x34a   : > { %8490 = vmatmul.mubr.f32.gmra.mrb[250].mxu0 %v12975_v35  ;;  %8324 = vmatprep.mubr.f32.mxu1 %v12449_v29 }
 0x34b   : > { %9313 = vmatpush3.bf16.msra.mxu1 %v9310_v0  ;;  %8492 = vmatprep.mubr.f32.mxu0 %v12468_v14 }
 0x34c   : > { %9315 = vmatprep.subr.bf16.mxu1 %v9314_v44 }
 0x34d   : > { %8325 = vmatmul.mubr.f32.gmra.mrb[188].mxu1 %v12975_v35 }
 0x34e   : > { %8327 = vmatprep.mubr.f32.mxu1 %v12468_v14  ;;  %8493 = vmatmul.mubr.f32.gmra.mrb[252].mxu0 %v12975_v35 }
 0x34f   : > { %9317 = vmatpush3.bf16.msra.mxu1 %v9314_v44  ;;  %8495 = vmatprep.mubr.f32.mxu0 %v12975_v35 }
 0x350   : > { %9319 = vmatprep.subr.bf16.mxu1 %v9318_v4 }
 0x351   : > { %8328 = vmatmul.mubr.f32.gmra.mrb[190].mxu1 %v12975_v35 }
 0x352   : > { %8362 = vmatprep.mubr.f32.mxu1 %v12975_v35  ;;  %8496 = vmatmul.mubr.f32.gmra.mrb[254].mxu0 %v12975_v35 }
 0x353   : > { %9321 = vmatpush3.bf16.msra.mxu1 %v9318_v4 }
 0x354   : > { %9323 = vmatprep.subr.bf16.mxu1 %v9322_v16 }
 0x356   : > { %8363 = vmatmul.mubr.f32.vlgmr.msra.gmra.mrb[176].mxu1 %v12975_v35 }
 0x357   : > { %8365 = vmatprep.mubr.f32.mxu1 %v12348_v24  ;;  %9325 = vmatpush3.bf16.msra.mxu1 %v9322_v16  ;;  %v6202_v24 = vld [vmem:[%s12921_s4 + $0x340] sm:$0xff] }
 0x358   : > { %9327 = vmatprep.subr.bf16.mxu1 %v9326_v58  ;;  %v9338_v46 = vpack.c.bf16 %v6203_v19, %v6202_v24 }
 0x35a   : > { %8366 = vmatmul.mubr.f32.gmra.mrb[178].mxu1 %v12975_v35 }
 0x35b   : > { %8368 = vmatprep.mubr.f32.mxu1 %v12350_v3  ;;  %9329 = vmatpush3.bf16.msra.mxu1 %v9326_v58 }
 0x35c   : > { %9331 = vmatprep.subr.bf16.mxu1 %v9330_v9 }
 0x35e   : > { %8369 = vmatmul.mubr.f32.gmra.mrb[180].mxu1 %v12975_v35 }
 0x35f   : > { %8371 = vmatprep.mubr.f32.mxu1 %v12373_v56  ;;  %9333 = vmatpush3.bf16.msra.mxu1 %v9330_v9 }
 0x360   : > { %9335 = vmatprep.subr.bf16.mxu1 %v9334_v22 }
 0x362   : > { %8372 = vmatmul.mubr.f32.gmra.mrb[182].mxu1 %v12975_v35 }
 0x363   : > { %8374 = vmatprep.mubr.f32.mxu1 %v12392_v36  ;;  %9337 = vmatpush3.bf16.msra.mxu1 %v9334_v22 }
 0x364   : > { %9339 = vmatprep.subr.bf16.mxu1 %v9338_v46 }
 0x366   : > { %8375 = vmatmul.mubr.f32.gmra.mrb[184].mxu1 %v12975_v35 }
 0x367   : > { %8377 = vmatprep.mubr.f32.mxu1 %v12411_v31  ;;  %9341 = vmatpush3.bf16.msra.mxu1 %v9338_v46 }
 0x368   : > { %9343 = vmatprep.subr.bf16.mxu1 %v9342_v57 }
 0x36a   : > { %8378 = vmatmul.mubr.f32.gmra.mrb[186].mxu1 %v12975_v35 }
 0x36b   : > { %8380 = vmatprep.mubr.f32.mxu1 %v12430_v11  ;;  %9345 = vmatpush3.bf16.msra.mxu1 %v9342_v57 }
 0x36c   : > { %9347 = vmatprep.subr.bf16.mxu1 %v9346_v12 }
 0x36e   : > { %8381 = vmatmul.mubr.f32.gmra.mrb[188].mxu1 %v12975_v35 }
 0x36f   : > { %8383 = vmatprep.mubr.f32.mxu1 %v12449_v29  ;;  %9349 = vmatpush3.bf16.msra.mxu1 %v9346_v12 }
 0x370   : > { %9351 = vmatprep.subr.bf16.mxu1 %v9350_v13 }
 0x372   : > { %8384 = vmatmul.mubr.f32.gmra.mrb[190].mxu1 %v12975_v35 }
 0x373   : > { %9353 = vmatpush3.bf16.msra.mxu1 %v9350_v13  ;;  %8418 = vmatprep.mubr.f32.mxu1 %v12350_v3 }
 0x374   : > { %9387 = vmatprep.subr.bf16.mxu1 %v9386_v15 }
 0x376   : > { %8419 = vmatmul.mubr.f32.vlgmr.msra.gmra.mrb[160].mxu1 %v12975_v35 }
 0x377   : > { %8421 = vmatprep.mubr.f32.mxu1 %v12373_v56  ;;  %9389 = vmatpush3.bf16.msra.mxu1 %v9386_v15 }
 0x378   : > { %9391 = vmatprep.subr.bf16.mxu1 %v9390_v20 }
 0x37a   : > { %8422 = vmatmul.mubr.f32.gmra.mrb[162].mxu1 %v12975_v35 }
 0x37b   : > { %8424 = vmatprep.mubr.f32.mxu1 %v12392_v36  ;;  %9393 = vmatpush3.bf16.msra.mxu1 %v9390_v20 }
 0x37c   : > { %9395 = vmatprep.subr.bf16.mxu1 %v9394_v33 }
 0x37e   : > { %8425 = vmatmul.mubr.f32.gmra.mrb[164].mxu1 %v12975_v35 }
 0x37f   : > { %8427 = vmatprep.mubr.f32.mxu1 %v12411_v31  ;;  %9397 = vmatpush3.bf16.msra.mxu1 %v9394_v33 }
 0x380   : > { %9399 = vmatprep.subr.bf16.mxu1 %v9398_v55 }
 0x382   : > { %8428 = vmatmul.mubr.f32.gmra.mrb[166].mxu1 %v12975_v35 }
 0x383   : > { %8430 = vmatprep.mubr.f32.mxu1 %v12430_v11  ;;  %9401 = vmatpush3.bf16.msra.mxu1 %v9398_v55 }
 0x384   : > { %9403 = vmatprep.subr.bf16.mxu1 %v9402_v25 }
 0x386   : > { %8431 = vmatmul.mubr.f32.gmra.mrb[168].mxu1 %v12975_v35 }
 0x387   : > { %8433 = vmatprep.mubr.f32.mxu1 %v12449_v29  ;;  %9405 = vmatpush3.bf16.msra.mxu1 %v9402_v25 }
 0x388   : > { %9407 = vmatprep.subr.bf16.mxu1 %v9406_v7 }
 0x38a   : > { %8434 = vmatmul.mubr.f32.gmra.mrb[170].mxu1 %v12975_v35 }
 0x38b   : > { %8436 = vmatprep.mubr.f32.mxu1 %v12468_v14  ;;  %9409 = vmatpush3.bf16.msra.mxu1 %v9406_v7 }
 0x38c   : > { %9411 = vmatprep.subr.bf16.mxu1 %v9410_v27 }
 0x38e   : > { %8437 = vmatmul.mubr.f32.gmra.mrb[172].mxu1 %v12975_v35 }
 0x38f   : > { %9413 = vmatpush3.bf16.msra.mxu1 %v9410_v27  ;;  %8439 = vmatprep.mubr.f32.mxu1 %v12975_v35 }
 0x390   : > { %9415 = vmatprep.subr.bf16.mxu1 %v9414_v50 }
 0x392   : > { %8440 = vmatmul.mubr.f32.gmra.mrb[174].mxu1 %v12975_v35 }
 0x393   : > { %9417 = vmatpush3.bf16.msra.mxu1 %v9414_v50  ;;  %8530 = vmatprep.mubr.f32.mxu1 %v12350_v3 }
 0x396   : > { %8531 = vmatmul.mubr.f32.vlgmr.msra.gmra.mrb[176].mxu1 %v12975_v35 }
 0x397   : > { %8533 = vmatprep.mubr.f32.mxu1 %v12373_v56 }
 0x39a   : > { %8534 = vmatmul.mubr.f32.gmra.mrb[178].mxu1 %v12975_v35 }
 0x39b   : > { %8536 = vmatprep.mubr.f32.mxu1 %v12392_v36 }
 0x39e   : > { %8537 = vmatmul.mubr.f32.gmra.mrb[180].mxu1 %v12975_v35 }
 0x39f   : > { %8539 = vmatprep.mubr.f32.mxu1 %v12411_v31 }
 0x3a2   : > { %8540 = vmatmul.mubr.f32.gmra.mrb[182].mxu1 %v12975_v35 }
 0x3a3   : > { %8542 = vmatprep.mubr.f32.mxu1 %v12430_v11 }
 0x3a6   : > { %8543 = vmatmul.mubr.f32.gmra.mrb[184].mxu1 %v12975_v35 }
 0x3a7   : > { %8545 = vmatprep.mubr.f32.mxu1 %v12449_v29 }
 0x3aa   : > { %8546 = vmatmul.mubr.f32.gmra.mrb[186].mxu1 %v12975_v35 }
 0x3ab   : > { %8548 = vmatprep.mubr.f32.mxu1 %v12468_v14 }
 0x3ae   : > { %8549 = vmatmul.mubr.f32.gmra.mrb[188].mxu1 %v12975_v35 }
 0x3af   : > { %8551 = vmatprep.mubr.f32.mxu1 %v12975_v35 }
 0x3b2   : > { %8552 = vmatmul.mubr.f32.gmra.mrb[190].mxu1 %v12975_v35 }
 0x3c7   : > { %v8196_v3 = vpop.f32.mrb[208].mxu0 }
 0x3c8   : > { %v4425_v56 = vpop.f32.mrb[209].mxu0 }
 0x3cb   : > { %v8199_v36 = vpop.f32.mrb[210].mxu0 }
 0x3cc   : > { %v4434_v31 = vpop.f32.mrb[211].mxu0 }
 0x3cf   : > { %v8202_v48 = vpop.f32.mrb[212].mxu0 }
 0x3d0   : > { %v4443_v11 = vpop.f32.mrb[213].mxu0 }
 0x3d3   : > { %v8205_v0 = vpop.f32.mrb[214].mxu0 }
 0x3d4   : > { %v4452_v23 = vpop.f32.mrb[215].mxu0 }
 0x3d7   : > { %v8208_v41 = vpop.f32.mrb[216].mxu0 }
 0x3d8   : > { %v4461_v29 = vpop.f32.mrb[217].mxu0 }
 0x3db   : > { %v8211_v44 = vpop.f32.mrb[218].mxu0 }
 0x3dc   : > { %v4470_v51 = vpop.f32.mrb[219].mxu0 }
 0x3df   : > { %v8214_v52 = vpop.f32.mrb[220].mxu0 }
 0x3e0   : > { %v4479_v14 = vpop.f32.mrb[221].mxu0 }
 0x3e3   : > { %v8217_v4 = vpop.f32.mrb[222].mxu0 }
 0x3e4   : > { %v4488_v32 = vpop.f32.mrb[223].mxu0 }
 0x3e8   : > { %v8252_v2 = vpop.f32.mrb[224].mxu0 }
 0x3e9   : > { %v4562_v16 = vpop.f32.mrb[225].mxu0 }
 0x3ea   : > { %v4563_v53 = vadd.f32 %v4562_v16, %v4425_v56 }
 0x3ec   : > { %v8255_v35 = vpop.f32.mrb[226].mxu0 }
 0x3ed   : > { %v4571_v1 = vpop.f32.mrb[227].mxu0 }
 0x3ee   : > { %v4572_v58 = vadd.f32 %v4571_v1, %v4434_v31 }
 0x3f0   : > { %v8258_v45 = vpop.f32.mrb[228].mxu0 }
 0x3f1   : > { %v4580_v34 = vpop.f32.mrb[229].mxu0 }
 0x3f2   : > { %v4581_v9 = vadd.f32 %v4580_v34, %v4443_v11 }
 0x3f4   : > { %v8261_v59 = vpop.f32.mrb[230].mxu0 }
 0x3f5   : > { %v4589_v39 = vpop.f32.mrb[231].mxu0 }
 0x3f6   : > { %v4590_v22 = vadd.f32 %v4589_v39, %v4452_v23 }
 0x3f8   : > { %v8264_v24 = vpop.f32.mrb[232].mxu0 }
 0x3f9   : > { %v4598_v19 = vpop.f32.mrb[233].mxu0 }
 0x3fa   : > { %v4599_v46 = vadd.f32 %v4598_v19, %v4461_v29 }
 0x3fc   : > { %v8267_v6 = vpop.f32.mrb[234].mxu0 }
 0x3fd   : > { %v4607_v17 = vpop.f32.mrb[235].mxu0 }
 0x3fe   : > { %v4608_v57 = vadd.f32 %v4607_v17, %v4470_v51 }
 0x400   : > { %v8270_v63 = vpop.f32.mrb[236].mxu0 }
 0x401   : > { %v4616_v49 = vpop.f32.mrb[237].mxu0 }
 0x402   : > { %v4617_v12 = vadd.f32 %v4616_v49, %v4479_v14 }
 0x404   : > { %v8273_v54 = vpop.f32.mrb[238].mxu0 }
 0x405   : > { %v4625_v61 = vpop.f32.mrb[239].mxu0 }
 0x406   : > { %v4626_v13 = vadd.f32 %v4625_v61, %v4488_v32 }
 0x409   : > { %v8476_v42 = vpop.f32.mrb[240].mxu0 }
 0x40a   : > { %v5218_v30 = vpop.f32.mrb[241].mxu0 }
 0x40b   : > { %v12828_v15 = vadd.f32 %v5218_v30, %v4563_v53 }
 0x40d   : > { %v8479_v37 = vpop.f32.mrb[242].mxu0 }
 0x40e   : > { %v5227_v18 = vpop.f32.mrb[243].mxu0 }
 0x40f   : > { %v5290_v20 = vadd.f32 %v5227_v18, %v4572_v58 }
 0x411   : > { %v8482_v43 = vpop.f32.mrb[244].mxu0 }
 0x412   : > { %v5236_v8 = vpop.f32.mrb[245].mxu0 }
 0x413   : > { %v5291_v33 = vadd.f32 %v5236_v8, %v4581_v9 }
 0x415   : > { %v8485_v40 = vpop.f32.mrb[246].mxu0 }
 0x416   : > { %v5245_v28 = vpop.f32.mrb[247].mxu0 }
 0x417   : > { %v5292_v55 = vadd.f32 %v5245_v28, %v4590_v22 }
 0x419   : > { %v8488_v26 = vpop.f32.mrb[248].mxu0 }
 0x41a   : > { %v5254_v38 = vpop.f32.mrb[249].mxu0 }
 0x41b   : > { %v5293_v25 = vadd.f32 %v5254_v38, %v4599_v46 }
 0x41d   : > { %v8491_v62 = vpop.f32.mrb[250].mxu0 }
 0x41e   : > { %v5263_v47 = vpop.f32.mrb[251].mxu0 }
 0x41f   : > { %v5294_v7 = vadd.f32 %v5263_v47, %v4608_v57 }
 0x421   : > { %v8494_v5 = vpop.f32.mrb[252].mxu0 }
 0x422   : > { %v5272_v21 = vpop.f32.mrb[253].mxu0 }
 0x423   : > { %v5295_v27 = vadd.f32 %v5272_v21, %v4617_v12 }
 0x425   : > { %v8497_v10 = vpop.f32.mrb[254].mxu0 }
 0x426   : > { %v5281_v60 = vpop.f32.mrb[255].mxu0 }
 0x427   : > { %v5296_v50 = vadd.f32 %v5281_v60, %v4626_v13 }
 0x449   : > { %v8420_v3 = vpop.f32.mrb[160].mxu1 }
 0x44a   : > { %v5040_v56 = vpop.f32.mrb[161].mxu1  ;;  %v5494_v48 = vrot.slane %v8420_v3, 7 }
 0x44b   : > { %v5493_v61 = vrot.slane %v5040_v56, 7 }
 0x44d   : > { %v8423_v36 = vpop.f32.mrb[162].mxu1 }
 0x44e   : > { %v5050_v31 = vpop.f32.mrb[163].mxu1  ;;  %v5497_v44 = vrot.slane %v8423_v36, 7 }
 0x44f   : > { %v5495_v11 = vrot.slane %v5050_v31, 7 }
 0x451   : > { %v5496_v0 = vsel %vm3759_vm1, %v5494_v48, %v5495_v11  ;;  %v8426_v23 = vpop.f32.mrb[164].mxu1 }
 0x452   : > { %v5525_v41 = vadd.f32 %v5496_v0, %v5290_v20  ;;  %v5060_v29 = vpop.f32.mrb[165].mxu1  ;;  %v5500_v2 = vrot.slane %v8426_v23, 7 }
 0x453   : > { %v5498_v51 = vrot.slane %v5060_v29, 7 }
 0x455   : > { %v5499_v52 = vsel %vm3759_vm1, %v5497_v44, %v5498_v51  ;;  %v8429_v14 = vpop.f32.mrb[166].mxu1 }
 0x456   : > { %v5526_v4 = vadd.f32 %v5499_v52, %v5291_v33  ;;  %v5070_v32 = vpop.f32.mrb[167].mxu1  ;;  %v5503_v45 = vrot.slane %v8429_v14, 7 }
 0x457   : > { %v5501_v16 = vrot.slane %v5070_v32, 7 }
 0x459   : > { %v5502_v53 = vsel %vm3759_vm1, %v5500_v2, %v5501_v16  ;;  %v8432_v35 = vpop.f32.mrb[168].mxu1 }
 0x45a   : > { %v5527_v1 = vadd.f32 %v5502_v53, %v5292_v55  ;;  %v5080_v58 = vpop.f32.mrb[169].mxu1  ;;  %v5506_v24 = vrot.slane %v8432_v35, 7 }
 0x45b   : > { %v5504_v34 = vrot.slane %v5080_v58, 7 }
 0x45d   : > { %v5505_v9 = vsel %vm3759_vm1, %v5503_v45, %v5504_v34  ;;  %v8435_v59 = vpop.f32.mrb[170].mxu1 }
 0x45e   : > { %v5528_v39 = vadd.f32 %v5505_v9, %v5293_v25  ;;  %v5090_v22 = vpop.f32.mrb[171].mxu1  ;;  %v5509_v63 = vrot.slane %v8435_v59, 7 }
 0x45f   : > { %v5507_v19 = vrot.slane %v5090_v22, 7 }
 0x461   : > { %v5508_v46 = vsel %vm3759_vm1, %v5506_v24, %v5507_v19  ;;  %v8438_v6 = vpop.f32.mrb[172].mxu1 }
 0x462   : > { %v5529_v17 = vadd.f32 %v5508_v46, %v5294_v7  ;;  %v5100_v57 = vpop.f32.mrb[173].mxu1  ;;  %v5512_v37 = vrot.slane %v8438_v6, 7 }
 0x463   : > { %v5510_v49 = vrot.slane %v5100_v57, 7 }
 0x465   : > { %v5511_v12 = vsel %vm3759_vm1, %v5509_v63, %v5510_v49  ;;  %v8441_v54 = vpop.f32.mrb[174].mxu1 }
 0x466   : > { %v5530_v13 = vadd.f32 %v5511_v12, %v5295_v27  ;;  %v5476_v42 = vrot.slane %v8441_v54, 7  ;;  %v5110_v30 = vpop.f32.mrb[175].mxu1 }
 0x467   : > { %v5513_v18 = vrot.slane %v5110_v30, 7 }
 0x468   : > { %v5523_v20 = vsel %vm3759_vm1, %v5476_v42, %v5493_v61 }
 0x469   : > { %v5524_v43 = vadd.f32 %v5523_v20, %v12828_v15  ;;  %v5514_v8 = vsel %vm3759_vm1, %v5512_v37, %v5513_v18  ;;  %v8532_v33 = vpop.f32.mrb[176].mxu1 }
 0x46a   : > { %v5549_v40 = vrot.slane %v8532_v33, 1  ;;  %v5380_v28 = vpop.f32.mrb[177].mxu1  ;;  %v5531_v55 = vadd.f32 %v5514_v8, %v5296_v50 }
 0x46b   : > { %v5548_v26 = vrot.slane %v5380_v28, 1 }
 0x46d   : > { %v5550_v38 = vsel %vm3839_vm0, %v5548_v26, %v5549_v40  ;;  %v8535_v25 = vpop.f32.mrb[178].mxu1 }
 0x46e   : > { %v12840_v62 = vadd.f32 %v5550_v38, %v5524_v43  ;;  %v5552_v47 = vrot.slane %v8535_v25, 1  ;;  %v5390_v7 = vpop.f32.mrb[179].mxu1 }
 0x46f   : > { %v5551_v5 = vrot.slane %v5390_v7, 1 }
 0x470   : > { %v5588_v35 = vmul.f32 %v12840_v62, %v12840_v62 }
 0x471   : > { %v5553_v21 = vsel %vm3839_vm0, %v5551_v5, %v5552_v47  ;;  %v8538_v27 = vpop.f32.mrb[180].mxu1 }
 0x472   : > { %v12843_v10 = vadd.f32 %v5553_v21, %v5525_v41  ;;  %v5555_v15 = vrot.slane %v8538_v27, 1  ;;  %v5400_v60 = vpop.f32.mrb[181].mxu1 }
 0x473   : > { %v5554_v3 = vrot.slane %v5400_v60, 1 }
 0x474   : > { %v5589_v32 = vmul.f32 %v12843_v10, %v12843_v10 }
 0x475   : > { %v5556_v56 = vsel %vm3839_vm0, %v5554_v3, %v5555_v15  ;;  %v8541_v50 = vpop.f32.mrb[182].mxu1 }
 0x476   : > { %v12846_v36 = vadd.f32 %v5556_v56, %v5526_v4  ;;  %v5558_v31 = vrot.slane %v8541_v50, 1  ;;  %v5410_v48 = vpop.f32.mrb[183].mxu1  ;;  %v5596_v34 = vadd.f32 %v5589_v32, %v5588_v35 }
 0x477   : > { %v5557_v11 = vrot.slane %v5410_v48, 1 }
 0x479   : > { %v5559_v0 = vsel %vm3839_vm0, %v5557_v11, %v5558_v31  ;;  %v8544_v23 = vpop.f32.mrb[184].mxu1 }
 0x47a   : > { %v12849_v29 = vadd.f32 %v5559_v0, %v5527_v1  ;;  %v5561_v44 = vrot.slane %v8544_v23, 1  ;;  %v5420_v51 = vpop.f32.mrb[185].mxu1  ;;  %v5590_v1 = vmul.f32 %v12846_v36, %v12846_v36 }
 0x47b   : > { %v5560_v41 = vrot.slane %v5420_v51, 1 }
 0x47c   : > { %v5591_v9 = vmul.f32 %v12849_v29, %v12849_v29  ;;  %v5597_v46 = vadd.f32 %v5596_v34, %v5590_v1 }
 0x47d   : > { %v5562_v52 = vsel %vm3839_vm0, %v5560_v41, %v5561_v44  ;;  %v8547_v14 = vpop.f32.mrb[186].mxu1 }
 0x47e   : > { %v5584_v2 = vadd.f32 %v5562_v52, %v5528_v39  ;;  %v5564_v4 = vrot.slane %v8547_v14, 1  ;;  %v5430_v16 = vpop.f32.mrb[187].mxu1  ;;  %v5598_v61 = vadd.f32 %v5597_v46, %v5591_v9 }
 0x47f   : > { %v5563_v53 = vrot.slane %v5430_v16, 1 }
 0x480   : > { %v5592_v19 = vmul.f32 %v5584_v2, %v5584_v2 }
 0x481   : > { %v5565_v58 = vsel %vm3839_vm0, %v5563_v53, %v5564_v4  ;;  %v8550_v45 = vpop.f32.mrb[188].mxu1 }
 0x482   : > { %v5585_v59 = vadd.f32 %v5565_v58, %v5529_v17  ;;  %v5567_v22 = vrot.slane %v8550_v45, 1  ;;  %v5440_v24 = vpop.f32.mrb[189].mxu1  ;;  %v5599_v37 = vadd.f32 %v5598_v61, %v5592_v19 }
 0x483   : > { %v5566_v39 = vrot.slane %v5440_v24, 1 }
 0x484   : > { %v5593_v54 = vmul.f32 %v5585_v59, %v5585_v59 }
 0x485   : > { %v5568_v6 = vsel %vm3839_vm0, %v5566_v39, %v5567_v22  ;;  %v8553_v57 = vpop.f32.mrb[190].mxu1 }
 0x486   : > { %v5570_v63 = vrot.slane %v8553_v57, 1  ;;  %v5450_v49 = vpop.f32.mrb[191].mxu1  ;;  %v5586_v12 = vadd.f32 %v5568_v6, %v5530_v13  ;;  %v5600_v17 = vadd.f32 %v5599_v37, %v5593_v54 }
 0x487   : > { %v5569_v42 = vrot.slane %v5450_v49, 1 }
 0x488   : > { %v5594_v30 = vmul.f32 %v5586_v12, %v5586_v12 }
 0x489   : > { %v5571_v18 = vsel %vm3839_vm0, %v5569_v42, %v5570_v63 }
 0x48a   : > { %v5587_v20 = vadd.f32 %v5571_v18, %v5531_v55  ;;  %v5601_v8 = vadd.f32 %v5600_v17, %v5594_v30 }
 0x48c   : > { %v5595_v43 = vmul.f32 %v5587_v20, %v5587_v20 }
 0x48e   : > { %v5602_v33 = vadd.f32 %v5601_v8, %v5595_v43 }
 0x490   : > { %5603 = vadd.xlane.f32.xlu0 %v5602_v33 }
 0x51d   : > { %v5604_v40 = vpop.xlane.xlu0 %5603 }
 0x51e   : > { %v5605_v28 = vrot.slane %v5604_v40, 4 }
 0x520   : > { %v5606_v26 = vadd.f32 %v5605_v28, %v5604_v40 }
 0x522   : > { %v5607_v38 = vrot.slane %v5606_v26, 2 }
 0x524   : > { %v5608_v13 = vadd.f32 %v5607_v38, %v5606_v26 }
 0x526   : > { %v5609_v25 = vrot.slane %v5608_v13, 1 }
 0x528   : > { %v5610_v47 = vadd.f32 %v5609_v25, %v5608_v13 }
 0x52a   : > { %9658 = vpush %v5610_v47 }
 0x55b   : > { %s9659_s8 = spop %9658 }
 0x55c   : > { %s5612_s13 = smax.f32 %s9772_s9, %s9659_s8 }
 0x55d   : > { %v5613_v7 = vstv %s5612_s13 }
 0x55e   : > { %9705 = vrsqrt.f32 %v5613_v7 }
 0x568   : > { %v9706_v55 = vpop.eup %9705 }
 0x569   : > { %9660 = vpush %v9706_v55 }
 0x59a   : > { %s9661_s26 = spop %9660 }
 0x59b   : > { %v5616_v5 = vstv %s9661_s26 }
 0x59c   : > { %v5617_v21 = vmul.f32 %v5616_v5, %v12840_v62  ;;  %v5618_v27 = vmul.f32 %v5616_v5, %v12843_v10  ;;  %v5619_v15 = vmul.f32 %v5616_v5, %v12846_v36  ;;  %v5620_v60 = vmul.f32 %v5616_v5, %v12849_v29 }
 0x59d   : > { %v5621_v3 = vmul.f32 %v5616_v5, %v5584_v2  ;;  %v5622_v56 = vmul.f32 %v5616_v5, %v5585_v59  ;;  %v5623_v50 = vmul.f32 %v5616_v5, %v5586_v12  ;;  %v5624_v62 = vmul.f32 %v5616_v5, %v5587_v20 }
 0x59e   : > { %5625 = vst [vmem:[%s232_s14] sm:$0xff] %v5617_v21  ;;  %5626 = vst [vmem:[%s232_s14 + $0x8] sm:$0xff] %v5618_v27 }
 0x59f   : > { %5627 = vst [vmem:[%s232_s14 + $0x10] sm:$0xff] %v5619_v15  ;;  %5628 = vst [vmem:[%s232_s14 + $0x18] sm:$0xff] %v5620_v60 }
 0x5a0   : > { %5629 = vst [vmem:[%s232_s14 + $0x20] sm:$0xff] %v5621_v3  ;;  %5630 = vst [vmem:[%s232_s14 + $0x28] sm:$0xff] %v5622_v56 }
 0x5a1   : > { %5631 = vst [vmem:[%s232_s14 + $0x30] sm:$0xff] %v5623_v50  ;;  %5632 = vst [vmem:[%s232_s14 + $0x38] sm:$0xff] %v5624_v62 }
 0x5a2   : > { %9720 = shalt.err (!%p9717_p3)
}
 0x5a3   : > { %s9721_s8 = scalar_lea.hbm %s12872_s23, 1024  ;;  %s9725_s10 = scalar_lea.hbm %s12922_s5, 2048 }
 0x5a4   : > { %p9722_p4 = scmp.ne.s32.totalorder %s12872_s23, %s9721_s8  ;;  %p9726_p9 = scmp.lt.u32.totalorder %s12872_s23, %s12922_s5 }
 0x5a5   : > { %p9727_p10 = scmp.lt.u32.totalorder %s9725_s10, %s9721_s8  ;;  %p9729_p12 = scmp.lt.u32.totalorder %s9721_s8, %s12872_s23 }
 0x5a6   : > { %p9723_p7 = pnand %p9722_p4, %p9844_p5 }
 0x5a7   : > { %p9728_p11 = por %p9727_p10, %p9726_p9 }
 0x5a8   : > { %p9724_p8 = pneg %p9723_p7 }
 0x5a9   : > { %p9730_p13 = por %p9729_p12, %p9728_p11 }
 0x5ab   : > { %p9731_p0 = pnand %p9730_p13, %p9724_p8 }
 0x5ad   : > { %9734 = shalt.err (!%p9731_p0)
}
 0x5ae   : > { %s9774_s14 = smov 128   ;;  %s9775_s26 = smov 8  }
 0x5af   : > { %9662 = dma.vmem_to_hbm [thread:$0]  (%p9844_p5), %s12874_s15, 1024, %s12872_s23, %s12876_s22, %s9774_s14, %s9774_s14, %s9775_s26  }
 0x5b0 PF: > { %p9668_p1 = scmp.ge.s32.totalorder %s9769_s21, 2  ;;  %s5662_s16 = sand.u32 1, %s9757_s18  }
 0x5b1   : > { %s5663_s17 = scalar_lea.sflag [#allocation6], %s5662_s16 }
 0x5b2   : > { %p9665_p2 = pnand %p9668_p1, %p9848_p6 }
 0x5b4   : > { %9752 = dma.done.wait (!%p9665_p2), %s5663_s17, 1024  }
 0x5b5   : > { %9754 = vsyncadd (!%p9665_p2), %s5663_s17, 4294966272  ;;  %p15_p3 = scmp.ge.s32.totalorder %s9831_s24, 4   ;;  %s12978_s18 = smov %s9761_s19 }
 0x5b6   : > { %s12979_s19 = smov %s9765_s20  ;;  %s12980_s20 = smov %s9842_s27 }
 0x5b7   : > { %s12981_s21 = smov %s9831_s24  ;;  %17 = sbr.rel (!%p15_p3) target bundleno = 3 (0x3), region = 111 }
 0x5be   :  { %5668 = vsyncpa [#allocation6], 1 }
 0x5bf   :  { %5670 = vsyncpa [#allocation6 + $0x1], 1 }

</bundles_post_ra>
